<compile_context>
chip_gen: v6e
topology: v6e:2x2x1
jax: 0.10.0
libtpu: 0.0.40
codegen_flags: <defaults>
</compile_context>

<pallas_src>
import jax
import jax.numpy as jnp
from jax import lax
from jax.experimental import pallas as pl
from jax.experimental.pallas import tpu as pltpu

# ----------------------------- hyper-parameters ------------------------------
NB_CLASSES = 3
CHANS = 1            # module's Linear sizing requires Chans == 1 (see note)
SAMPLES = 64
KERN_LENGTH = 16
F1 = 4
D = 2
F2 = 8
C1 = F1 * D          # channels after block1 depthwise (= F1 * D)
KW2 = 16             # block2 depthwise kernel width (fixed by the module)
BN_EPS = 1e-5

T = SAMPLES
T1 = SAMPLES // 4    # width after block1 AvgPool2d((1, 4))
T2 = T1 // 8         # width after block2 AvgPool2d((1, 8)) == Samples // 32

assert CHANS == 1, "module's Linear sizing requires Chans == 1"
assert SAMPLES % 32 == 0


# --------------------------------- kernel ------------------------------------
def _eegnet_kernel(x_ref, tp_ref, am_ref, ba_ref, mb_ref, bb_ref, wc_ref,
                   bc_ref, out_ref, y_buf):
    """One batch tile; batch lives on the LANE axis of every activation.

    x_ref  : (B_TILE, T)     input tile in natural (N, T) layout
    tp_ref : (F1*T, T)       stacked conv1 'same' Toeplitz (MXU weights)
    am_ref : (C1*F1,) SMEM   folded (C1 x F1) feature-mix scalars
    ba_ref : (C1*T, 1)       stage-1 bias (per channel, repeated over time)
    mb_ref : (F2*T1, C1*T)   folded AvgPool(1,4)+depthwise+pointwise+BN3
    bb_ref : (F2*T1, 1)
    wc_ref : (K, F2*T1)      folded AvgPool(1,8)+Flatten+Linear
    bc_ref : (K, 1)
    out_ref: (K, B_TILE)     softmax probabilities (lane-dense stores)
    y_buf  : (C1*T, B_TILE)  VMEM scratch holding stage-1 activations
    """
    f32 = jnp.float32
    mxu_dtype = tp_ref.dtype          # f32 or bf16; accumulation is always f32

    def elu(v):
        # exp only on the non-positive branch (avoids +inf in the dead lane).
        # NOTE: jnp.expm1 would save one VALU op, but exp(min(v,0))-1 keeps the
        # same EUP slot usage and has guaranteed Mosaic lowering.
        return jnp.where(v > 0, v, jnp.exp(jnp.minimum(v, 0.0)) - 1.0)

    # --- stage 1a: conv1 Toeplitz on the MXU (F1*T rows, K = T) -------------
    xt = x_ref[...].T                                        # (T, B) small XLU transpose
    h = jnp.dot(tp_ref[...], xt.astype(mxu_dtype),
                preferred_element_type=f32)                  # (F1*T, B) f32

    # --- stage 1b: (C1 x F1) feature mix + bias + ELU on the VPU -------------
    # y[e*T + t, b] = ELU( sum_f A[e,f] * h[f*T + t, b] + bA[e*T + t] )
    hs = [h[f * T:(f + 1) * T, :] for f in range(F1)]        # F1 x (T, B), 8-aligned slices
    for e in range(C1):
        acc = am_ref[e * F1 + 0] * hs[0]
        for f in range(1, F1):
            acc = acc + am_ref[e * F1 + f] * hs[f]
        acc = elu(acc + ba_ref[e * T:(e + 1) * T, :])
        y_buf[e * T:(e + 1) * T, :] = acc.astype(y_buf.dtype)

    # --- stage 2: AvgPool(1,4) + block2 depthwise/pointwise + BN3, then ELU --
    z = jnp.dot(mb_ref[...], y_buf[...],
                preferred_element_type=f32) + bb_ref[...]    # (F2*T1, B)
    z = elu(z)

    # --- stage 3: AvgPool(1,8) + Flatten + Linear, then softmax over classes -
    logits = jnp.dot(wc_ref[...], z.astype(mxu_dtype),
                     preferred_element_type=f32) + bc_ref[...]   # (K, B)
    m = jnp.max(logits, axis=0, keepdims=True)
    ex = jnp.exp(logits - m)
    out_ref[...] = (ex / jnp.sum(ex, axis=0, keepdims=True)).astype(out_ref.dtype)


# ----------------------------- weight folding ---------------------------------
def fold_params(params, mxu_dtype=jnp.float32):
    """Fold all adjacent linear ops ONCE per parameter set (hoisted out of the
    per-call path).  Matmul weights are cast to `mxu_dtype` (f32 or bf16);
    biases and the feature-mix scalars stay f32."""
    f32 = jnp.float32

    def bn_fold(bn):
        sc = bn["gamma"] / jnp.sqrt(bn["var"] + BN_EPS)
        sh = bn["beta"] - bn["mean"] * sc
        return sc.astype(f32), sh.astype(f32)

    w1 = params["conv1_w"].reshape(F1, KERN_LENGTH).astype(f32)
    s1, sh1 = bn_fold(params["bn1"])
    dw1 = params["dw1_w"].reshape(C1).astype(f32)
    bdw1 = params["dw1_b"].astype(f32)
    wpw1 = params["pw1_w"].reshape(C1, C1).astype(f32)
    bpw1 = params["pw1_b"].astype(f32)
    s2, sh2 = bn_fold(params["bn2"])
    wdw2 = params["dw2_w"].reshape(C1, KW2).astype(f32)
    bdw2 = params["dw2_b"].astype(f32)
    wpw2 = params["pw2_w"].reshape(F2, C1).astype(f32)
    bpw2 = params["pw2_b"].astype(f32)
    s3, sh3 = bn_fold(params["bn3"])
    wlin = params["lin_w"].astype(f32)                 # (K, F2*T2)
    blin = params["lin_b"].astype(f32)                 # (K,)

    # ---- stage 1: conv1 'same' Toeplitz (MXU) + (C1 x F1) mix (VPU) + bias
    padl1 = (KERN_LENGTH - 1) // 2                     # PyTorch 'same': left=7, right=8
    t_idx = jnp.arange(T)[:, None]                     # output time
    s_idx = jnp.arange(T)[None, :]                     # source time
    k1 = s_idx - t_idx + padl1
    valid1 = (k1 >= 0) & (k1 < KERN_LENGTH)
    toep1 = jnp.where(valid1[None], w1[:, jnp.clip(k1, 0, KERN_LENGTH - 1)], 0.0)  # (F1,T,T)
    TP = toep1.reshape(F1 * T, T)                                                   # MXU weights

    sel = (jnp.arange(C1)[:, None] // D == jnp.arange(F1)[None, :]).astype(f32)    # (C1,F1)
    bmat = sel * dw1[:, None]                                                      # (C1,F1)
    A = (s2[:, None] * wpw1) @ (bmat * s1[None, :])                                # (C1,F1)
    sh1_exp = sh1[jnp.arange(C1) // D]
    constA = s2 * (wpw1 @ (dw1 * sh1_exp + bdw1) + bpw1) + sh2                     # (C1,)
    amix = A.reshape(C1 * F1)                                                      # SMEM scalars
    bA = jnp.repeat(constA, T)[:, None]                                            # (C1*T,1)

    # ---- stage 2: AvgPool(1,4) + block2 depthwise ('same' Toeplitz) + pointwise + BN3
    padl2 = (KW2 - 1) // 2
    u_idx = jnp.arange(T1)[:, None]
    v_idx = jnp.arange(T1)[None, :]
    k2 = v_idx - u_idx + padl2
    valid2 = (k2 >= 0) & (k2 < KW2)
    toep2 = jnp.where(valid2[None], wdw2[:, jnp.clip(k2, 0, KW2 - 1)], 0.0)        # (C1,T1,T1)
    p4c = 0.25 * ((jnp.arange(T)[None, :] // 4) == jnp.arange(T1)[:, None]).astype(f32)  # (T1,T)
    band = jnp.einsum("cuv,vs->cus", toep2, p4c)                                   # (C1,T1,T)
    MB = jnp.einsum("gc,cus->gucs", s3[:, None] * wpw2, band).reshape(F2 * T1, C1 * T)
    constB = s3 * (wpw2 @ bdw2 + bpw2) + sh3                                       # (F2,)
    bB = jnp.repeat(constB, T1)[:, None]                                           # (F2*T1,1)

    # ---- stage 3: AvgPool(1,8) + Flatten + Linear
    wlin3 = wlin.reshape(NB_CLASSES, F2, T2)
    WC = wlin3[:, :, jnp.arange(T1) // 8].reshape(NB_CLASSES, F2 * T1) / 8.0
    bC = blin[:, None]                                                             # (K,1)

    return (TP.astype(mxu_dtype), amix, bA,
            MB.astype(mxu_dtype), bB, WC.astype(mxu_dtype), bC)


# -------------------------------- wrapper -------------------------------------
def _pick_b_tile(n):
    """Batch-tile size: big enough to amortize the ~0.35us grid-step overhead,
    small enough that tiny batches are not over-padded and the grid has >=2
    steps whenever N > 128 (so v7x can shard the 'parallel' axis across TCs)."""
    bt = min(1024, max(128, pl.cdiv(n, 2)))
    return ((bt + 127) // 128) * 128


def eegnet_forward(x_nchw, folded):
    """x_nchw: (N, 1, Chans, Samples) f32 (PyTorch NCHW) -> (N, nb_classes)."""
    tp, amix, ba, mb, bb, wc, bc = folded
    N, cin, chans, t = x_nchw.shape
    assert cin == 1 and chans == CHANS and t == SAMPLES
    f32 = jnp.float32
    w_dtype = tp.dtype

    b_tile = _pick_b_tile(N)
    n_tiles = pl.cdiv(N, b_tile)
    n_pad = n_tiles * b_tile

    # natural (N, T) layout: no wrapper-side HBM transpose of the input
    x2 = x_nchw.reshape(N, T).astype(f32)
    if n_pad != N:
        x2 = jnp.pad(x2, ((0, n_pad - N), (0, 0)))

    grid_spec = pltpu.PrefetchScalarGridSpec(
        num_scalar_prefetch=0,
        grid=(n_tiles,),
        in_specs=[pl.BlockSpec((b_tile, T), lambda n: (n, 0)),           # x tile
                  pl.BlockSpec(tp.shape, lambda n: (0, 0)),              # Toeplitz
                  pl.BlockSpec(memory_space=pltpu.MemorySpace.SMEM),     # mix scalars
                  pl.BlockSpec(ba.shape, lambda n: (0, 0)),
                  pl.BlockSpec(mb.shape, lambda n: (0, 0)),
                  pl.BlockSpec(bb.shape, lambda n: (0, 0)),
                  pl.BlockSpec(wc.shape, lambda n: (0, 0)),
                  pl.BlockSpec(bc.shape, lambda n: (0, 0))],
        out_specs=pl.BlockSpec((NB_CLASSES, b_tile), lambda n: (0, n)),
        scratch_shapes=[pltpu.VMEM((C1 * T, b_tile), w_dtype)],
    )
    # TODO(synk): constant-index weight inputs could use pipeline_mode=
    #   pl.Buffered(1) to drop their second pipeline buffer (~0.3 MiB of VMEM);
    #   skipped as a minor, version-sensitive knob.
    out = pl.pallas_call(
        _eegnet_kernel,
        out_shape=jax.ShapeDtypeStruct((NB_CLASSES, n_pad), f32),
        grid_spec=grid_spec,
        compiler_params=pltpu.CompilerParams(dimension_semantics=("parallel",)),
    )(x2, tp, amix, ba, mb, bb, wc, bc)
    return out[:, :N].T                                                  # (N, K)


# ------------------------- deterministic parameters ---------------------------
def init_params(key):
    ks = jax.random.split(key, 14)

    def nrm(k, shape, scale=0.1):
        return scale * jax.random.normal(k, shape, dtype=jnp.float32)

    def bn(k, c):
        k1, k2, k3, k4 = jax.random.split(k, 4)
        return {
            "gamma": 1.0 + 0.1 * jax.random.normal(k1, (c,), jnp.float32),
            "beta": 0.1 * jax.random.normal(k2, (c,), jnp.float32),
            "mean": 0.1 * jax.random.normal(k3, (c,), jnp.float32),
            "var": 1.0 + 0.1 * jnp.abs(jax.random.normal(k4, (c,), jnp.float32)),
        }

    return {
        "conv1_w": nrm(ks[0], (F1, 1, 1, KERN_LENGTH)),       # Conv2d(1,F1,(1,KL)), bias=False
        "bn1": bn(ks[1], F1),
        "dw1_w": nrm(ks[2], (C1, 1, CHANS, 1)),               # depthwise (Chans,1), groups=F1
        "dw1_b": nrm(ks[3], (C1,)),
        "pw1_w": nrm(ks[4], (C1, C1, 1, 1)),                  # pointwise 1x1
        "pw1_b": nrm(ks[5], (C1,)),
        "bn2": bn(ks[6], C1),
        "dw2_w": nrm(ks[7], (C1, 1, 1, KW2)),                 # depthwise (1,16), groups=C1
        "dw2_b": nrm(ks[8], (C1,)),
        "pw2_w": nrm(ks[9], (F2, C1, 1, 1)),                  # pointwise 1x1
        "pw2_b": nrm(ks[10], (F2,)),
        "bn3": bn(ks[11], F2),
        "lin_w": nrm(ks[12], (NB_CLASSES, F2 * (SAMPLES // 32))),
        "lin_b": nrm(ks[13], (NB_CLASSES,)),
    }


# ------------------------- pure-JAX reference (check) -------------------------
def _same_pad(k):
    tot = k - 1
    return (tot // 2, tot - tot // 2)     # PyTorch 'same': extra pad on the right


def eegnet_reference(x, p):
    dn = ("NCHW", "OIHW", "NCHW")

    def bn(y, b):
        sc = b["gamma"] / jnp.sqrt(b["var"] + BN_EPS)
        sh = b["beta"] - b["mean"] * sc
        return y * sc[None, :, None, None] + sh[None, :, None, None]

    def elu(y):
        return jnp.where(y > 0, y, jnp.exp(jnp.minimum(y, 0.0)) - 1.0)

    def pool_w(y, w):
        n, c, h, t = y.shape
        return y.reshape(n, c, h, t // w, w).mean(-1)

    y = lax.conv_general_dilated(x, p["conv1_w"], (1, 1),
                                 [(0, 0), _same_pad(KERN_LENGTH)], dimension_numbers=dn)
    y = bn(y, p["bn1"])
    y = lax.conv_general_dilated(y, p["dw1_w"], (1, 1),
                                 [_same_pad(CHANS), (0, 0)], dimension_numbers=dn,
                                 feature_group_count=F1) + p["dw1_b"][None, :, None, None]
    y = lax.conv_general_dilated(y, p["pw1_w"], (1, 1), [(0, 0), (0, 0)],
                                 dimension_numbers=dn) + p["pw1_b"][None, :, None, None]
    y = pool_w(elu(bn(y, p["bn2"])), 4)
    y = lax.conv_general_dilated(y, p["dw2_w"], (1, 1),
                                 [(0, 0), _same_pad(KW2)], dimension_numbers=dn,
                                 feature_group_count=C1) + p["dw2_b"][None, :, None, None]
    y = lax.conv_general_dilated(y, p["pw2_w"], (1, 1), [(0, 0), (0, 0)],
                                 dimension_numbers=dn) + p["pw2_b"][None, :, None, None]
    y = pool_w(elu(bn(y, p["bn3"])), 8)
    y = y.reshape(y.shape[0], -1)
    logits = y @ p["lin_w"].T + p["lin_b"]
    return jax.nn.softmax(logits, axis=1)


# ----------------------------------- main --------------------------------------
if __name__ == "__main__":
    key = jax.random.PRNGKey(0)
    pkey, xkey = jax.random.split(key)
    params = init_params(pkey)

    N = 2
    x = jax.random.normal(xkey, (N, 1, CHANS, SAMPLES), dtype=jnp.float32)

    ref = jax.block_until_ready(eegnet_reference(x, params))
    fwd = jax.jit(eegnet_forward)

    # f32 MXU feed: checked tightly against the conv/BN reference.
    folded_f32 = fold_params(params, jnp.float32)           # folded once (hoisted)
    out = jax.block_until_ready(fwd(x, folded_f32))
    assert out.shape == (N, NB_CLASSES)
    assert bool(jnp.all(jnp.isfinite(out)))
    assert bool(jnp.allclose(jnp.sum(out, axis=1), 1.0, atol=1e-5))
    assert bool(jnp.allclose(out, ref, atol=2e-4, rtol=2e-4)), (out, ref)

    # bf16 MXU feed (fast path for v6e/v7x): f32 accumulate, f32 VPU/EUP math,
    # checked with a correspondingly looser tolerance.
    folded_bf16 = fold_params(params, jnp.bfloat16)
    out16 = jax.block_until_ready(fwd(x, folded_bf16))
    assert out16.shape == (N, NB_CLASSES)
    assert bool(jnp.all(jnp.isfinite(out16)))
    assert bool(jnp.allclose(jnp.sum(out16, axis=1), 1.0, atol=1e-5))
    assert bool(jnp.allclose(out16, ref, atol=2e-2, rtol=2e-2)), (out16, ref)

    print("KERNEL_OK")
</pallas_src>

<mosaic_0001>
module attributes {stable_mosaic.version = 11 : i64} {
  func.func @_eegnet_kernel(%arg0: i32, %arg1: memref<128x64xf32, #tpu.memory_space<vmem>>, %arg2: memref<256x64xf32, #tpu.memory_space<vmem>>, %arg3: memref<32xf32, #tpu.memory_space<smem>>, %arg4: memref<512x1xf32, #tpu.memory_space<vmem>>, %arg5: memref<128x512xf32, #tpu.memory_space<vmem>>, %arg6: memref<128x1xf32, #tpu.memory_space<vmem>>, %arg7: memref<3x128xf32, #tpu.memory_space<vmem>>, %arg8: memref<3x1xf32, #tpu.memory_space<vmem>>, %arg9: memref<3x128xf32, #tpu.memory_space<vmem>>, %arg10: memref<512x128xf32, #tpu.memory_space<vmem>>) attributes {dimension_semantics = [#tpu.dimension_semantics<parallel>], iteration_bounds = array<i64: 1>, scalar_prefetch = 0 : i64, scratch_operands = 1 : i64, tpu.core_type = #tpu.core_type<tc>, window_params = [{transform_indices = @transform_0, window_bounds = array<i64: 128, 64>}, {pipeline_mode = #tpu.pipeline_mode<synchronous>, transform_indices = @transform_1, window_bounds = array<i64: 256, 64>}, {transform_indices = @transform_2, window_bounds = array<i64: 32>}, {pipeline_mode = #tpu.pipeline_mode<synchronous>, transform_indices = @transform_3, window_bounds = array<i64: 512, 1>}, {pipeline_mode = #tpu.pipeline_mode<synchronous>, transform_indices = @transform_4, window_bounds = array<i64: 128, 512>}, {pipeline_mode = #tpu.pipeline_mode<synchronous>, transform_indices = @transform_5, window_bounds = array<i64: 128, 1>}, {pipeline_mode = #tpu.pipeline_mode<synchronous>, transform_indices = @transform_6, window_bounds = array<i64: 3, 128>}, {pipeline_mode = #tpu.pipeline_mode<synchronous>, transform_indices = @transform_7, window_bounds = array<i64: 3, 1>}, {transform_indices = @transform_8, window_bounds = array<i64: 3, 128>}]} {
    %c0 = arith.constant 0 : index
    %c0_0 = arith.constant 0 : index
    %0 = vector.load %arg1[%c0, %c0_0] : memref<128x64xf32, #tpu.memory_space<vmem>>, vector<128x64xf32>
    %1 = tpu.transpose %0, [1, 0] : vector<128x64xf32> -> vector<64x128xf32>
    %c0_1 = arith.constant 0 : index
    %c0_2 = arith.constant 0 : index
    %2 = vector.load %arg2[%c0_1, %c0_2] : memref<256x64xf32, #tpu.memory_space<vmem>>, vector<256x64xf32>
    %cst = arith.constant dense<0.000000e+00> : vector<256x128xf32>
    %3 = tpu.matmul %2, %1, %cst {dimension_numbers = #tpu.dot_dimension_numbers<[1], [0], [0], [1], [0, 0, 1, 1], [], []>} : vector<256x64xf32>, vector<64x128xf32>, vector<256x128xf32> -> vector<256x128xf32>
    %4 = vector.extract_strided_slice %3 {offsets = [0, 0], sizes = [64, 128], strides = [1, 1]} : vector<256x128xf32> to vector<64x128xf32>
    %5 = vector.extract_strided_slice %3 {offsets = [64, 0], sizes = [64, 128], strides = [1, 1]} : vector<256x128xf32> to vector<64x128xf32>
    %6 = vector.extract_strided_slice %3 {offsets = [128, 0], sizes = [64, 128], strides = [1, 1]} : vector<256x128xf32> to vector<64x128xf32>
    %7 = vector.extract_strided_slice %3 {offsets = [192, 0], sizes = [64, 128], strides = [1, 1]} : vector<256x128xf32> to vector<64x128xf32>
    %c0_3 = arith.constant 0 : index
    %8 = memref.load %arg3[%c0_3] : memref<32xf32, #tpu.memory_space<smem>>
    %9 = vector.broadcast %8 : f32 to vector<64x128xf32>
    %10 = arith.mulf %9, %4 : vector<64x128xf32>
    %c1 = arith.constant 1 : index
    %11 = memref.load %arg3[%c1] : memref<32xf32, #tpu.memory_space<smem>>
    %12 = vector.broadcast %11 : f32 to vector<64x128xf32>
    %13 = arith.mulf %12, %5 : vector<64x128xf32>
    %14 = arith.addf %10, %13 : vector<64x128xf32>
    %c2 = arith.constant 2 : index
    %15 = memref.load %arg3[%c2] : memref<32xf32, #tpu.memory_space<smem>>
    %16 = vector.broadcast %15 : f32 to vector<64x128xf32>
    %17 = arith.mulf %16, %6 : vector<64x128xf32>
    %18 = arith.addf %14, %17 : vector<64x128xf32>
    %c3 = arith.constant 3 : index
    %19 = memref.load %arg3[%c3] : memref<32xf32, #tpu.memory_space<smem>>
    %20 = vector.broadcast %19 : f32 to vector<64x128xf32>
    %21 = arith.mulf %20, %7 : vector<64x128xf32>
    %22 = arith.addf %18, %21 : vector<64x128xf32>
    %c0_4 = arith.constant 0 : index
    %c0_5 = arith.constant 0 : index
    %23 = vector.load %arg4[%c0_4, %c0_5] : memref<512x1xf32, #tpu.memory_space<vmem>>, vector<64x1xf32>
    %24 = vector.broadcast %23 : vector<64x1xf32> to vector<64x128xf32>
    %25 = arith.addf %22, %24 : vector<64x128xf32>
    %cst_6 = arith.constant 0.000000e+00 : f32
    %26 = vector.broadcast %cst_6 : f32 to vector<64x128xf32>
    %27 = arith.cmpf ogt, %25, %26 : vector<64x128xf32>
    %cst_7 = arith.constant 0.000000e+00 : f32
    %28 = vector.broadcast %cst_7 : f32 to vector<64x128xf32>
    %29 = arith.minimumf %25, %28 : vector<64x128xf32>
    %30 = math.exp %29 : vector<64x128xf32>
    %cst_8 = arith.constant 1.000000e+00 : f32
    %31 = vector.broadcast %cst_8 : f32 to vector<64x128xf32>
    %32 = arith.subf %30, %31 : vector<64x128xf32>
    %33 = arith.select %27, %25, %32 : vector<64x128xi1>, vector<64x128xf32>
    %c0_9 = arith.constant 0 : index
    %c0_10 = arith.constant 0 : index
    %34 = vector.load %arg10[%c0_9, %c0_10] : memref<512x128xf32, #tpu.memory_space<vmem>>, vector<64x128xf32>
    tpu.vector_store %arg10[%c0_9, %c0_10], %33 {strides = array<i32>} : memref<512x128xf32, #tpu.memory_space<vmem>>, vector<64x128xf32>,
    %c4 = arith.constant 4 : index
    %35 = memref.load %arg3[%c4] : memref<32xf32, #tpu.memory_space<smem>>
    %36 = vector.broadcast %35 : f32 to vector<64x128xf32>
    %37 = arith.mulf %36, %4 : vector<64x128xf32>
    %c5 = arith.constant 5 : index
    %38 = memref.load %arg3[%c5] : memref<32xf32, #tpu.memory_space<smem>>
    %39 = vector.broadcast %38 : f32 to vector<64x128xf32>
    %40 = arith.mulf %39, %5 : vector<64x128xf32>
    %41 = arith.addf %37, %40 : vector<64x128xf32>
    %c6 = arith.constant 6 : index
    %42 = memref.load %arg3[%c6] : memref<32xf32, #tpu.memory_space<smem>>
    %43 = vector.broadcast %42 : f32 to vector<64x128xf32>
    %44 = arith.mulf %43, %6 : vector<64x128xf32>
    %45 = arith.addf %41, %44 : vector<64x128xf32>
    %c7 = arith.constant 7 : index
    %46 = memref.load %arg3[%c7] : memref<32xf32, #tpu.memory_space<smem>>
    %47 = vector.broadcast %46 : f32 to vector<64x128xf32>
    %48 = arith.mulf %47, %7 : vector<64x128xf32>
    %49 = arith.addf %45, %48 : vector<64x128xf32>
    %c64 = arith.constant 64 : index
    %c0_11 = arith.constant 0 : index
    %50 = vector.load %arg4[%c64, %c0_11] : memref<512x1xf32, #tpu.memory_space<vmem>>, vector<64x1xf32>
    %51 = vector.broadcast %50 : vector<64x1xf32> to vector<64x128xf32>
    %52 = arith.addf %49, %51 : vector<64x128xf32>
    %cst_12 = arith.constant 0.000000e+00 : f32
    %53 = vector.broadcast %cst_12 : f32 to vector<64x128xf32>
    %54 = arith.cmpf ogt, %52, %53 : vector<64x128xf32>
    %cst_13 = arith.constant 0.000000e+00 : f32
    %55 = vector.broadcast %cst_13 : f32 to vector<64x128xf32>
    %56 = arith.minimumf %52, %55 : vector<64x128xf32>
    %57 = math.exp %56 : vector<64x128xf32>
    %cst_14 = arith.constant 1.000000e+00 : f32
    %58 = vector.broadcast %cst_14 : f32 to vector<64x128xf32>
    %59 = arith.subf %57, %58 : vector<64x128xf32>
    %60 = arith.select %54, %52, %59 : vector<64x128xi1>, vector<64x128xf32>
    %c64_15 = arith.constant 64 : index
    %c0_16 = arith.constant 0 : index
    %61 = vector.load %arg10[%c64_15, %c0_16] : memref<512x128xf32, #tpu.memory_space<vmem>>, vector<64x128xf32>
    tpu.vector_store %arg10[%c64_15, %c0_16], %60 {strides = array<i32>} : memref<512x128xf32, #tpu.memory_space<vmem>>, vector<64x128xf32>,
    %c8 = arith.constant 8 : index
    %62 = memref.load %arg3[%c8] : memref<32xf32, #tpu.memory_space<smem>>
    %63 = vector.broadcast %62 : f32 to vector<64x128xf32>
    %64 = arith.mulf %63, %4 : vector<64x128xf32>
    %c9 = arith.constant 9 : index
    %65 = memref.load %arg3[%c9] : memref<32xf32, #tpu.memory_space<smem>>
    %66 = vector.broadcast %65 : f32 to vector<64x128xf32>
    %67 = arith.mulf %66, %5 : vector<64x128xf32>
    %68 = arith.addf %64, %67 : vector<64x128xf32>
    %c10 = arith.constant 10 : index
    %69 = memref.load %arg3[%c10] : memref<32xf32, #tpu.memory_space<smem>>
    %70 = vector.broadcast %69 : f32 to vector<64x128xf32>
    %71 = arith.mulf %70, %6 : vector<64x128xf32>
    %72 = arith.addf %68, %71 : vector<64x128xf32>
    %c11 = arith.constant 11 : index
    %73 = memref.load %arg3[%c11] : memref<32xf32, #tpu.memory_space<smem>>
    %74 = vector.broadcast %73 : f32 to vector<64x128xf32>
    %75 = arith.mulf %74, %7 : vector<64x128xf32>
    %76 = arith.addf %72, %75 : vector<64x128xf32>
    %c128 = arith.constant 128 : index
    %c0_17 = arith.constant 0 : index
    %77 = vector.load %arg4[%c128, %c0_17] : memref<512x1xf32, #tpu.memory_space<vmem>>, vector<64x1xf32>
    %78 = vector.broadcast %77 : vector<64x1xf32> to vector<64x128xf32>
    %79 = arith.addf %76, %78 : vector<64x128xf32>
    %cst_18 = arith.constant 0.000000e+00 : f32
    %80 = vector.broadcast %cst_18 : f32 to vector<64x128xf32>
    %81 = arith.cmpf ogt, %79, %80 : vector<64x128xf32>
    %cst_19 = arith.constant 0.000000e+00 : f32
    %82 = vector.broadcast %cst_19 : f32 to vector<64x128xf32>
    %83 = arith.minimumf %79, %82 : vector<64x128xf32>
    %84 = math.exp %83 : vector<64x128xf32>
    %cst_20 = arith.constant 1.000000e+00 : f32
    %85 = vector.broadcast %cst_20 : f32 to vector<64x128xf32>
    %86 = arith.subf %84, %85 : vector<64x128xf32>
    %87 = arith.select %81, %79, %86 : vector<64x128xi1>, vector<64x128xf32>
    %c128_21 = arith.constant 128 : index
    %c0_22 = arith.constant 0 : index
    %88 = vector.load %arg10[%c128_21, %c0_22] : memref<512x128xf32, #tpu.memory_space<vmem>>, vector<64x128xf32>
    tpu.vector_store %arg10[%c128_21, %c0_22], %87 {strides = array<i32>} : memref<512x128xf32, #tpu.memory_space<vmem>>, vector<64x128xf32>,
    %c12 = arith.constant 12 : index
    %89 = memref.load %arg3[%c12] : memref<32xf32, #tpu.memory_space<smem>>
    %90 = vector.broadcast %89 : f32 to vector<64x128xf32>
    %91 = arith.mulf %90, %4 : vector<64x128xf32>
    %c13 = arith.constant 13 : index
    %92 = memref.load %arg3[%c13] : memref<32xf32, #tpu.memory_space<smem>>
    %93 = vector.broadcast %92 : f32 to vector<64x128xf32>
    %94 = arith.mulf %93, %5 : vector<64x128xf32>
    %95 = arith.addf %91, %94 : vector<64x128xf32>
    %c14 = arith.constant 14 : index
    %96 = memref.load %arg3[%c14] : memref<32xf32, #tpu.memory_space<smem>>
    %97 = vector.broadcast %96 : f32 to vector<64x128xf32>
    %98 = arith.mulf %97, %6 : vector<64x128xf32>
    %99 = arith.addf %95, %98 : vector<64x128xf32>
    %c15 = arith.constant 15 : index
    %100 = memref.load %arg3[%c15] : memref<32xf32, #tpu.memory_space<smem>>
    %101 = vector.broadcast %100 : f32 to vector<64x128xf32>
    %102 = arith.mulf %101, %7 : vector<64x128xf32>
    %103 = arith.addf %99, %102 : vector<64x128xf32>
    %c192 = arith.constant 192 : index
    %c0_23 = arith.constant 0 : index
    %104 = vector.load %arg4[%c192, %c0_23] : memref<512x1xf32, #tpu.memory_space<vmem>>, vector<64x1xf32>
    %105 = vector.broadcast %104 : vector<64x1xf32> to vector<64x128xf32>
    %106 = arith.addf %103, %105 : vector<64x128xf32>
    %cst_24 = arith.constant 0.000000e+00 : f32
    %107 = vector.broadcast %cst_24 : f32 to vector<64x128xf32>
    %108 = arith.cmpf ogt, %106, %107 : vector<64x128xf32>
    %cst_25 = arith.constant 0.000000e+00 : f32
    %109 = vector.broadcast %cst_25 : f32 to vector<64x128xf32>
    %110 = arith.minimumf %106, %109 : vector<64x128xf32>
    %111 = math.exp %110 : vector<64x128xf32>
    %cst_26 = arith.constant 1.000000e+00 : f32
    %112 = vector.broadcast %cst_26 : f32 to vector<64x128xf32>
    %113 = arith.subf %111, %112 : vector<64x128xf32>
    %114 = arith.select %108, %106, %113 : vector<64x128xi1>, vector<64x128xf32>
    %c192_27 = arith.constant 192 : index
    %c0_28 = arith.constant 0 : index
    %115 = vector.load %arg10[%c192_27, %c0_28] : memref<512x128xf32, #tpu.memory_space<vmem>>, vector<64x128xf32>
    tpu.vector_store %arg10[%c192_27, %c0_28], %114 {strides = array<i32>} : memref<512x128xf32, #tpu.memory_space<vmem>>, vector<64x128xf32>,
    %c16 = arith.constant 16 : index
    %116 = memref.load %arg3[%c16] : memref<32xf32, #tpu.memory_space<smem>>
    %117 = vector.broadcast %116 : f32 to vector<64x128xf32>
    %118 = arith.mulf %117, %4 : vector<64x128xf32>
    %c17 = arith.constant 17 : index
    %119 = memref.load %arg3[%c17] : memref<32xf32, #tpu.memory_space<smem>>
    %120 = vector.broadcast %119 : f32 to vector<64x128xf32>
    %121 = arith.mulf %120, %5 : vector<64x128xf32>
    %122 = arith.addf %118, %121 : vector<64x128xf32>
    %c18 = arith.constant 18 : index
    %123 = memref.load %arg3[%c18] : memref<32xf32, #tpu.memory_space<smem>>
    %124 = vector.broadcast %123 : f32 to vector<64x128xf32>
    %125 = arith.mulf %124, %6 : vector<64x128xf32>
    %126 = arith.addf %122, %125 : vector<64x128xf32>
    %c19 = arith.constant 19 : index
    %127 = memref.load %arg3[%c19] : memref<32xf32, #tpu.memory_space<smem>>
    %128 = vector.broadcast %127 : f32 to vector<64x128xf32>
    %129 = arith.mulf %128, %7 : vector<64x128xf32>
    %130 = arith.addf %126, %129 : vector<64x128xf32>
    %c256 = arith.constant 256 : index
    %c0_29 = arith.constant 0 : index
    %131 = vector.load %arg4[%c256, %c0_29] : memref<512x1xf32, #tpu.memory_space<vmem>>, vector<64x1xf32>
    %132 = vector.broadcast %131 : vector<64x1xf32> to vector<64x128xf32>
    %133 = arith.addf %130, %132 : vector<64x128xf32>
    %cst_30 = arith.constant 0.000000e+00 : f32
    %134 = vector.broadcast %cst_30 : f32 to vector<64x128xf32>
    %135 = arith.cmpf ogt, %133, %134 : vector<64x128xf32>
    %cst_31 = arith.constant 0.000000e+00 : f32
    %136 = vector.broadcast %cst_31 : f32 to vector<64x128xf32>
    %137 = arith.minimumf %133, %136 : vector<64x128xf32>
    %138 = math.exp %137 : vector<64x128xf32>
    %cst_32 = arith.constant 1.000000e+00 : f32
    %139 = vector.broadcast %cst_32 : f32 to vector<64x128xf32>
    %140 = arith.subf %138, %139 : vector<64x128xf32>
    %141 = arith.select %135, %133, %140 : vector<64x128xi1>, vector<64x128xf32>
    %c256_33 = arith.constant 256 : index
    %c0_34 = arith.constant 0 : index
    %142 = vector.load %arg10[%c256_33, %c0_34] : memref<512x128xf32, #tpu.memory_space<vmem>>, vector<64x128xf32>
    tpu.vector_store %arg10[%c256_33, %c0_34], %141 {strides = array<i32>} : memref<512x128xf32, #tpu.memory_space<vmem>>, vector<64x128xf32>,
    %c20 = arith.constant 20 : index
    %143 = memref.load %arg3[%c20] : memref<32xf32, #tpu.memory_space<smem>>
    %144 = vector.broadcast %143 : f32 to vector<64x128xf32>
    %145 = arith.mulf %144, %4 : vector<64x128xf32>
    %c21 = arith.constant 21 : index
    %146 = memref.load %arg3[%c21] : memref<32xf32, #tpu.memory_space<smem>>
    %147 = vector.broadcast %146 : f32 to vector<64x128xf32>
    %148 = arith.mulf %147, %5 : vector<64x128xf32>
    %149 = arith.addf %145, %148 : vector<64x128xf32>
    %c22 = arith.constant 22 : index
    %150 = memref.load %arg3[%c22] : memref<32xf32, #tpu.memory_space<smem>>
    %151 = vector.broadcast %150 : f32 to vector<64x128xf32>
    %152 = arith.mulf %151, %6 : vector<64x128xf32>
    %153 = arith.addf %149, %152 : vector<64x128xf32>
    %c23 = arith.constant 23 : index
    %154 = memref.load %arg3[%c23] : memref<32xf32, #tpu.memory_space<smem>>
    %155 = vector.broadcast %154 : f32 to vector<64x128xf32>
    %156 = arith.mulf %155, %7 : vector<64x128xf32>
    %157 = arith.addf %153, %156 : vector<64x128xf32>
    %c320 = arith.constant 320 : index
    %c0_35 = arith.constant 0 : index
    %158 = vector.load %arg4[%c320, %c0_35] : memref<512x1xf32, #tpu.memory_space<vmem>>, vector<64x1xf32>
    %159 = vector.broadcast %158 : vector<64x1xf32> to vector<64x128xf32>
    %160 = arith.addf %157, %159 : vector<64x128xf32>
    %cst_36 = arith.constant 0.000000e+00 : f32
    %161 = vector.broadcast %cst_36 : f32 to vector<64x128xf32>
    %162 = arith.cmpf ogt, %160, %161 : vector<64x128xf32>
    %cst_37 = arith.constant 0.000000e+00 : f32
    %163 = vector.broadcast %cst_37 : f32 to vector<64x128xf32>
    %164 = arith.minimumf %160, %163 : vector<64x128xf32>
    %165 = math.exp %164 : vector<64x128xf32>
    %cst_38 = arith.constant 1.000000e+00 : f32
    %166 = vector.broadcast %cst_38 : f32 to vector<64x128xf32>
    %167 = arith.subf %165, %166 : vector<64x128xf32>
    %168 = arith.select %162, %160, %167 : vector<64x128xi1>, vector<64x128xf32>
    %c320_39 = arith.constant 320 : index
    %c0_40 = arith.constant 0 : index
    %169 = vector.load %arg10[%c320_39, %c0_40] : memref<512x128xf32, #tpu.memory_space<vmem>>, vector<64x128xf32>
    tpu.vector_store %arg10[%c320_39, %c0_40], %168 {strides = array<i32>} : memref<512x128xf32, #tpu.memory_space<vmem>>, vector<64x128xf32>,
    %c24 = arith.constant 24 : index
    %170 = memref.load %arg3[%c24] : memref<32xf32, #tpu.memory_space<smem>>
    %171 = vector.broadcast %170 : f32 to vector<64x128xf32>
    %172 = arith.mulf %171, %4 : vector<64x128xf32>
    %c25 = arith.constant 25 : index
    %173 = memref.load %arg3[%c25] : memref<32xf32, #tpu.memory_space<smem>>
    %174 = vector.broadcast %173 : f32 to vector<64x128xf32>
    %175 = arith.mulf %174, %5 : vector<64x128xf32>
    %176 = arith.addf %172, %175 : vector<64x128xf32>
    %c26 = arith.constant 26 : index
    %177 = memref.load %arg3[%c26] : memref<32xf32, #tpu.memory_space<smem>>
    %178 = vector.broadcast %177 : f32 to vector<64x128xf32>
    %179 = arith.mulf %178, %6 : vector<64x128xf32>
    %180 = arith.addf %176, %179 : vector<64x128xf32>
    %c27 = arith.constant 27 : index
    %181 = memref.load %arg3[%c27] : memref<32xf32, #tpu.memory_space<smem>>
    %182 = vector.broadcast %181 : f32 to vector<64x128xf32>
    %183 = arith.mulf %182, %7 : vector<64x128xf32>
    %184 = arith.addf %180, %183 : vector<64x128xf32>
    %c384 = arith.constant 384 : index
    %c0_41 = arith.constant 0 : index
    %185 = vector.load %arg4[%c384, %c0_41] : memref<512x1xf32, #tpu.memory_space<vmem>>, vector<64x1xf32>
    %186 = vector.broadcast %185 : vector<64x1xf32> to vector<64x128xf32>
    %187 = arith.addf %184, %186 : vector<64x128xf32>
    %cst_42 = arith.constant 0.000000e+00 : f32
    %188 = vector.broadcast %cst_42 : f32 to vector<64x128xf32>
    %189 = arith.cmpf ogt, %187, %188 : vector<64x128xf32>
    %cst_43 = arith.constant 0.000000e+00 : f32
    %190 = vector.broadcast %cst_43 : f32 to vector<64x128xf32>
    %191 = arith.minimumf %187, %190 : vector<64x128xf32>
    %192 = math.exp %191 : vector<64x128xf32>
    %cst_44 = arith.constant 1.000000e+00 : f32
    %193 = vector.broadcast %cst_44 : f32 to vector<64x128xf32>
    %194 = arith.subf %192, %193 : vector<64x128xf32>
    %195 = arith.select %189, %187, %194 : vector<64x128xi1>, vector<64x128xf32>
    %c384_45 = arith.constant 384 : index
    %c0_46 = arith.constant 0 : index
    %196 = vector.load %arg10[%c384_45, %c0_46] : memref<512x128xf32, #tpu.memory_space<vmem>>, vector<64x128xf32>
    tpu.vector_store %arg10[%c384_45, %c0_46], %195 {strides = array<i32>} : memref<512x128xf32, #tpu.memory_space<vmem>>, vector<64x128xf32>,
    %c28 = arith.constant 28 : index
    %197 = memref.load %arg3[%c28] : memref<32xf32, #tpu.memory_space<smem>>
    %198 = vector.broadcast %197 : f32 to vector<64x128xf32>
    %199 = arith.mulf %198, %4 : vector<64x128xf32>
    %c29 = arith.constant 29 : index
    %200 = memref.load %arg3[%c29] : memref<32xf32, #tpu.memory_space<smem>>
    %201 = vector.broadcast %200 : f32 to vector<64x128xf32>
    %202 = arith.mulf %201, %5 : vector<64x128xf32>
    %203 = arith.addf %199, %202 : vector<64x128xf32>
    %c30 = arith.constant 30 : index
    %204 = memref.load %arg3[%c30] : memref<32xf32, #tpu.memory_space<smem>>
    %205 = vector.broadcast %204 : f32 to vector<64x128xf32>
    %206 = arith.mulf %205, %6 : vector<64x128xf32>
    %207 = arith.addf %203, %206 : vector<64x128xf32>
    %c31 = arith.constant 31 : index
    %208 = memref.load %arg3[%c31] : memref<32xf32, #tpu.memory_space<smem>>
    %209 = vector.broadcast %208 : f32 to vector<64x128xf32>
    %210 = arith.mulf %209, %7 : vector<64x128xf32>
    %211 = arith.addf %207, %210 : vector<64x128xf32>
    %c448 = arith.constant 448 : index
    %c0_47 = arith.constant 0 : index
    %212 = vector.load %arg4[%c448, %c0_47] : memref<512x1xf32, #tpu.memory_space<vmem>>, vector<64x1xf32>
    %213 = vector.broadcast %212 : vector<64x1xf32> to vector<64x128xf32>
    %214 = arith.addf %211, %213 : vector<64x128xf32>
    %cst_48 = arith.constant 0.000000e+00 : f32
    %215 = vector.broadcast %cst_48 : f32 to vector<64x128xf32>
    %216 = arith.cmpf ogt, %214, %215 : vector<64x128xf32>
    %cst_49 = arith.constant 0.000000e+00 : f32
    %217 = vector.broadcast %cst_49 : f32 to vector<64x128xf32>
    %218 = arith.minimumf %214, %217 : vector<64x128xf32>
    %219 = math.exp %218 : vector<64x128xf32>
    %cst_50 = arith.constant 1.000000e+00 : f32
    %220 = vector.broadcast %cst_50 : f32 to vector<64x128xf32>
    %221 = arith.subf %219, %220 : vector<64x128xf32>
    %222 = arith.select %216, %214, %221 : vector<64x128xi1>, vector<64x128xf32>
    %c448_51 = arith.constant 448 : index
    %c0_52 = arith.constant 0 : index
    %223 = vector.load %arg10[%c448_51, %c0_52] : memref<512x128xf32, #tpu.memory_space<vmem>>, vector<64x128xf32>
    tpu.vector_store %arg10[%c448_51, %c0_52], %222 {strides = array<i32>} : memref<512x128xf32, #tpu.memory_space<vmem>>, vector<64x128xf32>,
    %c0_53 = arith.constant 0 : index
    %c0_54 = arith.constant 0 : index
    %224 = vector.load %arg5[%c0_53, %c0_54] : memref<128x512xf32, #tpu.memory_space<vmem>>, vector<128x512xf32>
    %c0_55 = arith.constant 0 : index
    %c0_56 = arith.constant 0 : index
    %225 = vector.load %arg10[%c0_55, %c0_56] : memref<512x128xf32, #tpu.memory_space<vmem>>, vector<512x128xf32>
    %cst_57 = arith.constant dense<0.000000e+00> : vector<128x128xf32>
    %226 = tpu.matmul %224, %225, %cst_57 {dimension_numbers = #tpu.dot_dimension_numbers<[1], [0], [0], [1], [0, 0, 1, 1], [], []>} : vector<128x512xf32>, vector<512x128xf32>, vector<128x128xf32> -> vector<128x128xf32>
    %c0_58 = arith.constant 0 : index
    %c0_59 = arith.constant 0 : index
    %227 = vector.load %arg6[%c0_58, %c0_59] : memref<128x1xf32, #tpu.memory_space<vmem>>, vector<128x1xf32>
    %228 = vector.broadcast %227 : vector<128x1xf32> to vector<128x128xf32>
    %229 = arith.addf %226, %228 : vector<128x128xf32>
    %cst_60 = arith.constant 0.000000e+00 : f32
    %230 = vector.broadcast %cst_60 : f32 to vector<128x128xf32>
    %231 = arith.cmpf ogt, %229, %230 : vector<128x128xf32>
    %cst_61 = arith.constant 0.000000e+00 : f32
    %232 = vector.broadcast %cst_61 : f32 to vector<128x128xf32>
    %233 = arith.minimumf %229, %232 : vector<128x128xf32>
    %234 = math.exp %233 : vector<128x128xf32>
    %cst_62 = arith.constant 1.000000e+00 : f32
    %235 = vector.broadcast %cst_62 : f32 to vector<128x128xf32>
    %236 = arith.subf %234, %235 : vector<128x128xf32>
    %237 = arith.select %231, %229, %236 : vector<128x128xi1>, vector<128x128xf32>
    %c0_63 = arith.constant 0 : index
    %c0_64 = arith.constant 0 : index
    %238 = vector.load %arg7[%c0_63, %c0_64] : memref<3x128xf32, #tpu.memory_space<vmem>>, vector<3x128xf32>
    %cst_65 = arith.constant dense<0.000000e+00> : vector<3x128xf32>
    %239 = tpu.matmul %238, %237, %cst_65 {dimension_numbers = #tpu.dot_dimension_numbers<[1], [0], [0], [1], [0, 0, 1, 1], [], []>} : vector<3x128xf32>, vector<128x128xf32>, vector<3x128xf32> -> vector<3x128xf32>
    %c0_66 = arith.constant 0 : index
    %c0_67 = arith.constant 0 : index
    %240 = vector.load %arg8[%c0_66, %c0_67] : memref<3x1xf32, #tpu.memory_space<vmem>>, vector<3x1xf32>
    %241 = vector.broadcast %240 : vector<3x1xf32> to vector<3x128xf32>
    %242 = arith.addf %239, %241 : vector<3x128xf32>
    %cst_68 = arith.constant dense<0xFF800000> : vector<128xf32>
    %243 = vector.multi_reduction <maximumf>, %242, %cst_68 [0] : vector<3x128xf32> to vector<128xf32>
    %244 = vector.shape_cast %243 : vector<128xf32> to vector<1x128xf32>
    %245 = vector.broadcast %244 : vector<1x128xf32> to vector<3x128xf32>
    %246 = arith.subf %242, %245 : vector<3x128xf32>
    %247 = math.exp %246 : vector<3x128xf32>
    %cst_69 = arith.constant dense<0.000000e+00> : vector<128xf32>
    %248 = vector.multi_reduction <add>, %247, %cst_69 [0] : vector<3x128xf32> to vector<128xf32>
    %249 = vector.shape_cast %248 : vector<128xf32> to vector<1x128xf32>
    %250 = vector.broadcast %249 : vector<1x128xf32> to vector<3x128xf32>
    %251 = arith.divf %247, %250 : vector<3x128xf32>
    %c0_70 = arith.constant 0 : index
    %c0_71 = arith.constant 0 : index
    %252 = vector.load %arg9[%c0_70, %c0_71] : memref<3x128xf32, #tpu.memory_space<vmem>>, vector<3x128xf32>
    tpu.vector_store %arg9[%c0_70, %c0_71], %251 {strides = array<i32>} : memref<3x128xf32, #tpu.memory_space<vmem>>, vector<3x128xf32>,
    return
  }
  func.func @transform_0(%arg0: i32) -> (i32, i32) {
    %c0_i32 = arith.constant 0 : i32
    %c0_i32_0 = arith.constant 0 : i32
    return %arg0, %c0_i32 : i32, i32
  }
  func.func @transform_1(%arg0: i32) -> (i32, i32) {
    %c0_i32 = arith.constant 0 : i32
    %c0_i32_0 = arith.constant 0 : i32
    %c0_i32_1 = arith.constant 0 : i32
    return %c0_i32, %c0_i32_0 : i32, i32
  }
  func.func @transform_2(%arg0: i32) -> i32 {
    %c0_i32 = arith.constant 0 : i32
    %c0_i32_0 = arith.constant 0 : i32
    return %c0_i32 : i32
  }
  func.func @transform_3(%arg0: i32) -> (i32, i32) {
    %c0_i32 = arith.constant 0 : i32
    %c0_i32_0 = arith.constant 0 : i32
    %c0_i32_1 = arith.constant 0 : i32
    return %c0_i32, %c0_i32_0 : i32, i32
  }
  func.func @transform_4(%arg0: i32) -> (i32, i32) {
    %c0_i32 = arith.constant 0 : i32
    %c0_i32_0 = arith.constant 0 : i32
    %c0_i32_1 = arith.constant 0 : i32
    return %c0_i32, %c0_i32_0 : i32, i32
  }
  func.func @transform_5(%arg0: i32) -> (i32, i32) {
    %c0_i32 = arith.constant 0 : i32
    %c0_i32_0 = arith.constant 0 : i32
    %c0_i32_1 = arith.constant 0 : i32
    return %c0_i32, %c0_i32_0 : i32, i32
  }
  func.func @transform_6(%arg0: i32) -> (i32, i32) {
    %c0_i32 = arith.constant 0 : i32
    %c0_i32_0 = arith.constant 0 : i32
    %c0_i32_1 = arith.constant 0 : i32
    return %c0_i32, %c0_i32_0 : i32, i32
  }
  func.func @transform_7(%arg0: i32) -> (i32, i32) {
    %c0_i32 = arith.constant 0 : i32
    %c0_i32_0 = arith.constant 0 : i32
    %c0_i32_1 = arith.constant 0 : i32
    return %c0_i32, %c0_i32_0 : i32, i32
  }
  func.func @transform_8(%arg0: i32) -> (i32, i32) {
    %c0_i32 = arith.constant 0 : i32
    %c0_i32_0 = arith.constant 0 : i32
    return %c0_i32, %arg0 : i32, i32
  }
}

</mosaic_0001>

<bundles_post_ra>
// kernel: eegnet_forward.1
= control target key start
LH: loop header
LB: loop body
LE: loop exit
PB: predicated region body
PF: predicated region fallthrough
CT: control target
= control target key end

     0   :  { %13 = vsyncpa [#allocation4], 0  ;;  %s5588_s0 = inlined_call_operand.vmem [shape: f32[128,64], index: 0, kind: input, shape index: {}]   ;;  %s5589_s1 = inlined_call_operand.vmem [shape: f32[256,64], index: 1, kind: input, shape index: {}]   ;;  %s5590_s2 = inlined_call_operand.vmem [shape: f32[32], index: 2, kind: input, shape index: {}]   ;;  %s5591_s3 = inlined_call_operand.vmem [shape: f32[512,1], index: 3, kind: input, shape index: {}]   ;;  %s5592_s4 = inlined_call_operand.vmem [shape: f32[128,512], index: 4, kind: input, shape index: {}]   ;;  %s5593_s5 = inlined_call_operand.vmem [shape: f32[128,1], index: 5, kind: input, shape index: {}]   ;;  %s5594_s6 = inlined_call_operand.vmem [shape: f32[3,128], index: 6, kind: input, shape index: {}]   ;;  %s5595_s7 = inlined_call_operand.vmem [shape: f32[3,1], index: 7, kind: input, shape index: {}]   ;;  %s5596_s8 = inlined_call_operand.vmem [shape: f32[3,128], index: 8, kind: output, shape index: {}]  }
   0x1   :  { %s24_s29 = sshll.u32 %s5590_s2, 4  ;;  %s25_s29 = int_to_ptr.vmem [resolvable:$true] %s24_s29 }
   0x2   :  { %s3250_s30 = scalar_lea.vmem %s25_s29, 16  ;;  %p3255_p1 = scmp.lt.s32.totalorder %s25_s29, %s25_s29 }
   0x3   :  { %p3251_p0 = scmp.ne.s32.totalorder %s25_s29, %s3250_s30  ;;  %p3256_p2 = scmp.lt.s32.totalorder %s3250_s30, %s3250_s30 }
   0x5   :  { %p3257_p3 = por %p3256_p2, %p3255_p1 }
   0x7   :  { %p3258_p4 = pnand %p3257_p3, %p3251_p0 }
   0x9   :  { %3261 = shalt.err (!%p3258_p4)
}
   0xa   :  { %s3264_s9 = smov [#allocation3]  }
   0xb   :  { %27 = dma.vmem_to_smem %s25_s29, 16, %s3264_s9, [#allocation4]  }
   0xc   :  { %3262 = dma.done.wait [#allocation4], 16  }
   0xd   :  { %3263 = vsyncadd [#allocation4], 4294967280 }
   0xe   :  { %41 = sfence }
   0xf   :  { %v57_v0 = vld [vmem:[%s5588_s0 + $0x78] sm:$0xff]  ;;  %vm90_vm0 = vcmask 523264   ;;  %v56_v1 = vld [vmem:[%s5588_s0 + $0x70] sm:$0xff]  ;;  %v3265_v3 = vmov 0   ;;  %v55_v6 = vld [vmem:[%s5588_s0 + $0x68] sm:$0xff]  ;;  %s2640_s27 = sld [smem:[#allocation3 + $0x4]] }
  0x10   :  { %v1059_v2 = vld [vmem:[%s5591_s3 + $0xf8] sm:$0xff]  ;;  %2965 = vmatprep.subr.msk.mxu0 %vm90_vm0, %v57_v0  ;;  %3084 = vset.pattern.permute.xlu0 %v3265_v3  ;;  %v1058_v4 = vld [vmem:[%s5591_s3 + $0xf0] sm:$0xff]  ;;  %v1057_v8 = vld [vmem:[%s5591_s3 + $0xe8] sm:$0xff]  ;;  %s2665_s28 = sld [smem:[#allocation3 + $0xd]] }
  0x11   :  { %2966 = vmatpush3.xpose.msk.msra.mxu0 %vm90_vm0, %v57_v0  ;;  %1097 = vperm.xlu0 %3084, %v1059_v2   ;;  %v707_v5 = vld [vmem:[%s5591_s3 + $0x78] sm:$0xff]  ;;  %v706_v7 = vld [vmem:[%s5591_s3 + $0x70] sm:$0xff]  ;;  %v54_v9 = vld [vmem:[%s5588_s0 + $0x60] sm:$0xff]  ;;  %s2641_s29 = sld [smem:[#allocation3 + $0x5]] }
  0x12   :  { %2967 = vmatprep.subr.msk.mxu0 %vm90_vm0, %v56_v1  ;;  %3085 = vset.pattern.permute.xlu1 %v3265_v3  ;;  %v705_v10 = vld [vmem:[%s5591_s3 + $0x68] sm:$0xff]  ;;  %v1056_v11 = vld [vmem:[%s5591_s3 + $0xe0] sm:$0xff]  ;;  %v53_v12 = vld [vmem:[%s5588_s0 + $0x58] sm:$0xff]  ;;  %s2652_s30 = sld [smem:[#allocation3 + $0x8]] }
  0x13   :  { %1092 = vperm.xlu1 %3085, %v1058_v4   ;;  %v704_v13 = vld [vmem:[%s5591_s3 + $0x60] sm:$0xff]  ;;  %v1055_v15 = vld [vmem:[%s5591_s3 + $0xd8] sm:$0xff]  ;;  %v52_v16 = vld [vmem:[%s5588_s0 + $0x50] sm:$0xff]  ;;  %s460_s9 = sld [smem:[#allocation3]] }
  0x14   :  { %v58_v14 = vld [vmem:[%s5589_s1] sm:$0xff]  ;;  %v703_v17 = vld [vmem:[%s5591_s3 + $0x58] sm:$0xff]  ;;  %v1054_v18 = vld [vmem:[%s5591_s3 + $0xd0] sm:$0xff]  ;;  %s2666_s10 = sld [smem:[#allocation3 + $0xe]] }
  0x15   :  { %2968 = vmatpush3.xpose.msk.msra.mxu0 %vm90_vm0, %v56_v1  ;;  %745 = vperm.xlu0 %3084, %v707_v5   ;;  %v51_v19 = vld [vmem:[%s5588_s0 + $0x48] sm:$0xff]  ;;  %v702_v20 = vld [vmem:[%s5591_s3 + $0x50] sm:$0xff]  ;;  %v50_v22 = vld [vmem:[%s5588_s0 + $0x40] sm:$0xff]  ;;  %s2642_s11 = sld [smem:[#allocation3 + $0x6]] }
  0x16   :  { %2969 = vmatprep.subr.msk.mxu0 %vm90_vm0, %v55_v6  ;;  %2997 = vmatprep.mubr.msk.f32.mxu0 %vm90_vm0, %v58_v14  ;;  %v1053_v21 = vld [vmem:[%s5591_s3 + $0xc8] sm:$0xff]  ;;  %v1052_v24 = vld [vmem:[%s5591_s3 + $0xc0] sm:$0xff]  ;;  %v49_v25 = vld [vmem:[%s5588_s0 + $0x38] sm:$0xff]  ;;  %s2653_s12 = sld [smem:[#allocation3 + $0x9]] }
  0x17   :  { %740 = vperm.xlu1 %3085, %v706_v7   ;;  %v701_v23 = vld [vmem:[%s5591_s3 + $0x48] sm:$0xff]  ;;  %v700_v26 = vld [vmem:[%s5591_s3 + $0x40] sm:$0xff]  ;;  %v883_v27 = vld [vmem:[%s5591_s3 + $0xb8] sm:$0xff]  ;;  %s2629_s2 = sld [smem:[#allocation3 + $0x1]] }
  0x18   :  { %v48_v28 = vld [vmem:[%s5588_s0 + $0x30] sm:$0xff]  ;;  %v531_v29 = vld [vmem:[%s5591_s3 + $0x38] sm:$0xff]  ;;  %v47_v31 = vld [vmem:[%s5588_s0 + $0x28] sm:$0xff]  ;;  %s2667_s13 = sld [smem:[#allocation3 + $0xf]] }
  0x19   :  { %2970 = vmatpush3.xpose.msk.msra.mxu0 %vm90_vm0, %v55_v6  ;;  %1087 = vperm.xlu0 %3084, %v1057_v8   ;;  %v882_v30 = vld [vmem:[%s5591_s3 + $0xb0] sm:$0xff]  ;;  %v881_v33 = vld [vmem:[%s5591_s3 + $0xa8] sm:$0xff]  ;;  %v46_v34 = vld [vmem:[%s5588_s0 + $0x20] sm:$0xff]  ;;  %s2643_s14 = sld [smem:[#allocation3 + $0x7]] }
  0x1a   :  { %2971 = vmatprep.subr.msk.mxu0 %vm90_vm0, %v54_v9  ;;  %v530_v32 = vld [vmem:[%s5591_s3 + $0x30] sm:$0xff]  ;;  %v529_v35 = vld [vmem:[%s5591_s3 + $0x28] sm:$0xff]  ;;  %v880_v36 = vld [vmem:[%s5591_s3 + $0xa0] sm:$0xff]  ;;  %s2712_s15 = sld [smem:[#allocation3 + $0x1c]] }
  0x1b   :  { %735 = vperm.xlu1 %3085, %v705_v10   ;;  %v45_v37 = vld [vmem:[%s5588_s0 + $0x18] sm:$0xff]  ;;  %v528_v38 = vld [vmem:[%s5591_s3 + $0x20] sm:$0xff]  ;;  %v44_v40 = vld [vmem:[%s5588_s0 + $0x10] sm:$0xff]  ;;  %s2655_s16 = sld [smem:[#allocation3 + $0xb]] }
  0x1c   :  { %v879_v39 = vld [vmem:[%s5591_s3 + $0x98] sm:$0xff]  ;;  %v878_v42 = vld [vmem:[%s5591_s3 + $0x90] sm:$0xff]  ;;  %v43_v43 = vld [vmem:[%s5588_s0 + $0x8] sm:$0xff]  ;;  %s2631_s17 = sld [smem:[#allocation3 + $0x3]] }
  0x1d   :  { %2972 = vmatpush3.xpose.msk.msra.mxu0 %vm90_vm0, %v54_v9  ;;  %1082 = vperm.xlu0 %3084, %v1056_v11   ;;  %v527_v41 = vld [vmem:[%s5591_s3 + $0x18] sm:$0xff]  ;;  %v526_v44 = vld [vmem:[%s5591_s3 + $0x10] sm:$0xff]  ;;  %v877_v45 = vld [vmem:[%s5591_s3 + $0x88] sm:$0xff]  ;;  %s2688_s18 = sld [smem:[#allocation3 + $0x14]] }
  0x1e   :  { %2973 = vmatprep.subr.msk.mxu0 %vm90_vm0, %v53_v12  ;;  %v42_v46 = vld [vmem:[%s5588_s0] sm:$0xff]  ;;  %v525_v47 = vld [vmem:[%s5591_s3 + $0x8] sm:$0xff]  ;;  %v60_v51 = vld [vmem:[%s5589_s1 + $0x10] sm:$0xff]  ;;  %s2630_s0 = sld [smem:[#allocation3 + $0x2]] }
  0x1f   :  { %730 = vperm.xlu1 %3085, %v704_v13   ;;  %v876_v48 = vld [vmem:[%s5591_s3 + $0x80] sm:$0xff]  ;;  %v59_v50 = vld [vmem:[%s5589_s1 + $0x8] sm:$0xff]  ;;  %v1763_v52 = vld [vmem:[%s5591_s3 + $0x1f8] sm:$0xff]  ;;  %s3767_s19 = sld [smem:[#allocation3 + $0x15]] }
  0x20   :  { %v524_v49 = vld [vmem:[%s5591_s3] sm:$0xff]  ;;  %v1411_v53 = vld [vmem:[%s5591_s3 + $0x178] sm:$0xff]  ;;  %v1762_v56 = vld [vmem:[%s5591_s3 + $0x1f0] sm:$0xff]  ;;  %s2714_s20 = sld [smem:[#allocation3 + $0x1e]] }
  0x21   :  { %2974 = vmatpush3.xpose.msk.msra.mxu0 %vm90_vm0, %v53_v12  ;;  %1077 = vperm.xlu0 %3084, %v1055_v15   ;;  %v61_v54 = vld [vmem:[%s5589_s1 + $0x18] sm:$0xff]  ;;  %v62_v55 = vld [vmem:[%s5589_s1 + $0x20] sm:$0xff]  ;;  %v1410_v57 = vld [vmem:[%s5591_s3 + $0x170] sm:$0xff]  ;;  %s3771_s21 = sld [smem:[#allocation3 + $0x16]] }
  0x22   :  { %2975 = vmatprep.subr.msk.mxu0 %vm90_vm0, %v52_v16  ;;  %v63_v58 = vld [vmem:[%s5589_s1 + $0x28] sm:$0xff]  ;;  %v64_v59 = vld [vmem:[%s5589_s1 + $0x30] sm:$0xff]  ;;  %v65_v62 = vld [vmem:[%s5589_s1 + $0x38] sm:$0xff]  ;;  %s3783_s22 = sld [smem:[#allocation3 + $0x1f]] }
  0x23   :  { %725 = vperm.xlu1 %3085, %v703_v17   ;;  %v1761_v60 = vld [vmem:[%s5591_s3 + $0x1e8] sm:$0xff]  ;;  %v66_v63 = vld [vmem:[%s5589_s1 + $0x40] sm:$0xff]  ;;  %v68_v3 = vld [vmem:[%s5589_s1 + $0x50] sm:$0xff]  ;;  %s3938_s25 = sld [smem:[#allocation3 + $0x18]] }
  0x24   :  { %v1409_v61 = vld [vmem:[%s5591_s3 + $0x168] sm:$0xff]  ;;  %v1760_v0 = vld [vmem:[%s5591_s3 + $0x1e0] sm:$0xff]  ;;  %v1759_v4 = vld [vmem:[%s5591_s3 + $0x1d8] sm:$0xff]  ;;  %s4974_s23 = sld [smem:[#allocation3 + $0x1a]] }
  0x25   :  { %2976 = vmatpush3.xpose.msk.msra.mxu0 %vm90_vm0, %v52_v16  ;;  %1072 = vperm.xlu0 %3084, %v1054_v18   ;;  %v1408_v1 = vld [vmem:[%s5591_s3 + $0x160] sm:$0xff]  ;;  %v67_v2 = vld [vmem:[%s5589_s1 + $0x48] sm:$0xff]  ;;  %v1407_v5 = vld [vmem:[%s5591_s3 + $0x158] sm:$0xff]  ;;  %s4984_s26 = sld [smem:[#allocation3 + $0x1b]] }
  0x26   :  { %2977 = vmatprep.subr.msk.mxu0 %vm90_vm0, %v51_v19  ;;  %v69_v6 = vld [vmem:[%s5589_s1 + $0x58] sm:$0xff]  ;;  %v70_v7 = vld [vmem:[%s5589_s1 + $0x60] sm:$0xff]  ;;  %v1758_v8 = vld [vmem:[%s5591_s3 + $0x1d0] sm:$0xff] }
  0x27   :  { %720 = vperm.xlu1 %3085, %v702_v20   ;;  %v1406_v9 = vld [vmem:[%s5591_s3 + $0x150] sm:$0xff]  ;;  %v71_v10 = vld [vmem:[%s5589_s1 + $0x68] sm:$0xff]  ;;  %v73_v14 = vld [vmem:[%s5589_s1 + $0x78] sm:$0xff] }
  0x28   :  { %v72_v11 = vld [vmem:[%s5589_s1 + $0x70] sm:$0xff]  ;;  %v1757_v12 = vld [vmem:[%s5591_s3 + $0x1c8] sm:$0xff]  ;;  %v74_v15 = vld [vmem:[%s5589_s1 + $0x80] sm:$0xff] }
  0x29   :  { %2978 = vmatpush3.xpose.msk.msra.mxu0 %vm90_vm0, %v51_v19  ;;  %1067 = vperm.xlu0 %3084, %v1053_v21   ;;  %v1405_v13 = vld [vmem:[%s5591_s3 + $0x148] sm:$0xff]  ;;  %v1756_v16 = vld [vmem:[%s5591_s3 + $0x1c0] sm:$0xff]  ;;  %v76_v19 = vld [vmem:[%s5589_s1 + $0x90] sm:$0xff] }
  0x2a   :  { %2979 = vmatprep.subr.msk.mxu0 %vm90_vm0, %v50_v22  ;;  %v1404_v17 = vld [vmem:[%s5591_s3 + $0x140] sm:$0xff]  ;;  %v75_v18 = vld [vmem:[%s5589_s1 + $0x88] sm:$0xff]  ;;  %v1587_v20 = vld [vmem:[%s5591_s3 + $0x1b8] sm:$0xff] }
  0x2b   :  { %715 = vperm.xlu1 %3085, %v701_v23   ;;  %v1235_v21 = vld [vmem:[%s5591_s3 + $0x138] sm:$0xff]  ;;  %v78_v23 = vld [vmem:[%s5589_s1 + $0xa0] sm:$0xff] }
  0x2d   :  { %2980 = vmatpush3.xpose.msk.msra.mxu0 %vm90_vm0, %v50_v22  ;;  %1062 = vperm.xlu0 %3084, %v1052_v24   ;;  %v77_v22 = vld [vmem:[%s5589_s1 + $0x98] sm:$0xff]  ;;  %v1586_v24 = vld [vmem:[%s5591_s3 + $0x1b0] sm:$0xff] }
  0x2e   :  { %2981 = vmatprep.subr.msk.mxu0 %vm90_vm0, %v49_v25 }
  0x2f   :  { %710 = vperm.xlu1 %3085, %v700_v26   ;;  %v79_v26 = vld [vmem:[%s5589_s1 + $0xa8] sm:$0xff] }
  0x31   :  { %2982 = vmatpush3.xpose.msk.msra.mxu0 %vm90_vm0, %v49_v25  ;;  %921 = vperm.xlu0 %3084, %v883_v27   ;;  %v1234_v25 = vld [vmem:[%s5591_s3 + $0x130] sm:$0xff] }
  0x32   :  { %2983 = vmatprep.subr.msk.mxu0 %vm90_vm0, %v48_v28  ;;  %v80_v27 = vld [vmem:[%s5589_s1 + $0xb0] sm:$0xff] }
  0x33   :  { %569 = vperm.xlu1 %3085, %v531_v29   ;;  %v1233_v29 = vld [vmem:[%s5591_s3 + $0x128] sm:$0xff] }
  0x35   :  { %2984 = vmatpush3.xpose.msk.msra.mxu0 %vm90_vm0, %v48_v28  ;;  %916 = vperm.xlu0 %3084, %v882_v30   ;;  %v1585_v28 = vld [vmem:[%s5591_s3 + $0x1a8] sm:$0xff]  ;;  %v81_v30 = vld [vmem:[%s5589_s1 + $0xb8] sm:$0xff] }
  0x36   :  { %2985 = vmatprep.subr.msk.mxu0 %vm90_vm0, %v47_v31 }
  0x37   :  { %564 = vperm.xlu1 %3085, %v530_v32   ;;  %v1584_v32 = vld [vmem:[%s5591_s3 + $0x1a0] sm:$0xff] }
  0x39   :  { %2986 = vmatpush3.xpose.msk.msra.mxu0 %vm90_vm0, %v47_v31  ;;  %911 = vperm.xlu0 %3084, %v881_v33   ;;  %v82_v31 = vld [vmem:[%s5589_s1 + $0xc0] sm:$0xff] }
  0x3a   :  { %2987 = vmatprep.subr.msk.mxu0 %vm90_vm0, %v46_v34  ;;  %v1232_v33 = vld [vmem:[%s5591_s3 + $0x120] sm:$0xff] }
  0x3b   :  { %559 = vperm.xlu1 %3085, %v529_v35   ;;  %v84_v35 = vld [vmem:[%s5589_s1 + $0xd0] sm:$0xff] }
  0x3d   :  { %2988 = vmatpush3.xpose.msk.msra.mxu0 %vm90_vm0, %v46_v34  ;;  %906 = vperm.xlu0 %3084, %v880_v36   ;;  %v83_v34 = vld [vmem:[%s5589_s1 + $0xc8] sm:$0xff]  ;;  %v1583_v36 = vld [vmem:[%s5591_s3 + $0x198] sm:$0xff] }
  0x3e   :  { %2989 = vmatprep.subr.msk.mxu0 %vm90_vm0, %v45_v37 }
  0x3f   :  { %554 = vperm.xlu1 %3085, %v528_v38   ;;  %v85_v38 = vld [vmem:[%s5589_s1 + $0xd8] sm:$0xff] }
  0x41   :  { %2990 = vmatpush3.xpose.msk.msra.mxu0 %vm90_vm0, %v45_v37  ;;  %901 = vperm.xlu0 %3084, %v879_v39   ;;  %v1231_v37 = vld [vmem:[%s5591_s3 + $0x118] sm:$0xff]  ;;  %v86_v39 = vld [vmem:[%s5589_s1 + $0xe0] sm:$0xff] }
  0x42   :  { %2991 = vmatprep.subr.msk.mxu0 %vm90_vm0, %v44_v40 }
  0x43   :  { %549 = vperm.xlu1 %3085, %v527_v41   ;;  %v1230_v41 = vld [vmem:[%s5591_s3 + $0x110] sm:$0xff] }
  0x45   :  { %2992 = vmatpush3.xpose.msk.msra.mxu0 %vm90_vm0, %v44_v40  ;;  %896 = vperm.xlu0 %3084, %v878_v42   ;;  %v1582_v40 = vld [vmem:[%s5591_s3 + $0x190] sm:$0xff]  ;;  %v87_v42 = vld [vmem:[%s5589_s1 + $0xe8] sm:$0xff] }
  0x46   :  { %2993 = vmatprep.subr.msk.mxu0 %vm90_vm0, %v43_v43 }
  0x47   :  { %544 = vperm.xlu1 %3085, %v526_v44   ;;  %v1581_v44 = vld [vmem:[%s5591_s3 + $0x188] sm:$0xff] }
  0x49   :  { %2994 = vmatpush3.xpose.msk.msra.mxu0 %vm90_vm0, %v43_v43  ;;  %891 = vperm.xlu0 %3084, %v877_v45   ;;  %v88_v43 = vld [vmem:[%s5589_s1 + $0xf0] sm:$0xff]  ;;  %v1229_v45 = vld [vmem:[%s5591_s3 + $0x108] sm:$0xff] }
  0x4a   :  { %2995 = vmatprep.subr.msk.mxu0 %vm90_vm0, %v42_v46 }
  0x4b   :  { %539 = vperm.xlu1 %3085, %v525_v47   ;;  %v1580_v47 = vld [vmem:[%s5591_s3 + $0x180] sm:$0xff] }
  0x4d   :  { %2996 = vmatpush3.xpose.msk.msra.mxu0 %vm90_vm0, %v42_v46  ;;  %886 = vperm.xlu0 %3084, %v876_v48   ;;  %v89_v46 = vld [vmem:[%s5589_s1 + $0xf8] sm:$0xff]  ;;  %v1228_v48 = vld [vmem:[%s5591_s3 + $0x100] sm:$0xff]  ;;  %s2664_s3 = sld [smem:[#allocation3 + $0xc]] }
  0x4e   :  { %s3803_s1 = sld [smem:[#allocation3 + $0x17]] }
  0x4f   :  { %534 = vperm.xlu1 %3085, %v524_v49   ;;  %v2011_v49 = vld [vmem:[%s5593_s5 + $0x78] sm:$0xff] }
  0x50   :  { %2998 = vmatmul.mubr.msk.f32.vlgmr.msra.gmra.mxu0 %vm90_vm0, %v59_v50  ;;  %v2010_v50 = vld [vmem:[%s5593_s5 + $0x70] sm:$0xff] }
  0x51   :  { %3000 = vmatprep.mubr.msk.f32.mxu0 %vm90_vm0, %v60_v51  ;;  %1801 = vperm.xlu0 %3084, %v1763_v52   ;;  %v2009_v51 = vld [vmem:[%s5593_s5 + $0x68] sm:$0xff]  ;;  %v2008_v52 = vld [vmem:[%s5593_s5 + $0x60] sm:$0xff] }
  0x53   :  { %1449 = vperm.xlu1 %3085, %v1411_v53   ;;  %v2007_v53 = vld [vmem:[%s5593_s5 + $0x58] sm:$0xff] }
  0x54   :  { %3001 = vmatmul.mubr.msk.f32.gmra.mxu0 %vm90_vm0, %v61_v54  ;;  %v2006_v54 = vld [vmem:[%s5593_s5 + $0x50] sm:$0xff] }
  0x55   :  { %3003 = vmatprep.mubr.msk.f32.mxu0 %vm90_vm0, %v62_v55  ;;  %1796 = vperm.xlu0 %3084, %v1762_v56   ;;  %v2005_v55 = vld [vmem:[%s5593_s5 + $0x48] sm:$0xff]  ;;  %v2004_v56 = vld [vmem:[%s5593_s5 + $0x40] sm:$0xff] }
  0x57   :  { %1444 = vperm.xlu1 %3085, %v1410_v57   ;;  %v2003_v57 = vld [vmem:[%s5593_s5 + $0x38] sm:$0xff] }
  0x58   :  { %3004 = vmatmul.mubr.msk.f32.gmra.mxu0 %vm90_vm0, %v63_v58  ;;  %v2002_v58 = vld [vmem:[%s5593_s5 + $0x30] sm:$0xff] }
  0x59   :  { %3006 = vmatprep.mubr.msk.f32.mxu0 %vm90_vm0, %v64_v59  ;;  %1791 = vperm.xlu0 %3084, %v1761_v60   ;;  %v2001_v59 = vld [vmem:[%s5593_s5 + $0x28] sm:$0xff]  ;;  %v2000_v60 = vld [vmem:[%s5593_s5 + $0x20] sm:$0xff] }
  0x5b   :  { %1439 = vperm.xlu1 %3085, %v1409_v61   ;;  %v1999_v61 = vld [vmem:[%s5593_s5 + $0x18] sm:$0xff] }
  0x5c   :  { %3007 = vmatmul.mubr.msk.f32.gmra.mxu0 %vm90_vm0, %v65_v62  ;;  %v1998_v62 = vld [vmem:[%s5593_s5 + $0x10] sm:$0xff] }
  0x5d   :  { %3009 = vmatprep.mubr.msk.f32.mxu0 %vm90_vm0, %v66_v63  ;;  %1786 = vperm.xlu0 %3084, %v1760_v0   ;;  %v1997_v63 = vld [vmem:[%s5593_s5 + $0x8] sm:$0xff]  ;;  %v1996_v0 = vld [vmem:[%s5593_s5] sm:$0xff]  ;;  %s2654_s5 = sld [smem:[#allocation3 + $0xa]] }
  0x5f   :  { %1434 = vperm.xlu1 %3085, %v1408_v1   ;;  %v2479_v1 = vld [vmem:[%s5595_s7] sm:$0x7]  ;;  %s2713_s7 = sld [smem:[#allocation3 + $0x1d]] }
  0x60   :  { %3010 = vmatmul.mubr.msk.f32.gmra.mxu0 %vm90_vm0, %v67_v2 }
  0x61   :  { %3012 = vmatprep.mubr.msk.f32.mxu0 %vm90_vm0, %v68_v3  ;;  %1781 = vperm.xlu0 %3084, %v1759_v4  }
  0x63   :  { %1429 = vperm.xlu1 %3085, %v1407_v5   ;;  %v3777_v5 = vstv %s2664_s3 }
  0x64   :  { %3013 = vmatmul.mubr.msk.f32.gmra.mxu0 %vm90_vm0, %v69_v6  ;;  %v3779_v6 = vstv %s2665_s28  ;;  %s4995_s28 = sld [smem:[#allocation3 + $0x10]] }
  0x65   :  { %3015 = vmatprep.mubr.msk.f32.mxu0 %vm90_vm0, %v70_v7  ;;  %1776 = vperm.xlu0 %3084, %v1758_v8   ;;  %v3781_v7 = vstv %s2640_s27  ;;  %v3785_v8 = vstv %s2666_s10  ;;  %s5013_s10 = sld [smem:[#allocation3 + $0x12]] }
  0x67   :  { %1424 = vperm.xlu1 %3085, %v1406_v9   ;;  %v3787_v9 = vstv %s2641_s29  ;;  %s5003_s29 = sld [smem:[#allocation3 + $0x11]] }
  0x68   :  { %3016 = vmatmul.mubr.msk.f32.gmra.mxu0 %vm90_vm0, %v71_v10  ;;  %v3789_v10 = vstv %s2652_s30 }
  0x69   :  { %3018 = vmatprep.mubr.msk.f32.mxu0 %vm90_vm0, %v72_v11  ;;  %1771 = vperm.xlu0 %3084, %v1757_v12   ;;  %v3791_v11 = vstv %s460_s9 }
  0x6b   :  { %1419 = vperm.xlu1 %3085, %v1405_v13   ;;  %v3795_v13 = vstv %s2667_s13 }
  0x6c   :  { %3019 = vmatmul.mubr.msk.f32.gmra.mxu0 %vm90_vm0, %v73_v14  ;;  %v3797_v14 = vstv %s2642_s11 }
  0x6d   :  { %3021 = vmatprep.mubr.msk.f32.mxu0 %vm90_vm0, %v74_v15  ;;  %1766 = vperm.xlu0 %3084, %v1756_v16   ;;  %v3799_v15 = vstv %s2653_s12  ;;  %v3801_v16 = vstv %s2629_s2  ;;  %s5023_s2 = sld [smem:[#allocation3 + $0x13]] }
  0x6f   :  { %1414 = vperm.xlu1 %3085, %v1404_v17   ;;  %v3805_v17 = vstv %s2643_s14 }
  0x70   :  { %3022 = vmatmul.mubr.msk.f32.gmra.mxu0 %vm90_vm0, %v75_v18  ;;  %5663 = vst [vmem:[#allocation10_spill] sm:$0xff] %v3805_v17  ;;  %v3807_v18 = vstv %s2654_s5 }
  0x71   :  { %3024 = vmatprep.mubr.msk.f32.mxu0 %vm90_vm0, %v76_v19  ;;  %1625 = vperm.xlu0 %3084, %v1587_v20   ;;  %v3809_v19 = vstv %s2630_s0  ;;  %v3811_v20 = vstv %s2712_s15 }
  0x73   :  { %1273 = vperm.xlu1 %3085, %v1235_v21  }
  0x74   :  { %3025 = vmatmul.mubr.msk.f32.gmra.mxu0 %vm90_vm0, %v77_v22  ;;  %v3815_v22 = vstv %s2655_s16 }
  0x75   :  { %3027 = vmatprep.mubr.msk.f32.mxu0 %vm90_vm0, %v78_v23  ;;  %1620 = vperm.xlu0 %3084, %v1586_v24   ;;  %5665 = vst [vmem:[#allocation12_spill] sm:$0xff] %v3815_v22  ;;  %v3817_v23 = vstv %s2631_s17  ;;  %v3819_v24 = vstv %s2713_s7 }
  0x76   :  { %5666 = vst [vmem:[#allocation13_spill] sm:$0xff] %v3817_v23  ;;  %5667 = vst [vmem:[#allocation14_spill] sm:$0xff] %v3819_v24 }
  0x77   :  { %1268 = vperm.xlu1 %3085, %v1234_v25   ;;  %v3821_v25 = vstv %s2688_s18 }
  0x78   :  { %3028 = vmatmul.mubr.msk.f32.gmra.mxu0 %vm90_vm0, %v79_v26 }
  0x79   :  { %3030 = vmatprep.mubr.msk.f32.mxu0 %vm90_vm0, %v80_v27  ;;  %1615 = vperm.xlu0 %3084, %v1585_v28   ;;  %v1869_v27 = vld [vmem:[%s5592_s4 + $0x8] sm:$0xff]  ;;  %v3830_v28 = vstv %s2714_s20 }
  0x7a   :  { %5668 = vst [vmem:[#allocation15_spill] sm:$0xff] %v3830_v28  ;;  %2156 = vmatprep.mubr.f32.mxu1 %v1869_v27 }
  0x7b   :  { %1263 = vperm.xlu1 %3085, %v1233_v29   ;;  %v3833_v29 = vstv %s3767_s19  ;;  %s4949_s19 = sld [smem:[#allocation3 + $0x19]] }
  0x7c   :  { %3031 = vmatmul.mubr.msk.f32.gmra.mxu0 %vm90_vm0, %v81_v30  ;;  %5669 = vst [vmem:[#allocation16_spill] sm:$0xff] %v3833_v29  ;;  %v3836_v30 = vstv %s3771_s21 }
  0x7d   :  { %3033 = vmatprep.mubr.msk.f32.mxu0 %vm90_vm0, %v82_v31  ;;  %1610 = vperm.xlu0 %3084, %v1584_v32   ;;  %5670 = vst [vmem:[#allocation17_spill] sm:$0xff] %v3836_v30 }
  0x7f   :  { %1258 = vperm.xlu1 %3085, %v1232_v33  }
  0x80   :  { %3034 = vmatmul.mubr.msk.f32.gmra.mxu0 %vm90_vm0, %v83_v34 }
  0x81   :  { %3036 = vmatprep.mubr.msk.f32.mxu0 %vm90_vm0, %v84_v35  ;;  %1605 = vperm.xlu0 %3084, %v1583_v36  }
  0x83   :  { %1253 = vperm.xlu1 %3085, %v1231_v37  }
  0x84   :  { %3037 = vmatmul.mubr.msk.f32.gmra.mxu0 %vm90_vm0, %v85_v38 }
  0x85   :  { %3039 = vmatprep.mubr.msk.f32.mxu0 %vm90_vm0, %v86_v39  ;;  %1600 = vperm.xlu0 %3084, %v1582_v40  }
  0x87   :  { %1248 = vperm.xlu1 %3085, %v1230_v41  }
  0x88   :  { %3040 = vmatmul.mubr.msk.f32.gmra.mxu0 %vm90_vm0, %v87_v42 }
  0x89   :  { %3042 = vmatprep.mubr.msk.f32.mxu0 %vm90_vm0, %v88_v43  ;;  %1595 = vperm.xlu0 %3084, %v1581_v44   ;;  %v3887_v44 = vstv %s3783_s22 }
  0x8a   :  { %5674 = vst [vmem:[#allocation21_spill] sm:$0xff] %v3887_v44 }
  0x8b   :  { %1243 = vperm.xlu1 %3085, %v1229_v45  }
  0x8c   :  { %3043 = vmatmul.mubr.msk.f32.gmra.mxu0 %vm90_vm0, %v89_v46 }
  0x8d   :  { %1590 = vperm.xlu0 %3084, %v1580_v47  }
  0x8f   :  { %1238 = vperm.xlu1 %3085, %v1228_v48  }
  0x91   :  { %2089 = vperm.xlu0 %3084, %v2011_v49  }
  0x93   :  { %2084 = vperm.xlu1 %3085, %v2010_v50  }
  0x95   :  { %2079 = vperm.xlu0 %3084, %v2009_v51  }
  0x97   :  { %2074 = vperm.xlu1 %3085, %v2008_v52  }
  0x99   :  { %2069 = vperm.xlu0 %3084, %v2007_v53   ;;  %v3920_v53 = vstv %s3803_s1 }
  0x9a   :  { %5678 = vst [vmem:[#allocation25_spill] sm:$0xff] %v3920_v53  ;;  %v4024_v53 = vpop.permute.xlu1 %1092 }
  0x9b   :  { %2064 = vperm.xlu1 %3085, %v2006_v54   ;;  %5693 = vst [vmem:[#allocation40_spill] sm:$0xff] %v4024_v53 }
  0x9d   :  { %2059 = vperm.xlu0 %3084, %v2005_v55  }
  0x9f   :  { %2054 = vperm.xlu1 %3085, %v2004_v56  }
  0xa1   :  { %2049 = vperm.xlu0 %3084, %v2003_v57  }
  0xa3   :  { %2044 = vperm.xlu1 %3085, %v2002_v58  }
  0xa5   :  { %2039 = vperm.xlu0 %3084, %v2001_v59  }
  0xa7   :  { %2034 = vperm.xlu1 %3085, %v2000_v60  }
  0xa9   :  { %2029 = vperm.xlu0 %3084, %v1999_v61  }
  0xab   :  { %2024 = vperm.xlu1 %3085, %v1998_v62  }
  0xad   :  { %2019 = vperm.xlu0 %3084, %v1997_v63  }
  0xaf   :  { %2014 = vperm.xlu1 %3085, %v1996_v0  }
  0xb1   :  { %2482 = vperm.xlu0 %3084, %v2479_v1  }
 0x110   :  { %v3769_v2 = vpop.f32.mrf.mxu0 }
 0x111   :  { %5659 = vst [vmem:[#allocation6_spill] sm:$0xff] %v3769_v2  ;;  %v3825_v26 = vmul.f32 %v3769_v2, %v3777_v5  ;;  %v3842_v32 = vmul.f32 %v3769_v2, %v3781_v7  ;;  %v3846_v33 = vmul.f32 %v3769_v2, %v3789_v10  ;;  %v3850_v34 = vmul.f32 %v3769_v2, %v3791_v11 }
 0x112   :  { %v3773_v3 = vpop.f32.mrf.mxu0  ;;  %v3854_v35 = vmul.f32 %v3769_v2, %v3811_v20  ;;  %v3936_v57 = vmul.f32 %v3769_v2, %v3821_v25 }
 0x113   :  { %5660 = vst [vmem:[#allocation7_spill] sm:$0xff] %v3773_v3  ;;  %v3858_v36 = vmul.f32 %v3777_v5, %v3773_v3  ;;  %v3862_v37 = vmul.f32 %v3781_v7, %v3773_v3  ;;  %v3866_v38 = vmul.f32 %v3789_v10, %v3773_v3  ;;  %v3870_v39 = vmul.f32 %v3791_v11, %v3773_v3 }
 0x114   :  { %v3775_v4 = vpop.f32.mrf.mxu0  ;;  %5672 = vst [vmem:[#allocation19_spill] sm:$0xff] %v3854_v35  ;;  %5681 = vst [vmem:[#allocation28_spill] sm:$0xff] %v3936_v57 }
 0x115   :  { %5661 = vst [vmem:[#allocation8_spill] sm:$0xff] %v3775_v4  ;;  %v3876_v41 = vmul.f32 %v3775_v4, %v3777_v5  ;;  %v3880_v42 = vmul.f32 %v3775_v4, %v3781_v7  ;;  %v3884_v43 = vmul.f32 %v3775_v4, %v3789_v10  ;;  %v3895_v46 = vmul.f32 %v3775_v4, %v3791_v11 }
 0x116   :  { %v3793_v12 = vpop.f32.mrf.mxu0  ;;  %v3899_v47 = vmul.f32 %v3775_v4, %v3811_v20  ;;  %v3903_v48 = vmul.f32 %v3775_v4, %v3821_v25 }
 0x117   :  { %5662 = vst [vmem:[#allocation9_spill] sm:$0xff] %v3793_v12  ;;  %v3891_v45 = vmul.f32 %v3777_v5, %v3793_v12  ;;  %v3909_v50 = vmul.f32 %v3781_v7, %v3793_v12  ;;  %v3913_v51 = vmul.f32 %v3789_v10, %v3793_v12  ;;  %v3917_v52 = vmul.f32 %v3791_v11, %v3793_v12 }
 0x118   :  { %v3813_v21 = vpop.f32.mrf.mxu0  ;;  %5675 = vst [vmem:[#allocation22_spill] sm:$0xff] %v3899_v47  ;;  %5676 = vst [vmem:[#allocation23_spill] sm:$0xff] %v3903_v48  ;;  %v3928_v55 = vmul.f32 %v3811_v20, %v3793_v12  ;;  %v3932_v56 = vmul.f32 %v3821_v25, %v3793_v12 }
 0x119   :  { %5664 = vst [vmem:[#allocation11_spill] sm:$0xff] %v3813_v21  ;;  %v3924_v54 = vmul.f32 %v3813_v21, %v3777_v5  ;;  %v3944_v59 = vmul.f32 %v3813_v21, %v3781_v7  ;;  %v3948_v60 = vmul.f32 %v3813_v21, %v3789_v10  ;;  %v3952_v61 = vmul.f32 %v3813_v21, %v3791_v11 }
 0x11a   :  { %v3838_v31 = vpop.f32.mrf.mxu0  ;;  %5679 = vst [vmem:[#allocation26_spill] sm:$0xff] %v3928_v55  ;;  %5680 = vst [vmem:[#allocation27_spill] sm:$0xff] %v3932_v56  ;;  %v3956_v62 = vmul.f32 %v3813_v21, %v3811_v20  ;;  %v3972_v27 = vmul.f32 %v3813_v21, %v3821_v25 }
 0x11b   :  { %5671 = vst [vmem:[#allocation18_spill] sm:$0xff] %v3838_v31  ;;  %v3960_v63 = vmul.f32 %v3777_v5, %v3838_v31  ;;  %v3964_v0 = vmul.f32 %v3781_v7, %v3838_v31  ;;  %v3968_v1 = vmul.f32 %v3789_v10, %v3838_v31  ;;  %v3982_v4 = vmul.f32 %v3791_v11, %v3838_v31 }
 0x11c   :  { %v3872_v40 = vpop.f32.mrf.mxu0  ;;  %5683 = vst [vmem:[#allocation30_spill] sm:$0xff] %v3956_v62  ;;  %5684 = vst [vmem:[#allocation31_spill] sm:$0xff] %v3972_v27  ;;  %v3986_v57 = vmul.f32 %v3811_v20, %v3838_v31  ;;  %v3990_v35 = vmul.f32 %v3821_v25, %v3838_v31  ;;  %v4020_v27 = vmul.f32 %v3811_v20, %v3773_v3  ;;  %v4022_v62 = vpop.permute.xlu0 %1097 }
 0x11d   :  { %5673 = vst [vmem:[#allocation20_spill] sm:$0xff] %v3872_v40  ;;  %v3978_v12 = vmul.f32 %v3872_v40, %v3777_v5  ;;  %v3994_v21 = vmul.f32 %v3872_v40, %v3781_v7  ;;  %v4000_v55 = vmul.f32 %v3872_v40, %v3789_v10  ;;  %v4004_v48 = vmul.f32 %v3872_v40, %v3791_v11 }
 0x11e   :  { %v3905_v49 = vpop.f32.mrf.mxu0  ;;  %5686 = vst [vmem:[#allocation33_spill] sm:$0xff] %v3986_v57  ;;  %5687 = vst [vmem:[#allocation34_spill] sm:$0xff] %v3990_v35  ;;  %v4012_v35 = vmul.f32 %v3872_v40, %v3811_v20  ;;  %v4016_v57 = vmul.f32 %v3872_v40, %v3821_v25 }
 0x11f   :  { %5677 = vst [vmem:[#allocation24_spill] sm:$0xff] %v3905_v49  ;;  %5691 = vst [vmem:[#allocation38_spill] sm:$0xff] %v4020_v27  ;;  %v4028_v30 = vmul.f32 %v3777_v5, %v3905_v49  ;;  %v4042_v27 = vmul.f32 %v3781_v7, %v3905_v49  ;;  %v4048_v28 = vmul.f32 %v3789_v10, %v3905_v49 }
 0x120   :  { %v3940_v58 = vpop.f32.mrf.mxu0  ;;  %5689 = vst [vmem:[#allocation36_spill] sm:$0xff] %v4012_v35  ;;  %5690 = vst [vmem:[#allocation37_spill] sm:$0xff] %v4016_v57  ;;  %v4036_v57 = vmul.f32 %v3821_v25, %v3773_v3  ;;  %v4063_v7 = vmul.f32 %v3821_v25, %v3905_v49  ;;  %v4066_v35 = vstv %s3938_s25  ;;  %v4100_v53 = vpop.permute.xlu0 %745 }
 0x121   :  { %5682 = vst [vmem:[#allocation29_spill] sm:$0xff] %v3940_v58  ;;  %v1001_v56 = vmul.f32 %v3940_v58, %v3779_v6  ;;  %v649_v31 = vmul.f32 %v3940_v58, %v3787_v9  ;;  %5692 = vst [vmem:[#allocation39_spill] sm:$0xff] %v4022_v62  ;;  %v825_v29 = vmul.f32 %v3940_v58, %v3799_v15 }
 0x122   :  { %v3974_v2 = vpop.f32.mrf.mxu0  ;;  %v473_v40 = vmul.f32 %v3940_v58, %v3801_v16  ;;  %5694 = vst [vmem:[#allocation41_spill] sm:$0xff] %v4036_v57  ;;  %v4052_v58 = vmul.f32 %v3791_v11, %v3905_v49  ;;  %v4059_v57 = vmul.f32 %v3811_v20, %v3905_v49  ;;  %5697 = vst [vmem:[#allocation44_spill] sm:$0xff] %v4063_v7 }
 0x123   :  { %5685 = vst [vmem:[#allocation32_spill] sm:$0xff] %v3974_v2  ;;  %v1000_v5 = vmul.f32 %v3779_v6, %v3974_v2  ;;  %v4055_v3 = vadd.f32 %v1001_v56, %v3825_v26  ;;  %5698 = vst [vmem:[#allocation45_spill] sm:$0xff] %v4066_v35  ;;  %v4071_v10 = vadd.f32 %v649_v31, %v3842_v32 }
 0x124   :  { %v4006_v47 = vpop.f32.mrf.mxu0  ;;  %5696 = vst [vmem:[#allocation43_spill] sm:$0xff] %v4059_v57  ;;  %v648_v11 = vmul.f32 %v3787_v9, %v3974_v2  ;;  %v824_v26 = vmul.f32 %v3799_v15, %v3974_v2  ;;  %v472_v20 = vmul.f32 %v3801_v16, %v3974_v2  ;;  %v4084_v49 = vadd.f32 %v825_v29, %v3846_v33  ;;  %v4102_v29 = vpop.permute.xlu1 %740 }
 0x125   :  { %5688 = vst [vmem:[#allocation35_spill] sm:$0xff] %v4006_v47  ;;  %v1003_v25 = vmul.f32 %v4006_v47, %v3779_v6  ;;  %v651_v56 = vmul.f32 %v4006_v47, %v3787_v9  ;;  %v4087_v31 = vadd.f32 %v473_v40, %v3850_v34  ;;  %v4094_v7 = vadd.f32 %v1000_v5, %v3858_v36 }
 0x126   :  { %v4038_v44 = vpop.f32.mrf.mxu0  ;;  %v827_v2 = vmul.f32 %v4006_v47, %v3799_v15  ;;  %v475_v57 = vmul.f32 %v4006_v47, %v3801_v16  ;;  %5701 = vst [vmem:[#allocation48_spill] sm:$0xff] %v4100_v53  ;;  %5702 = vst [vmem:[#allocation49_spill] sm:$0xff] %v4102_v29  ;;  %v4117_v53 = vadd.f32 %v648_v11, %v3862_v37 }
 0x127   :  { %5695 = vst [vmem:[#allocation42_spill] sm:$0xff] %v4038_v44  ;;  %v1002_v35 = vmul.f32 %v3779_v6, %v4038_v44  ;;  %v650_v34 = vmul.f32 %v3787_v9, %v4038_v44  ;;  %v826_v36 = vmul.f32 %v3799_v15, %v4038_v44  ;;  %v474_v40 = vmul.f32 %v3801_v16, %v4038_v44 }
 0x128   :  { %v4068_v24 = vpop.f32.mrf.mxu0  ;;  %v4120_v29 = vadd.f32 %v824_v26, %v3866_v38  ;;  %v4123_v62 = vadd.f32 %v472_v20, %v3870_v39  ;;  %v4126_v23 = vadd.f32 %v1003_v25, %v3876_v41  ;;  %v4129_v22 = vadd.f32 %v651_v56, %v3880_v42 }
 0x129   :  { %5699 = vst [vmem:[#allocation46_spill] sm:$0xff] %v4068_v24  ;;  %v1005_v33 = vmul.f32 %v4068_v24, %v3779_v6  ;;  %v653_v47 = vmul.f32 %v4068_v24, %v3787_v9  ;;  %v829_v44 = vmul.f32 %v4068_v24, %v3799_v15  ;;  %v477_v17 = vmul.f32 %v4068_v24, %v3801_v16 }
 0x12a   :  { %v4089_v32 = vpop.f32.mrf.mxu0  ;;  %v4140_v39 = vadd.f32 %v1002_v35, %v3891_v45  ;;  %v4143_v41 = vadd.f32 %v827_v2, %v3884_v43  ;;  %v4146_v42 = vadd.f32 %v475_v57, %v3895_v46  ;;  %v4152_v26 = vadd.f32 %v650_v34, %v3909_v50  ;;  %v4171_v50 = vpop.permute.xlu0 %1087 }
 0x12b   :  { %5700 = vst [vmem:[#allocation47_spill] sm:$0xff] %v4089_v32  ;;  %v1004_v38 = vmul.f32 %v3779_v6, %v4089_v32  ;;  %v4149_v11 = vadd.f32 %v1005_v33, %v3924_v54  ;;  %v4155_v20 = vadd.f32 %v826_v36, %v3913_v51  ;;  %v4158_v25 = vadd.f32 %v474_v40, %v3917_v52  ;;  %v4173_v51 = vpop.permute.xlu1 %735 }
 0x12c   :  { %v4112_v5 = vpop.f32.mrf.mxu0  ;;  %v4163_v2 = vadd.f32 %v653_v47, %v3944_v59  ;;  %v652_v43 = vmul.f32 %v3787_v9, %v4089_v32  ;;  %v828_v45 = vmul.f32 %v3799_v15, %v4089_v32  ;;  %v476_v46 = vmul.f32 %v3801_v16, %v4089_v32 }
 0x12d   :  { %5703 = vst [vmem:[#allocation50_spill] sm:$0xff] %v4112_v5  ;;  %v1007_v52 = vmul.f32 %v4112_v5, %v3779_v6  ;;  %v655_v47 = vmul.f32 %v4112_v5, %v3787_v9  ;;  %v4180_v54 = vadd.f32 %v829_v44, %v3948_v60  ;;  %v4183_v57 = vadd.f32 %v477_v17, %v3952_v61 }
 0x12e   :  { %v4135_v37 = vpop.f32.mrf.mxu0  ;;  %v4190_v33 = vadd.f32 %v1004_v38, %v3960_v63  ;;  %v831_v34 = vmul.f32 %v4112_v5, %v3799_v15  ;;  %v479_v36 = vmul.f32 %v4112_v5, %v3801_v16  ;;  %v4207_v63 = vadd.f32 %v652_v43, %v3964_v0 }
 0x12f   :  { %5704 = vst [vmem:[#allocation51_spill] sm:$0xff] %v4135_v37  ;;  %v1006_v56 = vmul.f32 %v3779_v6, %v4135_v37  ;;  %v654_v44 = vmul.f32 %v3787_v9, %v4135_v37  ;;  %v830_v60 = vmul.f32 %v3799_v15, %v4135_v37  ;;  %v478_v6 = vmul.f32 %v3801_v16, %v4135_v37 }
 0x130   :  { %v4160_v35 = vpop.f32.mrf.mxu0  ;;  %v4212_v38 = vadd.f32 %v828_v45, %v3968_v1  ;;  %v4215_v9 = vadd.f32 %v476_v46, %v3982_v4  ;;  %v4218_v32 = vadd.f32 %v1007_v52, %v3978_v12  ;;  %v4221_v15 = vadd.f32 %v655_v47, %v3994_v21  ;;  %v4240_v45 = vpop.permute.xlu0 %1082 }
 0x131   :  { %5705 = vst [vmem:[#allocation52_spill] sm:$0xff] %v4160_v35  ;;  %v1019_v17 = vmul.f32 %v4160_v35, %v3785_v8  ;;  %v667_v40 = vmul.f32 %v4160_v35, %v3797_v14  ;;  %v843_v16 = vmul.f32 %v4160_v35, %v3807_v18  ;;  %v491_v0 = vmul.f32 %v4160_v35, %v3809_v19  ;;  %v4242_v46 = vpop.permute.xlu1 %730 }
 0x132   :  { %v4185_v59 = vpop.f32.mrf.mxu0  ;;  %v4230_v1 = vadd.f32 %v1006_v56, %v4028_v30  ;;  %v4235_v12 = vadd.f32 %v831_v34, %v4000_v55  ;;  %v4238_v21 = vadd.f32 %v479_v36, %v4004_v48  ;;  %v4245_v52 = vadd.f32 %v654_v44, %v4042_v27 }
 0x133   :  { %5706 = vst [vmem:[#allocation53_spill] sm:$0xff] %v4185_v59  ;;  %v1018_v4 = vmul.f32 %v3785_v8, %v4185_v59  ;;  %v4248_v47 = vadd.f32 %v1019_v17, %v4055_v3  ;;  %v4251_v30 = vadd.f32 %v830_v60, %v4048_v28  ;;  %v4254_v56 = vadd.f32 %v478_v6, %v4052_v58 }
 0x134   :  { %v4204_v61 = vpop.f32.mrf.mxu0  ;;  %v4259_v48 = vadd.f32 %v667_v40, %v4071_v10  ;;  %v666_v34 = vmul.f32 %v3797_v14, %v4185_v59  ;;  %v842_v27 = vmul.f32 %v3807_v18, %v4185_v59  ;;  %v490_v3 = vmul.f32 %v3809_v19, %v4185_v59  ;;  %v4309_v24 = vpop.permute.xlu0 %1077 }
 0x135   :  { %5707 = vst [vmem:[#allocation54_spill] sm:$0xff] %v4204_v61  ;;  %v1021_v28 = vmul.f32 %v4204_v61, %v3785_v8  ;;  %v669_v58 = vmul.f32 %v4204_v61, %v3797_v14  ;;  %v4272_v36 = vadd.f32 %v843_v16, %v4084_v49  ;;  %v4275_v10 = vadd.f32 %v491_v0, %v4087_v31  ;;  %v4311_v37 = vpop.permute.xlu1 %725 }
 0x136   :  { %v4227_v43 = vpop.f32.mrf.mxu0  ;;  %v4282_v60 = vadd.f32 %v1018_v4, %v4094_v7  ;;  %v845_v6 = vmul.f32 %v4204_v61, %v3807_v18  ;;  %v493_v40 = vmul.f32 %v4204_v61, %v3809_v19  ;;  %v4301_v59 = vadd.f32 %v666_v34, %v4117_v53 }
 0x137   :  { %5708 = vst [vmem:[#allocation55_spill] sm:$0xff] %v4227_v43  ;;  %v1020_v17 = vmul.f32 %v3785_v8, %v4227_v43  ;;  %v668_v31 = vmul.f32 %v3797_v14, %v4227_v43  ;;  %v844_v16 = vmul.f32 %v3807_v18, %v4227_v43  ;;  %v492_v0 = vmul.f32 %v3809_v19, %v4227_v43 }
 0x138   :  { %v4256_v55 = vpop.f32.mrf.mxu0  ;;  %v4304_v35 = vadd.f32 %v842_v27, %v4120_v29  ;;  %v4307_v61 = vadd.f32 %v490_v3, %v4123_v62  ;;  %v4314_v43 = vadd.f32 %v1021_v28, %v4126_v23  ;;  %v4317_v5 = vadd.f32 %v669_v58, %v4129_v22 }
 0x139   :  { %5709 = vst [vmem:[#allocation56_spill] sm:$0xff] %v4256_v55  ;;  %v1023_v49 = vmul.f32 %v4256_v55, %v3785_v8  ;;  %v671_v4 = vmul.f32 %v4256_v55, %v3797_v14  ;;  %v847_v53 = vmul.f32 %v4256_v55, %v3807_v18  ;;  %v495_v29 = vmul.f32 %v4256_v55, %v3809_v19 }
 0x13a   :  { %v4277_v44 = vpop.f32.mrf.mxu0  ;;  %5712 = vst [vmem:[#allocation59_spill] sm:$0xff] %v4304_v35  ;;  %5713 = vst [vmem:[#allocation60_spill] sm:$0xff] %v4307_v61  ;;  %v4328_v27 = vadd.f32 %v1020_v17, %v4140_v39  ;;  %v4331_v23 = vadd.f32 %v845_v6, %v4143_v41  ;;  %v4334_v22 = vadd.f32 %v493_v40, %v4146_v42 }
 0x13b   :  { %5710 = vst [vmem:[#allocation57_spill] sm:$0xff] %v4277_v44  ;;  %v1022_v62 = vmul.f32 %v3785_v8, %v4277_v44  ;;  %v1031_v3 = vadd.f32 %v1023_v49, %v4149_v11  ;;  %v4338_v28 = vadd.f32 %v668_v31, %v4152_v26  ;;  %v4341_v58 = vadd.f32 %v844_v16, %v4155_v20  ;;  %v5720_v49 = vld [vmem:[#allocation10_spill] sm:$0xff] }
 0x13c   :  { %v4296_v7 = vpop.f32.mrf.mxu0  ;;  %5715 = vst [vmem:[#allocation62_spill] sm:$0xff] %v4334_v22  ;;  %v4344_v55 = vadd.f32 %v492_v0, %v4158_v25  ;;  %v679_v39 = vadd.f32 %v671_v4, %v4163_v2  ;;  %v670_v41 = vmul.f32 %v3797_v14, %v4277_v44  ;;  %v846_v42 = vmul.f32 %v3807_v18, %v4277_v44  ;;  %v4374_v0 = vpop.permute.xlu0 %1072 }
 0x13d   :  { %5711 = vst [vmem:[#allocation58_spill] sm:$0xff] %v4296_v7  ;;  %5716 = vst [vmem:[#allocation63_spill] sm:$0xff] %v4341_v58  ;;  %v494_v11 = vmul.f32 %v3809_v19, %v4277_v44  ;;  %v1025_v26 = vmul.f32 %v4296_v7, %v3785_v8  ;;  %v673_v20 = vmul.f32 %v4296_v7, %v3797_v14  ;;  %v5722_v58 = vld [vmem:[#allocation13_spill] sm:$0xff] }
 0x13e   :  { %v4323_v34 = vpop.f32.mrf.mxu0  ;;  %5717 = vst [vmem:[#allocation64_spill] sm:$0xff] %v4344_v55  ;;  %v4360_v25 = vadd.f32 %v847_v53, %v4180_v54  ;;  %v4363_v2 = vadd.f32 %v495_v29, %v4183_v57  ;;  %v1030_v6 = vadd.f32 %v1022_v62, %v4190_v33  ;;  %v849_v16 = vmul.f32 %v4296_v7, %v3807_v18  ;;  %v4376_v54 = vpop.permute.xlu1 %720  ;;  %v5721_v55 = vld [vmem:[#allocation12_spill] sm:$0xff] }
 0x13f   :  { %5714 = vst [vmem:[#allocation61_spill] sm:$0xff] %v4323_v34  ;;  %v1024_v57 = vmul.f32 %v3785_v8, %v4323_v34  ;;  %v672_v4 = vmul.f32 %v3797_v14, %v4323_v34  ;;  %v497_v33 = vmul.f32 %v4296_v7, %v3809_v19  ;;  %v848_v53 = vmul.f32 %v3807_v18, %v4323_v34 }
 0x140   :  { %v4346_v61 = vpop.f32.mrf.mxu0  ;;  %v678_v62 = vadd.f32 %v670_v41, %v4207_v63  ;;  %v496_v44 = vmul.f32 %v3809_v19, %v4323_v34  ;;  %v4392_v35 = vadd.f32 %v846_v42, %v4212_v38  ;;  %v4395_v8 = vadd.f32 %v494_v11, %v4215_v9 }
 0x141   :  { %5718 = vst [vmem:[#allocation65_spill] sm:$0xff] %v4346_v61  ;;  %v1037_v40 = vmul.f32 %v4346_v61, %v3795_v13  ;;  %v685_v31 = vmul.f32 %v4346_v61, %v5720_v49  ;;  %v1033_v14 = vadd.f32 %v1025_v26, %v4218_v32  ;;  %v681_v7 = vadd.f32 %v673_v20, %v4221_v15 }
 0x142   :  { %v4365_v17 = vpop.f32.mrf.mxu0  ;;  %v861_v18 = vmul.f32 %v4346_v61, %v5721_v55  ;;  %v509_v22 = vmul.f32 %v4346_v61, %v5722_v58  ;;  %v4410_v41 = vadd.f32 %v849_v16, %v4235_v12  ;;  %v1032_v32 = vadd.f32 %v1024_v57, %v4230_v1 }
 0x143   :  { %5719 = vst [vmem:[#allocation66_spill] sm:$0xff] %v4365_v17  ;;  %v1045_v38 = vadd.f32 %v1037_v40, %v4248_v47  ;;  %v693_v9 = vadd.f32 %v685_v31, %v4259_v48  ;;  %v680_v15 = vadd.f32 %v672_v4, %v4245_v52  ;;  %v4415_v42 = vadd.f32 %v497_v33, %v4238_v21  ;;  %v1068_v52 = vpop.permute.xlu0 %1067  ;;  %v716_v21 = vpop.permute.xlu1 %715 }
 0x144   :  { %v4386_v29 = vpop.f32.mrf.mxu0  ;;  %v4418_v11 = vadd.f32 %v848_v53, %v4251_v30  ;;  %v1036_v48 = vmul.f32 %v3795_v13, %v4365_v17  ;;  %v684_v12 = vmul.f32 %v5720_v49, %v4365_v17  ;;  %v4429_v1 = vadd.f32 %v496_v44, %v4254_v56 }
 0x145   :  { %v1039_v19 = vmul.f32 %v4386_v29, %v3795_v13  ;;  %v687_v47 = vmul.f32 %v4386_v29, %v5720_v49  ;;  %v4436_v40 = vadd.f32 %v861_v18, %v4272_v36  ;;  %v4439_v31 = vadd.f32 %v509_v22, %v4275_v10 }
 0x146   :  { %v4403_v63 = vpop.f32.mrf.mxu0  ;;  %v4444_v56 = vadd.f32 %v1068_v52, %v1045_v38  ;;  %v4446_v44 = vadd.f32 %v716_v21, %v693_v9  ;;  %v4450_v4 = vmul.f32 %v5721_v55, %v4365_v17  ;;  %v692_v38 = vadd.f32 %v684_v12, %v4301_v59 }
 0x147   :  { %v1047_v57 = vadd.f32 %v1039_v19, %v4314_v43  ;;  %v695_v43 = vadd.f32 %v687_v47, %v4317_v5  ;;  %v1038_v18 = vmul.f32 %v3795_v13, %v4403_v63  ;;  %v1044_v19 = vadd.f32 %v1036_v48, %v4282_v60  ;;  %v1063_v48 = vpop.permute.xlu0 %1062  ;;  %v711_v12 = vpop.permute.xlu1 %710 }
 0x148   :  { %v4420_v26 = vpop.f32.mrf.mxu0  ;;  %v686_v59 = vmul.f32 %v5720_v49, %v4403_v63  ;;  %vm1109_vm12 = vcmp.gt.f32.partialorder %v4444_v56, 0.0  ;;  %vm757_vm13 = vcmp.gt.f32.partialorder %v4446_v44, 0.0 }
 0x149   :  { %v1041_v30 = vmul.f32 %v4420_v26, %v3795_v13  ;;  %v689_v20 = vmul.f32 %v4420_v26, %v5720_v49  ;;  %v4476_v60 = vadd.f32 %v4309_v24, %v1047_v57  ;;  %v1117_v24 = vmin.f32 %v4444_v56, 0.0  ;;  %v5723_v57 = vld [vmem:[#allocation39_spill] sm:$0xff] }
 0x14a   :  { %v4441_v16 = vpop.f32.mrf.mxu0 }
 0x14b   :  { %v1049_v33 = vadd.f32 %v1041_v30, %v1031_v3  ;;  %v697_v53 = vadd.f32 %v689_v20, %v679_v39  ;;  %v1040_v36 = vmul.f32 %v3795_v13, %v4441_v16  ;;  %v688_v10 = vmul.f32 %v5720_v49, %v4441_v16 }
 0x14c   :  { %v4456_v22 = vpop.f32.mrf.mxu0  ;;  %vm1111_vm9 = vcmp.gt.f32.partialorder %v4476_v60, 0.0 }
 0x14d   :  { %v1043_v3 = vmul.f32 %v4456_v22, %v3795_v13  ;;  %v691_v39 = vmul.f32 %v4456_v22, %v5720_v49  ;;  %v4468_v9 = vadd.f32 %v4171_v50, %v1049_v33  ;;  %v4471_v52 = vadd.f32 %v4173_v51, %v697_v53 }
 0x14e   :  { %v4473_v5 = vpop.f32.mrf.mxu0  ;;  %v1048_v47 = vadd.f32 %v1040_v36, %v1030_v6  ;;  %v696_v21 = vadd.f32 %v688_v10, %v678_v62  ;;  %v765_v62 = vmin.f32 %v4446_v44, 0.0  ;;  %v5724_v36 = vld [vmem:[#allocation48_spill] sm:$0xff] }
 0x14f   :  { %v1051_v30 = vadd.f32 %v1043_v3, %v1033_v14  ;;  %v699_v20 = vadd.f32 %v691_v39, %v681_v7  ;;  %v1042_v50 = vmul.f32 %v3795_v13, %v4473_v5  ;;  %v690_v51 = vmul.f32 %v5720_v49, %v4473_v5 }
 0x150   :  { %v1121_v33 = vmin.f32 %v4468_v9, 0.0  ;;  %v769_v6 = vmin.f32 %v4471_v52, 0.0  ;;  %v4495_v49 = vadd.f32 %v4240_v45, %v1048_v47  ;;  %v4498_v39 = vadd.f32 %v4311_v37, %v695_v43  ;;  %v922_v43 = vpop.permute.xlu0 %921  ;;  %v570_v47 = vpop.permute.xlu1 %569 }
 0x151   :  { %v4489_v53 = vadd.f32 %v5723_v57, %v1051_v30  ;;  %v4492_v14 = vadd.f32 %v5724_v36, %v699_v20  ;;  %v1050_v7 = vadd.f32 %v1042_v50, %v1032_v32  ;;  %v698_v10 = vadd.f32 %v690_v51, %v680_v15  ;;  %v5725_v57 = vld [vmem:[#allocation40_spill] sm:$0xff]  ;;  %v5726_v15 = vld [vmem:[#allocation49_spill] sm:$0xff] }
 0x152   :  { %v1134_v13 = vmul.f32 1.442695, %v1121_v33  ;;  %v782_v3 = vmul.f32 1.442695, %v769_v6  ;;  %v4503_v30 = vadd.f32 %v4242_v46, %v696_v21  ;;  %v1119_v20 = vmin.f32 %v4476_v60, 0.0 }
 0x153   :  { %v1123_v61 = vmin.f32 %v4489_v53, 0.0  ;;  %v771_v34 = vmin.f32 %v4492_v14, 0.0  ;;  %v4507_v32 = vadd.f32 %v5725_v57, %v1050_v7  ;;  %v4510_v50 = vadd.f32 %v5726_v15, %v698_v10 }
 0x154   :  { %v1046_v45 = vadd.f32 %v1038_v18, %v4328_v27  ;;  %v694_v37 = vadd.f32 %v686_v59, %v4338_v28  ;;  %3086 = vpow2.f32 %v1134_v13  ;;  %v1120_v46 = vmin.f32 %v4495_v49, 0.0 }
 0x155   :  { %v1138_v51 = vmul.f32 1.442695, %v1123_v61  ;;  %v786_v33 = vmul.f32 1.442695, %v771_v34  ;;  %v1122_v21 = vmin.f32 %v4507_v32, 0.0  ;;  %v770_v6 = vmin.f32 %v4510_v50, 0.0 }
 0x156   :  { %3088 = vpow2.f32 %v782_v3  ;;  %v767_v36 = vmin.f32 %v4498_v39, 0.0  ;;  %v1132_v7 = vmul.f32 1.442695, %v1120_v46  ;;  %v768_v27 = vmin.f32 %v4503_v30, 0.0 }
 0x157   :  { %3090 = vpow2.f32 %v1138_v51  ;;  %v1130_v18 = vmul.f32 1.442695, %v1119_v20  ;;  %v1136_v28 = vmul.f32 1.442695, %v1122_v21  ;;  %v784_v59 = vmul.f32 1.442695, %v770_v6  ;;  %v917_v20 = vpop.permute.xlu0 %916  ;;  %v565_v51 = vpop.permute.xlu1 %564 }
 0x158   :  { %3092 = vpow2.f32 %v786_v33  ;;  %v4520_v61 = vadd.f32 %v4374_v0, %v1046_v45  ;;  %v780_v34 = vmul.f32 1.442695, %v768_v27  ;;  %v4523_v10 = vadd.f32 %v4376_v54, %v694_v37 }
 0x159   :  { %3094 = vpow2.f32 %v1132_v7  ;;  %v4525_v13 = vadd.f32 %v1063_v48, %v1044_v19  ;;  %v778_v3 = vmul.f32 1.442695, %v767_v36  ;;  %v4528_v15 = vadd.f32 %v711_v12, %v692_v38 }
 0x15a   :  { %3096 = vpow2.f32 %v1136_v28  ;;  %v1118_v57 = vmin.f32 %v4520_v61, 0.0  ;;  %v766_v33 = vmin.f32 %v4523_v10, 0.0  ;;  %v4533_v0 = vmul.f32 %v4386_v29, %v5721_v55 }
 0x15b   :  { %3098 = vpow2.f32 %v784_v59  ;;  %v4537_v54 = vmul.f32 %v5722_v58, %v4365_v17  ;;  %v1126_v48 = vmul.f32 1.442695, %v1117_v24  ;;  %v1116_v45 = vmin.f32 %v4525_v13, 0.0  ;;  %v4552_v59 = vpop.permute.xlu1 %559 }
 0x15c   :  { %3100 = vpow2.f32 %v780_v34  ;;  %v1128_v19 = vmul.f32 1.442695, %v1118_v57  ;;  %v776_v38 = vmul.f32 1.442695, %v766_v33  ;;  %v764_v12 = vmin.f32 %v4528_v15, 0.0 }
 0x15d   :  { %3102 = vpow2.f32 %v1130_v18  ;;  %v867_v37 = vmul.f32 %v4456_v22, %v5721_v55  ;;  %v774_v46 = vmul.f32 1.442695, %v765_v62  ;;  %v515_v21 = vmul.f32 %v4456_v22, %v5722_v58  ;;  %v912_v62 = vpop.permute.xlu0 %911 }
 0x15e   :  { %3104 = vpow2.f32 %v778_v3  ;;  %v866_v6 = vmul.f32 %v5721_v55, %v4473_v5  ;;  %v1124_v36 = vmul.f32 1.442695, %v1116_v45  ;;  %v514_v7 = vmul.f32 %v5722_v58, %v4473_v5 }
 0x15f   :  { %3106 = vpow2.f32 %v1128_v19  ;;  %v875_v24 = vadd.f32 %v867_v37, %v4410_v41  ;;  %v772_v27 = vmul.f32 1.442695, %v764_v12  ;;  %v523_v18 = vadd.f32 %v515_v21, %v4415_v42 }
 0x160   :  { %3108 = vpow2.f32 %v776_v38  ;;  %v874_v28 = vadd.f32 %v866_v6, %v4418_v11  ;;  %vm1115_vm1 = vcmp.gt.f32.partialorder %v4489_v53, 0.0  ;;  %v4559_v41 = vmul.f32 %v4386_v29, %v5722_v58 }
 0x161   :  { %3110 = vpow2.f32 %v1126_v48  ;;  %v4555_v34 = vadd.f32 %v922_v43, %v875_v24  ;;  %v3087_v3 = vpop.eup %3086  ;;  %v4561_v57 = vadd.f32 %v570_v47, %v523_v18  ;;  %v522_v42 = vadd.f32 %v514_v7, %v4429_v1  ;;  %v4583_v7 = vpop.permute.xlu0 %906 }
 0x162   :  { %3112 = vpow2.f32 %v774_v46  ;;  %v4563_v33 = vadd.f32 %v917_v20, %v874_v28  ;;  %vm763_vm2 = vcmp.gt.f32.partialorder %v4492_v14, 0.0  ;;  %vm1113_vm3 = vcmp.gt.f32.partialorder %v4468_v9, 0.0 }
 0x163   :  { %v3089_v11 = vpop.eup %3088  ;;  %vm761_vm4 = vcmp.gt.f32.partialorder %v4471_v52, 0.0  ;;  %3114 = vpow2.f32 %v1124_v36  ;;  %v947_v43 = vmin.f32 %v4555_v34, 0.0  ;;  %v865_v19 = vmul.f32 %v4420_v26, %v5721_v55 }
 0x164   :  { %v3091_v48 = vpop.eup %3090  ;;  %vm1114_vm5 = vcmp.gt.f32.partialorder %v4507_v32, 0.0  ;;  %vm762_vm6 = vcmp.gt.f32.partialorder %v4510_v50, 0.0  ;;  %3116 = vpow2.f32 %v772_v27  ;;  %v595_v1 = vmin.f32 %v4561_v57, 0.0  ;;  %v4585_v27 = vpop.permute.xlu1 %554 }
 0x165   :  { %v3093_v47 = vpop.eup %3092  ;;  %v2675_v20 = vadd.f32 -1.0, %v3091_v48  ;;  %v2673_v45 = vadd.f32 -1.0, %v3087_v3  ;;  %vm1112_vm7 = vcmp.gt.f32.partialorder %v4495_v49, 0.0  ;;  %v962_v38 = vmul.f32 1.442695, %v947_v43 }
 0x166   :  { %v513_v12 = vmul.f32 %v4420_v26, %v5722_v58  ;;  %v3095_v37 = vpop.eup %3094  ;;  %v2651_v46 = vadd.f32 -1.0, %v3093_v47  ;;  %vm760_vm8 = vcmp.gt.f32.partialorder %v4503_v30, 0.0  ;;  %v610_v21 = vmul.f32 1.442695, %v595_v1 }
 0x167   :  { %v946_v6 = vmin.f32 %v4563_v33, 0.0  ;;  %v4581_v36 = vadd.f32 %v565_v51, %v522_v42  ;;  %v3097_v24 = vpop.eup %3096  ;;  %v1155_v18 = vsel %vm1115_vm1, %v4489_v53, %v2675_v20  ;;  %v2649_v28 = vadd.f32 -1.0, %v3089_v11 }
 0x168   :  { %3118 = vpow2.f32 %v962_v38  ;;  %v873_v3 = vadd.f32 %v865_v19, %v4360_v25  ;;  %v3099_v43 = vpop.eup %3098  ;;  %2788 = vmatprep.subr.mxu1 %v1155_v18  ;;  %v803_v51 = vsel %vm763_vm2, %v4492_v14, %v2651_v46  ;;  %v2674_v42 = vadd.f32 -1.0, %v3097_v24  ;;  %v902_v18 = vpop.permute.xlu0 %901 }
 0x169   :  { %vm759_vm10 = vcmp.gt.f32.partialorder %v4498_v39, 0.0  ;;  %3120 = vpow2.f32 %v610_v21  ;;  %v960_v48 = vmul.f32 1.442695, %v946_v6  ;;  %v3101_v1 = vpop.eup %3100  ;;  %2789 = vmatpush3.msra.mxu1 %v803_v51  ;;  %v2650_v47 = vadd.f32 -1.0, %v3099_v43 }
 0x16a   :  { %v2672_v17 = vadd.f32 -1.0, %v3095_v37  ;;  %vm1110_vm11 = vcmp.gt.f32.partialorder %v4520_v61, 0.0  ;;  %v594_v53 = vmin.f32 %v4581_v36, 0.0  ;;  %v3103_v25 = vpop.eup %3102  ;;  %v1154_v11 = vsel %vm1114_vm5, %v4507_v32, %v2674_v42 }
 0x16b   :  { %v2648_v19 = vadd.f32 -1.0, %v3101_v1  ;;  %3122 = vpow2.f32 %v960_v48  ;;  %v4600_v14 = vadd.f32 %v912_v62, %v873_v3  ;;  %v3105_v20 = vpop.eup %3104  ;;  %2790 = vmatprep.subr.mxu1 %v1154_v11  ;;  %v802_v38 = vsel %vm762_vm6, %v4510_v50, %v2650_v47  ;;  %v550_v3 = vpop.permute.xlu1 %549 }
 0x16c   :  { %v2671_v37 = vadd.f32 -1.0, %v3103_v25  ;;  %v608_v46 = vmul.f32 1.442695, %v594_v53  ;;  %v521_v21 = vadd.f32 %v513_v12, %v4363_v2  ;;  %v3107_v6 = vpop.eup %3106  ;;  %2791 = vmatpush3.msra.mxu1 %v802_v38  ;;  %v1153_v32 = vsel %vm1113_vm3, %v4468_v9, %v2673_v45 }
 0x16d   :  { %v801_v62 = vsel %vm761_vm4, %v4471_v52, %v2649_v28  ;;  %vm758_vm14 = vcmp.gt.f32.partialorder %v4523_v10, 0.0  ;;  %v945_v50 = vmin.f32 %v4600_v14, 0.0  ;;  %v3109_v24 = vpop.eup %3108  ;;  %2792 = vmatprep.subr.mxu1 %v1153_v32  ;;  %v2647_v43 = vadd.f32 -1.0, %v3105_v20 }
 0x16e   :  { %v2670_v2 = vadd.f32 -1.0, %v3107_v6  ;;  %vm1108_vm15 = vcmp.gt.f32.partialorder %v4525_v13, 0.0  ;;  %3124 = vpow2.f32 %v608_v46  ;;  %v4618_v12 = vadd.f32 %v4552_v59, %v521_v21  ;;  %v3111_v9 = vpop.eup %3110  ;;  %2793 = vmatpush3.msra.mxu1 %v801_v62  ;;  %v5727_v6 = vld [vmem:[#allocation62_spill] sm:$0xff] }
 0x16f   :  { %v1152_v52 = vsel %vm1112_vm7, %v4495_v49, %v2672_v17  ;;  %v2646_v45 = vadd.f32 -1.0, %v3109_v24  ;;  %vm756_vm0 = vcmp.gt.f32.partialorder %v4528_v15, 0.0  ;;  %vm939_vm1 = vcmp.gt.f32.partialorder %v4555_v34, 0.0  ;;  %v3113_v42 = vpop.eup %3112  ;;  %v4652_v46 = vpop.permute.xlu1 %544 }
 0x170   :  { %v958_v28 = vmul.f32 1.442695, %v945_v50  ;;  %v864_v51 = vmul.f32 %v5721_v55, %v4441_v16  ;;  %2794 = vmatprep.subr.mxu1 %v1152_v52  ;;  %v800_v59 = vsel %vm760_vm8, %v4503_v30, %v2648_v19  ;;  %v1151_v48 = vsel %vm1111_vm9, %v4476_v60, %v2671_v37  ;;  %v3115_v49 = vpop.eup %3114  ;;  %v897_v37 = vpop.permute.xlu0 %896 }
 0x171   :  { %vm587_vm2 = vcmp.gt.f32.partialorder %v4561_v57, 0.0  ;;  %v593_v17 = vmin.f32 %v4618_v12, 0.0  ;;  %2795 = vmatpush3.msra.mxu1 %v800_v59  ;;  %v2669_v1 = vadd.f32 -1.0, %v3111_v9  ;;  %v2645_v47 = vadd.f32 -1.0, %v3113_v42  ;;  %v3117_v25 = vpop.eup %3116  ;;  %v5728_v59 = vld [vmem:[#allocation63_spill] sm:$0xff] }
 0x172   :  { %3126 = vpow2.f32 %v958_v28  ;;  %v872_v53 = vadd.f32 %v864_v51, %v4392_v35  ;;  %2796 = vmatprep.subr.mxu1 %v1151_v48  ;;  %v799_v30 = vsel %vm759_vm10, %v4498_v39, %v2647_v43  ;;  %v1150_v60 = vsel %vm1110_vm11, %v4520_v61, %v2670_v2 }
 0x173   :  { %v606_v11 = vmul.f32 1.442695, %v593_v17  ;;  %v512_v19 = vmul.f32 %v5722_v58, %v4441_v16  ;;  %2797 = vmatpush3.msra.mxu1 %v799_v30  ;;  %v798_v20 = vsel %vm758_vm14, %v4523_v10, %v2646_v45  ;;  %v2668_v35 = vadd.f32 -1.0, %v3115_v49  ;;  %v540_v51 = vpop.permute.xlu1 %539 }
 0x174   :  { %v4648_v38 = vadd.f32 %v4583_v7, %v872_v53  ;;  %v871_v39 = vadd.f32 %v4533_v0, %v4331_v23  ;;  %2798 = vmatprep.subr.mxu1 %v1150_v60  ;;  %v2644_v61 = vadd.f32 -1.0, %v3117_v25  ;;  %v519_v32 = vadd.f32 %v4559_v41, %v5727_v6  ;;  %v892_v28 = vpop.permute.xlu0 %891  ;;  %v5732_v6 = vld [vmem:[#allocation14_spill] sm:$0xff] }
 0x175   :  { %3128 = vpow2.f32 %v606_v11  ;;  %v520_v21 = vadd.f32 %v512_v19, %v4395_v8  ;;  %v3119_v62 = vpop.eup %3118  ;;  %2799 = vmatpush3.msra.mxu1 %v798_v20  ;;  %v1149_v10 = vsel %vm1109_vm12, %v4444_v56, %v2669_v1  ;;  %v797_v23 = vsel %vm757_vm13, %v4446_v44, %v2645_v47 }
 0x176   :  { %v944_v0 = vmin.f32 %v4648_v38, 0.0  ;;  %v4664_v7 = vadd.f32 %v902_v18, %v871_v39  ;;  %v3121_v50 = vpop.eup %3120  ;;  %2800 = vmatprep.subr.mxu1 %v1149_v10  ;;  %v2663_v8 = vadd.f32 -1.0, %v3119_v62  ;;  %v4669_v41 = vadd.f32 %v550_v3, %v519_v32  ;;  %v5733_v32 = vld [vmem:[#allocation50_spill] sm:$0xff] }
 0x177   :  { %v4667_v24 = vadd.f32 %v4585_v27, %v520_v21  ;;  %v862_v43 = vmul.f32 %v5721_v55, %v4403_v63  ;;  %2801 = vmatpush3.msra.mxu1 %v797_v23  ;;  %v1148_v56 = vsel %vm1108_vm15, %v4525_v13, %v2668_v35  ;;  %v2639_v44 = vadd.f32 -1.0, %v3121_v50  ;;  %v5731_v21 = vld [vmem:[#allocation60_spill] sm:$0xff]  ;;  %v535_v50 = vpop.permute.xlu1 %534 }
 0x178   :  { %v956_v2 = vmul.f32 1.442695, %v944_v0  ;;  %v943_v18 = vmin.f32 %v4664_v7, 0.0  ;;  %v3123_v9 = vpop.eup %3122  ;;  %2802 = vmatprep.subr.mxu1 %v1148_v56  ;;  %v796_v27 = vsel %vm756_vm0, %v4528_v15, %v2644_v61  ;;  %v979_v3 = vsel %vm939_vm1, %v4555_v34, %v2663_v8  ;;  %v887_v23 = vpop.permute.xlu0 %886 }
 0x179   :  { %vm938_vm3 = vcmp.gt.f32.partialorder %v4563_v33, 0.0  ;;  %v592_v55 = vmin.f32 %v4667_v24, 0.0  ;;  %2803 = vmatpush3.msra.mxu1 %v796_v27  ;;  %v627_v13 = vsel %vm587_vm2, %v4561_v57, %v2639_v44  ;;  %v2662_v52 = vadd.f32 -1.0, %v3123_v9  ;;  %v5734_v44 = vld [vmem:[#allocation36_spill] sm:$0xff]  ;;  %v5736_v9 = vld [vmem:[#allocation58_spill] sm:$0xff] }
 0x17a   :  { %3130 = vpow2.f32 %v956_v2  ;;  %v954_v45 = vmul.f32 1.442695, %v943_v18  ;;  %2804 = vmatprep.subr.mxu1 %v979_v3  ;;  %v591_v42 = vmin.f32 %v4669_v41, 0.0  ;;  %v870_v34 = vadd.f32 %v862_v43, %v5728_v59  ;;  %v5735_v18 = vld [vmem:[#allocation15_spill] sm:$0xff] }
 0x17b   :  { %v604_v15 = vmul.f32 1.442695, %v592_v55  ;;  %v510_v48 = vmul.f32 %v5722_v58, %v4403_v63  ;;  %v3125_v17 = vpop.eup %3124  ;;  %2805 = vmatpush3.msra.mxu1 %v627_v13  ;;  %v978_v57 = vsel %vm938_vm3, %v4563_v33, %v2662_v52  ;;  %v4696_v49 = vadd.f32 %v892_v28, %v4436_v40  ;;  %v5729_v58 = vld [vmem:[#allocation64_spill] sm:$0xff]  ;;  %v5737_v28 = vld [vmem:[#allocation21_spill] sm:$0xff] }
 0x17c   :  { %3132 = vpow2.f32 %v954_v45  ;;  %v4699_v1 = vadd.f32 %v540_v51, %v4439_v31  ;;  %2806 = vmatprep.subr.mxu1 %v978_v57  ;;  %v2638_v47 = vadd.f32 -1.0, %v3125_v17  ;;  %v602_v53 = vmul.f32 1.442695, %v591_v42  ;;  %v5739_v42 = vld [vmem:[#allocation17_spill] sm:$0xff] }
 0x17d   :  { %3134 = vpow2.f32 %v604_v15  ;;  %v4701_v25 = vadd.f32 %v897_v37, %v870_v34  ;;  %vm586_vm4 = vcmp.gt.f32.partialorder %v4581_v36, 0.0  ;;  %vm937_vm5 = vcmp.gt.f32.partialorder %v4600_v14, 0.0  ;;  %v5730_v37 = vld [vmem:[#allocation59_spill] sm:$0xff]  ;;  %v5738_v15 = vld [vmem:[#allocation16_spill] sm:$0xff]  ;;  %v5740_v17 = vld [vmem:[#allocation25_spill] sm:$0xff] }
 0x17e   :  { %v518_v30 = vadd.f32 %v510_v48, %v5729_v58  ;;  %v941_v33 = vmin.f32 %v4696_v49, 0.0  ;;  %v626_v40 = vsel %vm586_vm4, %v4581_v36, %v2638_v47  ;;  %vm585_vm6 = vcmp.gt.f32.partialorder %v4618_v12, 0.0  ;;  %v5741_v47 = vld [vmem:[#allocation51_spill] sm:$0xff] }
 0x17f   :  { %v3127_v60 = vpop.eup %3126  ;;  %3136 = vpow2.f32 %v602_v53  ;;  %v942_v31 = vmin.f32 %v4701_v25, 0.0  ;;  %2807 = vmatpush3.msra.mxu1 %v626_v40  ;;  %v589_v35 = vmin.f32 %v4699_v1, 0.0  ;;  %v868_v61 = vadd.f32 %v4450_v4, %v5730_v37  ;;  %v5744_v37 = vld [vmem:[#allocation43_spill] sm:$0xff] }
 0x180   :  { %v2661_v11 = vadd.f32 -1.0, %v3127_v60  ;;  %v4711_v19 = vadd.f32 %v4652_v46, %v518_v30  ;;  %v950_v20 = vmul.f32 1.442695, %v941_v33  ;;  %v516_v36 = vadd.f32 %v4537_v54, %v5731_v21  ;;  %v1802_v30 = vpop.permute.xlu0 %1801  ;;  %v5742_v60 = vld [vmem:[#allocation37_spill] sm:$0xff] }
 0x181   :  { %v952_v39 = vmul.f32 1.442695, %v942_v31  ;;  %v1711_v62 = vmul.f32 %v5733_v32, %v5732_v6  ;;  %vm936_vm7 = vcmp.gt.f32.partialorder %v4648_v38, 0.0  ;;  %v598_v8 = vmul.f32 1.442695, %v589_v35  ;;  %v5743_v31 = vld [vmem:[#allocation61_spill] sm:$0xff] }
 0x182   :  { %v3129_v10 = vpop.eup %3128  ;;  %v977_v46 = vsel %vm937_vm5, %v4600_v14, %v2661_v11  ;;  %v590_v0 = vmin.f32 %v4711_v19, 0.0  ;;  %3138 = vpow2.f32 %v950_v20  ;;  %v4725_v54 = vadd.f32 %v887_v23, %v868_v61 }
 0x183   :  { %2808 = vmatprep.subr.mxu1 %v977_v46  ;;  %v2637_v4 = vadd.f32 -1.0, %v3129_v10  ;;  %3140 = vpow2.f32 %v952_v39  ;;  %v4727_v56 = vadd.f32 %v535_v50, %v516_v36  ;;  %v1719_v2 = vadd.f32 %v1711_v62, %v5734_v44 }
 0x184   :  { %v600_v43 = vmul.f32 1.442695, %v590_v0  ;;  %v1729_v14 = vmul.f32 %v5736_v9, %v5735_v18  ;;  %vm935_vm8 = vcmp.gt.f32.partialorder %v4664_v7, 0.0  ;;  %3142 = vpow2.f32 %v598_v8 }
 0x185   :  { %v625_v27 = vsel %vm585_vm6, %v4618_v12, %v2637_v4  ;;  %v940_v3 = vmin.f32 %v4725_v54, 0.0  ;;  %vm584_vm9 = vcmp.gt.f32.partialorder %v4667_v24, 0.0  ;;  %v588_v55 = vmin.f32 %v4727_v56, 0.0 }
 0x186   :  { %2809 = vmatpush3.msra.mxu1 %v625_v27  ;;  %3144 = vpow2.f32 %v600_v43  ;;  %v1737_v13 = vadd.f32 %v1729_v14, %v1719_v2  ;;  %v1747_v51 = vmul.f32 %v4456_v22, %v5737_v28  ;;  %v1359_v12 = vmul.f32 %v5733_v32, %v5738_v15  ;;  %v1450_v43 = vpop.permute.xlu1 %1449  ;;  %v5745_v27 = vld [vmem:[#allocation44_spill] sm:$0xff] }
 0x187   :  { %v3131_v52 = vpop.eup %3130  ;;  %v948_v45 = vmul.f32 1.442695, %v940_v3  ;;  %v1377_v59 = vmul.f32 %v5736_v9, %v5739_v42  ;;  %v596_v48 = vmul.f32 1.442695, %v588_v55  ;;  %v1395_v57 = vmul.f32 %v4456_v22, %v5740_v17  ;;  %v1797_v55 = vpop.permute.xlu0 %1796 }
 0x188   :  { %v2660_v34 = vadd.f32 -1.0, %v3131_v52  ;;  %v1710_v53 = vmul.f32 %v5732_v6, %v5741_v47  ;;  %v1755_v33 = vadd.f32 %v1747_v51, %v1737_v13  ;;  %v1367_v40 = vadd.f32 %v1359_v12, %v5742_v60  ;;  %v5746_v51 = vld [vmem:[#allocation46_spill] sm:$0xff] }
 0x189   :  { %v3133_v58 = vpop.eup %3132  ;;  %3146 = vpow2.f32 %v948_v45  ;;  %v1728_v11 = vmul.f32 %v5735_v18, %v5743_v31  ;;  %vm583_vm10 = vcmp.gt.f32.partialorder %v4669_v41, 0.0  ;;  %v1746_v62 = vmul.f32 %v5737_v28, %v4473_v5  ;;  %v5748_v60 = vld [vmem:[#allocation30_spill] sm:$0xff] }
 0x18a   :  { %v3135_v20 = vpop.eup %3134  ;;  %v976_v35 = vsel %vm936_vm7, %v4648_v38, %v2660_v34  ;;  %v2659_v39 = vadd.f32 -1.0, %v3133_v58  ;;  %3148 = vpow2.f32 %v596_v48  ;;  %v1718_v61 = vadd.f32 %v1710_v53, %v5744_v37  ;;  %v5747_v48 = vld [vmem:[#allocation56_spill] sm:$0xff] }
 0x18b   :  { %2810 = vmatprep.subr.mxu1 %v976_v35  ;;  %v2636_v21 = vadd.f32 -1.0, %v3135_v20  ;;  %v4757_v36 = vadd.f32 %v1802_v30, %v1755_v33  ;;  %vm934_vm11 = vcmp.gt.f32.partialorder %v4701_v25, 0.0  ;;  %vm933_vm12 = vcmp.gt.f32.partialorder %v4696_v49, 0.0 }
 0x18c   :  { %v3137_v10 = vpop.eup %3136  ;;  %v1385_v23 = vadd.f32 %v1377_v59, %v1367_v40  ;;  %v1736_v38 = vadd.f32 %v1728_v11, %v1718_v61  ;;  %v1358_v46 = vmul.f32 %v5738_v15, %v5741_v47  ;;  %vm582_vm13 = vcmp.gt.f32.partialorder %v4711_v19, 0.0 }
 0x18d   :  { %v624_v0 = vsel %vm584_vm9, %v4667_v24, %v2636_v21  ;;  %v2635_v50 = vadd.f32 -1.0, %v3137_v10  ;;  %v1827_v4 = vmin.f32 %v4757_v36, 0.0  ;;  %v1376_v8 = vmul.f32 %v5739_v42, %v5743_v31  ;;  %v1445_v21 = vpop.permute.xlu1 %1444 }
 0x18e   :  { %2811 = vmatpush3.msra.mxu1 %v624_v0  ;;  %v975_v44 = vsel %vm935_vm8, %v4664_v7, %v2659_v39  ;;  %vm581_vm14 = vcmp.gt.f32.partialorder %v4699_v1, 0.0  ;;  %v1403_v2 = vadd.f32 %v1395_v57, %v1385_v23  ;;  %v1754_v14 = vadd.f32 %v1746_v62, %v1736_v38 }
 0x18f   :  { %v1366_v24 = vadd.f32 %v1358_v46, %v5745_v27  ;;  %v3139_v3 = vpop.eup %3138  ;;  %2812 = vmatprep.subr.mxu1 %v975_v44  ;;  %v623_v13 = vsel %vm583_vm10, %v4669_v41, %v2635_v50  ;;  %v1842_v52 = vmul.f32 1.442695, %v1827_v4  ;;  %v1394_v45 = vmul.f32 %v5740_v17, %v4473_v5  ;;  %v5749_v44 = vld [vmem:[#allocation31_spill] sm:$0xff]  ;;  %v1792_v27 = vpop.permute.xlu0 %1791 }
 0x190   :  { %v1709_v7 = vmul.f32 %v5746_v51, %v5732_v6  ;;  %v3141_v12 = vpop.eup %3140  ;;  %2813 = vmatpush3.msra.mxu1 %v623_v13  ;;  %vm932_vm15 = vcmp.gt.f32.partialorder %v4725_v54, 0.0  ;;  %v4785_v59 = vadd.f32 %v1450_v43, %v1403_v2  ;;  %v4787_v34 = vadd.f32 %v1797_v55, %v1754_v14 }
 0x191   :  { %v1727_v57 = vmul.f32 %v5747_v48, %v5735_v18  ;;  %v2658_v53 = vadd.f32 -1.0, %v3141_v12  ;;  %v2657_v41 = vadd.f32 -1.0, %v3139_v3  ;;  %3150 = vpow2.f32 %v1842_v52  ;;  %v3143_v30 = vpop.eup %3142  ;;  %v5750_v12 = vld [vmem:[#allocation47_spill] sm:$0xff] }
 0x192   :  { %v1384_v58 = vadd.f32 %v1376_v8, %v1366_v24  ;;  %vm580_vm0 = vcmp.gt.f32.partialorder %v4727_v56, 0.0  ;;  %v1475_v33 = vmin.f32 %v4785_v59, 0.0  ;;  %v1717_v40 = vadd.f32 %v1709_v7, %v5748_v60  ;;  %v5752_v60 = vld [vmem:[#allocation29_spill] sm:$0xff] }
 0x193   :  { %v1745_v11 = vmul.f32 %v4420_v26, %v5737_v28  ;;  %v3145_v20 = vpop.eup %3144  ;;  %v974_v35 = vsel %vm934_vm11, %v4701_v25, %v2658_v53  ;;  %v2633_v39 = vadd.f32 -1.0, %v3143_v30  ;;  %v1826_v37 = vmin.f32 %v4787_v34, 0.0  ;;  %v5751_v53 = vld [vmem:[#allocation57_spill] sm:$0xff] }
 0x194   :  { %v1402_v61 = vadd.f32 %v1394_v45, %v1384_v58  ;;  %2814 = vmatprep.subr.mxu1 %v974_v35  ;;  %v2634_v62 = vadd.f32 -1.0, %v3145_v20  ;;  %v1490_v10 = vmul.f32 1.442695, %v1475_v33  ;;  %v1735_v23 = vadd.f32 %v1727_v57, %v1717_v40  ;;  %v5753_v20 = vld [vmem:[#allocation33_spill] sm:$0xff] }
 0x195   :  { %v1357_v38 = vmul.f32 %v5746_v51, %v5738_v15  ;;  %v973_v46 = vsel %vm933_vm12, %v4696_v49, %v2657_v41  ;;  %v1840_v0 = vmul.f32 1.442695, %v1826_v37  ;;  %v1375_v25 = vmul.f32 %v5747_v48, %v5739_v42 }
 0x196   :  { %v4805_v50 = vadd.f32 %v1445_v21, %v1402_v61  ;;  %v3147_v4 = vpop.eup %3146  ;;  %v622_v8 = vsel %vm582_vm13, %v4711_v19, %v2634_v62  ;;  %3152 = vpow2.f32 %v1490_v10  ;;  %v1753_v43 = vadd.f32 %v1745_v11, %v1735_v23  ;;  %v1440_v11 = vpop.permute.xlu1 %1439  ;;  %v1872_v23 = vld [vmem:[%s5592_s4 + $0x20] sm:$0xff] }
 0x197   :  { %v1365_v2 = vadd.f32 %v1357_v38, %v5749_v44  ;;  %v3149_v14 = vpop.eup %3148  ;;  %2815 = vmatpush3.msra.mxu1 %v622_v8  ;;  %v621_v49 = vsel %vm581_vm14, %v4699_v1, %v2633_v39  ;;  %v2656_v24 = vadd.f32 -1.0, %v3147_v4  ;;  %3154 = vpow2.f32 %v1840_v0  ;;  %v1868_v1 = vld [vmem:[%s5592_s4] sm:$0xff]  ;;  %v1787_v10 = vpop.permute.xlu0 %1786 }
 0x198   :  { %v1474_v3 = vmin.f32 %v4805_v50, 0.0  ;;  %2816 = vmatprep.subr.mxu1 %v973_v46  ;;  %v2632_v55 = vadd.f32 -1.0, %v3149_v14  ;;  %v4817_v13 = vadd.f32 %v1792_v27, %v1753_v43  ;;  %v1393_v52 = vmul.f32 %v4420_v26, %v5740_v17  ;;  %v5754_v46 = vld [vmem:[#allocation34_spill] sm:$0xff]  ;;  %v1877_v14 = vld [vmem:[%s5592_s4 + $0x48] sm:$0xff] }
 0x199   :  { %v1383_v19 = vadd.f32 %v1375_v25, %v1365_v2  ;;  %2817 = vmatpush3.msra.mxu1 %v621_v49  ;;  %v972_v45 = vsel %vm932_vm15, %v4725_v54, %v2656_v24  ;;  %v1708_v57 = vmul.f32 %v5732_v6, %v5750_v12  ;;  %v1726_v41 = vmul.f32 %v5735_v18, %v5751_v53  ;;  %v1873_v54 = vld [vmem:[%s5592_s4 + $0x28] sm:$0xff]  ;;  %v5756_v8 = vld [vmem:[#allocation54_spill] sm:$0xff] }
 0x19a   :  { %v1488_v7 = vmul.f32 1.442695, %v1474_v3  ;;  %2818 = vmatprep.subr.mxu1 %v972_v45  ;;  %v620_v58 = vsel %vm580_vm0, %v4727_v56, %v2632_v55  ;;  %v1825_v30 = vmin.f32 %v4817_v13, 0.0  ;;  %v4840_v40 = vmul.f32 %v5752_v60, %v5732_v6  ;;  %v5755_v25 = vld [vmem:[#allocation35_spill] sm:$0xff]  ;;  %v5757_v55 = vld [vmem:[#allocation22_spill] sm:$0xff] }
 0x19b   :  { %v1401_v33 = vadd.f32 %v1393_v52, %v1383_v19  ;;  %2819 = vmatpush3.msra.mxu1 %v620_v58  ;;  %v1716_v35 = vadd.f32 %v1708_v57, %v5753_v20  ;;  %v1744_v39 = vmul.f32 %v5737_v28, %v4441_v16  ;;  %v1356_v56 = vmul.f32 %v5738_v15, %v5750_v12  ;;  %v1435_v57 = vpop.permute.xlu1 %1434 }
 0x19c   :  { %3156 = vpow2.f32 %v1488_v7  ;;  %2157 = vmatmul.mubr.f32.vlgmr.msra.gmra.mxu1 %v1868_v1  ;;  %v1838_v37 = vmul.f32 1.442695, %v1825_v30  ;;  %v1374_v21 = vmul.f32 %v5739_v42, %v5751_v53  ;;  %v1392_v62 = vmul.f32 %v5740_v17, %v4441_v16  ;;  %v1876_v30 = vld [vmem:[%s5592_s4 + $0x40] sm:$0xff] }
 0x19d   :  { %v4847_v61 = vadd.f32 %v1440_v11, %v1401_v33  ;;  %2161 = vmatprep.mubr.f32.mxu1 %v1873_v54  ;;  %v1734_v38 = vadd.f32 %v1726_v41, %v1716_v35  ;;  %v1364_v0 = vadd.f32 %v1356_v56, %v5754_v46  ;;  %v1707_v4 = vmul.f32 %v5755_v25, %v5732_v6  ;;  %v5758_v11 = vld [vmem:[#allocation23_spill] sm:$0xff]  ;;  %v5759_v35 = vld [vmem:[#allocation42_spill] sm:$0xff] }
 0x19e   :  { %v1725_v43 = vmul.f32 %v5756_v8, %v5735_v18  ;;  %v3151_v44 = vpop.eup %3150  ;;  %vm1819_vm1 = vcmp.gt.f32.partialorder %v4757_v36, 0.0  ;;  %3158 = vpow2.f32 %v1838_v37  ;;  %v1743_v27 = vmul.f32 %v4386_v29, %v5737_v28  ;;  %v5760_v56 = vld [vmem:[#allocation55_spill] sm:$0xff] }
 0x19f   :  { %v1473_v2 = vmin.f32 %v4847_v61, 0.0  ;;  %v2723_v49 = vadd.f32 -1.0, %v3151_v44  ;;  %v1752_v24 = vadd.f32 %v1744_v39, %v1734_v38  ;;  %v1382_v3 = vadd.f32 %v1374_v21, %v1364_v0 }
 0x1a0   :  { %v1715_v19 = vadd.f32 %v1707_v4, %v5757_v55  ;;  %2162 = vmatmul.mubr.f32.gmra.mxu1 %v1872_v23  ;;  %v1355_v45 = vmul.f32 %v5755_v25, %v5738_v15  ;;  %v1373_v1 = vmul.f32 %v5756_v8, %v5739_v42  ;;  %v1391_v7 = vmul.f32 %v4386_v29, %v5740_v17 }
 0x1a1   :  { %v1486_v52 = vmul.f32 1.442695, %v1473_v2  ;;  %v1859_v41 = vsel %vm1819_vm1, %v4757_v36, %v2723_v49  ;;  %v4876_v58 = vadd.f32 %v1787_v10, %v1752_v24  ;;  %2166 = vmatprep.mubr.f32.mxu1 %v1877_v14  ;;  %v1400_v54 = vadd.f32 %v1392_v62, %v1382_v3  ;;  %v1881_v36 = vld [vmem:[%s5592_s4 + $0x68] sm:$0xff]  ;;  %v1782_v62 = vpop.permute.xlu0 %1781 }
 0x1a2   :  { %v1733_v33 = vadd.f32 %v1725_v43, %v1715_v19  ;;  %2868 = vmatprep.subr.mxu1 %v1859_v41  ;;  %v1363_v20 = vadd.f32 %v1355_v45, %v5758_v11  ;;  %v1706_v39 = vmul.f32 %v5732_v6, %v5759_v35  ;;  %v1724_v37 = vmul.f32 %v5735_v18, %v5760_v56  ;;  %v5761_v43 = vld [vmem:[#allocation26_spill] sm:$0xff]  ;;  %v1885_v45 = vld [vmem:[%s5592_s4 + $0x88] sm:$0xff] }
 0x1a3   :  { %3160 = vpow2.f32 %v1486_v52  ;;  %v3153_v21 = vpop.eup %3152  ;;  %vm1467_vm2 = vcmp.gt.f32.partialorder %v4785_v59, 0.0  ;;  %v1824_v10 = vmin.f32 %v4876_v58, 0.0  ;;  %v4891_v23 = vadd.f32 %v1435_v57, %v1400_v54 }
 0x1a4   :  { %v1751_v38 = vadd.f32 %v1743_v27, %v1733_v33  ;;  %v3155_v46 = vpop.eup %3154  ;;  %v2699_v0 = vadd.f32 -1.0, %v3153_v21  ;;  %2167 = vmatmul.mubr.f32.gmra.mxu1 %v1876_v30  ;;  %v1381_v4 = vadd.f32 %v1373_v1, %v1363_v20  ;;  %v1714_v44 = vadd.f32 %v1706_v39, %v5761_v43  ;;  %v1880_v27 = vld [vmem:[%s5592_s4 + $0x60] sm:$0xff]  ;;  %v1430_v1 = vpop.permute.xlu1 %1429  ;;  %v5762_v39 = vld [vmem:[#allocation27_spill] sm:$0xff] }
 0x1a5   :  { %v1742_v2 = vmul.f32 %v5737_v28, %v4403_v63  ;;  %vm1818_vm3 = vcmp.gt.f32.partialorder %v4787_v34, 0.0  ;;  %v2722_v14 = vadd.f32 -1.0, %v3155_v46  ;;  %v1836_v49 = vmul.f32 1.442695, %v1824_v10  ;;  %2171 = vmatprep.mubr.f32.mxu1 %v1881_v36  ;;  %v1777_v11 = vpop.permute.xlu0 %1776  ;;  %v1884_v10 = vld [vmem:[%s5592_s4 + $0x80] sm:$0xff]  ;;  %v1889_v43 = vld [vmem:[%s5592_s4 + $0xa8] sm:$0xff] }
 0x1a6   :  { %v1472_v24 = vmin.f32 %v4891_v23, 0.0  ;;  %v1507_v3 = vsel %vm1467_vm2, %v4785_v59, %v2699_v0  ;;  %v4904_v55 = vadd.f32 %v1782_v62, %v1751_v38  ;;  %v1399_v19 = vadd.f32 %v1391_v7, %v1381_v4 }
 0x1a7   :  { %v1732_v52 = vadd.f32 %v1724_v37, %v1714_v44  ;;  %2869 = vmatpush3.msra.mxu1 %v1507_v3  ;;  %v1858_v57 = vsel %vm1818_vm3, %v4787_v34, %v2722_v14  ;;  %3162 = vpow2.f32 %v1836_v49  ;;  %v1354_v54 = vmul.f32 %v5738_v15, %v5759_v35  ;;  %v5763_v14 = vld [vmem:[#allocation19_spill] sm:$0xff] }
 0x1a8   :  { %v1484_v41 = vmul.f32 1.442695, %v1472_v24  ;;  %2870 = vmatprep.subr.mxu1 %v1858_v57  ;;  %vm1466_vm4 = vcmp.gt.f32.partialorder %v4805_v50, 0.0  ;;  %v1823_v59 = vmin.f32 %v4904_v55, 0.0  ;;  %v4914_v7 = vadd.f32 %v1430_v1, %v1399_v19  ;;  %2172 = vmatmul.mubr.f32.gmra.mxu1 %v1880_v27  ;;  %v5764_v27 = vld [vmem:[#allocation52_spill] sm:$0xff]  ;;  %v5765_v19 = vld [vmem:[#allocation65_spill] sm:$0xff] }
 0x1a9   :  { %v3157_v30 = vpop.eup %3156  ;;  %v1750_v33 = vadd.f32 %v1742_v2, %v1732_v52  ;;  %v1362_v34 = vadd.f32 %v1354_v54, %v5762_v39  ;;  %v1372_v37 = vmul.f32 %v5739_v42, %v5760_v56  ;;  %2176 = vmatprep.mubr.f32.mxu1 %v1885_v45  ;;  %vm1817_vm5 = vcmp.gt.f32.partialorder %v4817_v13, 0.0  ;;  %v1425_v45 = vpop.permute.xlu1 %1424  ;;  %v5766_v39 = vld [vmem:[#allocation28_spill] sm:$0xff] }
 0x1aa   :  { %v2698_v20 = vadd.f32 -1.0, %v3157_v30  ;;  %3164 = vpow2.f32 %v1484_v41  ;;  %v1834_v36 = vmul.f32 1.442695, %v1823_v59  ;;  %v1471_v21 = vmin.f32 %v4914_v7, 0.0  ;;  %v1888_v41 = vld [vmem:[%s5592_s4 + $0xa0] sm:$0xff] }
 0x1ab   :  { %v4921_v62 = vadd.f32 %v1777_v11, %v1750_v33  ;;  %v3159_v38 = vpop.eup %3158  ;;  %vm1465_vm6 = vcmp.gt.f32.partialorder %v4847_v61, 0.0  ;;  %v1380_v0 = vadd.f32 %v1372_v37, %v1362_v34  ;;  %v1390_v4 = vmul.f32 %v5740_v17, %v4403_v63  ;;  %v1893_v11 = vld [vmem:[%s5592_s4 + $0xc8] sm:$0xff]  ;;  %v5767_v37 = vld [vmem:[#allocation32_spill] sm:$0xff] }
 0x1ac   :  { %v1506_v46 = vsel %vm1466_vm4, %v4805_v50, %v2698_v20  ;;  %v2721_v44 = vadd.f32 -1.0, %v3159_v38  ;;  %3166 = vpow2.f32 %v1834_v36  ;;  %v1482_v2 = vmul.f32 1.442695, %v1471_v21  ;;  %2177 = vmatmul.mubr.f32.gmra.mxu1 %v1884_v10  ;;  %v5768_v21 = vld [vmem:[#allocation53_spill] sm:$0xff]  ;;  %v1772_v38 = vpop.permute.xlu0 %1771 }
 0x1ad   :  { %2871 = vmatpush3.msra.mxu1 %v1506_v46  ;;  %v1713_v49 = vadd.f32 %v4840_v40, %v5763_v14  ;;  %v1822_v24 = vmin.f32 %v4921_v62, 0.0  ;;  %v1398_v50 = vadd.f32 %v1390_v4, %v1380_v0  ;;  %v1723_v3 = vmul.f32 %v5764_v27, %v5735_v18  ;;  %2181 = vmatprep.mubr.f32.mxu1 %v1889_v43  ;;  %v5770_v14 = vld [vmem:[#allocation66_spill] sm:$0xff] }
 0x1ae   :  { %v1741_v52 = vmul.f32 %v5765_v19, %v5737_v28  ;;  %v1857_v1 = vsel %vm1817_vm5, %v4817_v13, %v2721_v44  ;;  %3168 = vpow2.f32 %v1482_v2  ;;  %v1353_v57 = vmul.f32 %v5752_v60, %v5738_v15  ;;  %v5769_v44 = vld [vmem:[#allocation38_spill] sm:$0xff] }
 0x1af   :  { %v1371_v40 = vmul.f32 %v5764_v27, %v5739_v42  ;;  %2872 = vmatprep.subr.mxu1 %v1857_v1  ;;  %v1832_v30 = vmul.f32 1.442695, %v1822_v24  ;;  %v4954_v59 = vadd.f32 %v1425_v45, %v1398_v50  ;;  %v1731_v13 = vadd.f32 %v1723_v3, %v1713_v49  ;;  %v1420_v1 = vpop.permute.xlu1 %1419 }
 0x1b0   :  { %v3161_v54 = vpop.eup %3160  ;;  %v1389_v33 = vmul.f32 %v5765_v19, %v5740_v17  ;;  %v1361_v34 = vadd.f32 %v1353_v57, %v5766_v39  ;;  %v1704_v36 = vmul.f32 %v5732_v6, %v5767_v37  ;;  %v1722_v10 = vmul.f32 %v5735_v18, %v5768_v21  ;;  %2182 = vmatmul.mubr.f32.gmra.mxu1 %v1888_v41  ;;  %v1892_v18 = vld [vmem:[%s5592_s4 + $0xc0] sm:$0xff] }
 0x1b1   :  { %v2697_v20 = vadd.f32 -1.0, %v3161_v54  ;;  %vm1816_vm7 = vcmp.gt.f32.partialorder %v4876_v58, 0.0  ;;  %3170 = vpow2.f32 %v1832_v30  ;;  %v1470_v46 = vmin.f32 %v4954_v59, 0.0  ;;  %2186 = vmatprep.mubr.f32.mxu1 %v1893_v11 }
 0x1b2   :  { %v1749_v0 = vadd.f32 %v1741_v52, %v1731_v13  ;;  %v1379_v43 = vadd.f32 %v1371_v40, %v1361_v34  ;;  %v1712_v2 = vadd.f32 %v1704_v36, %v5769_v44  ;;  %v1740_v6 = vmul.f32 %v5737_v28, %v5770_v14  ;;  %v1897_v28 = vld [vmem:[%s5592_s4 + $0xe8] sm:$0xff]  ;;  %v5771_v13 = vld [vmem:[#allocation41_spill] sm:$0xff]  ;;  %v5773_v44 = vld [vmem:[#allocation20_spill] sm:$0xff] }
 0x1b3   :  { %v1505_v4 = vsel %vm1465_vm6, %v4847_v61, %v2697_v20  ;;  %vm1464_vm8 = vcmp.gt.f32.partialorder %v4891_v23, 0.0  ;;  %v1480_v49 = vmul.f32 1.442695, %v1470_v46  ;;  %v1352_v61 = vmul.f32 %v5738_v15, %v5767_v37  ;;  %v1767_v20 = vpop.permute.xlu0 %1766 }
 0x1b4   :  { %2873 = vmatpush3.msra.mxu1 %v1505_v4  ;;  %v4980_v24 = vadd.f32 %v1772_v38, %v1749_v0  ;;  %v3163_v50 = vpop.eup %3162  ;;  %vm1815_vm9 = vcmp.gt.f32.partialorder %v4904_v55, 0.0  ;;  %v1397_v3 = vadd.f32 %v1389_v33, %v1379_v43  ;;  %v1730_v52 = vadd.f32 %v1722_v10, %v1712_v2  ;;  %v1901_v10 = vld [vmem:[%s5592_s4 + $0x108] sm:$0xff]  ;;  %v5772_v43 = vld [vmem:[#allocation45_spill] sm:$0xff] }
 0x1b5   :  { %v1370_v45 = vmul.f32 %v5739_v42, %v5768_v21  ;;  %v2720_v57 = vadd.f32 -1.0, %v3163_v50  ;;  %3172 = vpow2.f32 %v1480_v49  ;;  %v1388_v40 = vmul.f32 %v5740_v17, %v5770_v14  ;;  %2187 = vmatmul.mubr.f32.gmra.mxu1 %v1892_v18  ;;  %v1896_v42 = vld [vmem:[%s5592_s4 + $0xe0] sm:$0xff] }
 0x1b6   :  { %v1821_v15 = vmin.f32 %v4980_v24, 0.0  ;;  %v4997_v54 = vadd.f32 %v1420_v1, %v1397_v3  ;;  %v1748_v30 = vadd.f32 %v1740_v6, %v1730_v52  ;;  %v1360_v33 = vadd.f32 %v1352_v61, %v5771_v13  ;;  %2191 = vmatprep.mubr.f32.mxu1 %v1897_v28  ;;  %v1415_v1 = vpop.permute.xlu1 %1414 }
 0x1b7   :  { %v3165_v41 = vpop.eup %3164  ;;  %v5001_v11 = vstv %s4949_s19  ;;  %v1856_v17 = vsel %vm1816_vm7, %v4876_v58, %v2720_v57  ;;  %vm1463_vm10 = vcmp.gt.f32.partialorder %v4914_v7, 0.0  ;;  %vm1814_vm11 = vcmp.gt.f32.partialorder %v4921_v62, 0.0 }
 0x1b8   :  { %v2696_v39 = vadd.f32 -1.0, %v3165_v41  ;;  %v1830_v34 = vmul.f32 1.442695, %v1821_v15  ;;  %v1535_v36 = vmul.f32 %v5733_v32, %v5001_v11  ;;  %2874 = vmatprep.subr.mxu1 %v1856_v17  ;;  %v1469_v38 = vmin.f32 %v4997_v54, 0.0  ;;  %v1905_v41 = vld [vmem:[%s5592_s4 + $0x128] sm:$0xff] }
 0x1b9   :  { %v5021_v58 = vadd.f32 %v1767_v20, %v1748_v30  ;;  %v3167_v46 = vpop.eup %3166  ;;  %v1378_v4 = vadd.f32 %v1370_v45, %v1360_v33  ;;  %v1525_v2 = vmul.f32 %v5773_v44, %v5772_v43  ;;  %2192 = vmatmul.mubr.f32.gmra.mxu1 %v1896_v42  ;;  %v5032_v61 = vstv %s4974_s23  ;;  %v1900_v45 = vld [vmem:[%s5592_s4 + $0x100] sm:$0xff] }
 0x1ba   :  { %v1504_v0 = vsel %vm1464_vm8, %v4891_v23, %v2696_v39  ;;  %3174 = vpow2.f32 %v1830_v34  ;;  %v2719_v6 = vadd.f32 -1.0, %v3167_v46  ;;  %v1478_v18 = vmul.f32 1.442695, %v1469_v38  ;;  %2196 = vmatprep.mubr.f32.mxu1 %v1901_v10  ;;  %v1626_v38 = vpop.permute.xlu0 %1625 }
 0x1bb   :  { %2875 = vmatpush3.msra.mxu1 %v1504_v0  ;;  %v1820_v49 = vmin.f32 %v5021_v58, 0.0  ;;  %v3169_v28 = vpop.eup %3168  ;;  %v1396_v50 = vadd.f32 %v1388_v40, %v1378_v4  ;;  %v1543_v3 = vadd.f32 %v1535_v36, %v1525_v2  ;;  %v1553_v23 = vmul.f32 %v5736_v9, %v5032_v61  ;;  %v1904_v2 = vld [vmem:[%s5592_s4 + $0x120] sm:$0xff] }
 0x1bc   :  { %v5037_v52 = vstv %s4984_s26  ;;  %v1855_v57 = vsel %vm1815_vm9, %v4904_v55, %v2719_v6  ;;  %v2695_v15 = vadd.f32 -1.0, %v3169_v28  ;;  %3176 = vpow2.f32 %v1478_v18 }
 0x1bd   :  { %v1828_v40 = vmul.f32 1.442695, %v1820_v49  ;;  %2876 = vmatprep.subr.mxu1 %v1855_v57  ;;  %vm1462_vm12 = vcmp.gt.f32.partialorder %v4954_v59, 0.0  ;;  %v5049_v30 = vadd.f32 %v1415_v1, %v1396_v50  ;;  %v1561_v13 = vadd.f32 %v1553_v23, %v1543_v3  ;;  %2197 = vmatmul.mubr.f32.gmra.mxu1 %v1900_v45 }
 0x1be   :  { %v1571_v33 = vmul.f32 %v4456_v22, %v5037_v52  ;;  %v3171_v42 = vpop.eup %3170  ;;  %v1503_v55 = vsel %vm1463_vm10, %v4914_v7, %v2695_v15  ;;  %v5057_v20 = vstv %s4995_s28  ;;  %v5060_v17 = vstv %s5003_s29  ;;  %2201 = vmatprep.mubr.f32.mxu1 %v1905_v41 }
 0x1bf   :  { %3178 = vpow2.f32 %v1828_v40  ;;  %2877 = vmatpush3.msra.mxu1 %v1503_v55  ;;  %v2718_v39 = vadd.f32 -1.0, %v3171_v42  ;;  %v1468_v34 = vmin.f32 %v5049_v30, 0.0  ;;  %v5064_v10 = vstv %s5013_s10 }
 0x1c0   :  { %v1579_v36 = vadd.f32 %v1571_v33, %v1561_v13  ;;  %v1173_v46 = vmul.f32 %v5773_v44, %v5057_v20  ;;  %v1183_v7 = vmul.f32 %v5733_v32, %v5060_v17  ;;  %v1201_v0 = vmul.f32 %v5736_v9, %v5064_v10  ;;  %v5774_v44 = vld [vmem:[#allocation24_spill] sm:$0xff]  ;;  %v1909_v32 = vld [vmem:[%s5592_s4 + $0x148] sm:$0xff]  ;;  %v1908_v13 = vld [vmem:[%s5592_s4 + $0x140] sm:$0xff]  ;;  %v1274_v33 = vpop.permute.xlu1 %1273 }
 0x1c1   :  { %v5073_v4 = vstv %s5023_s2  ;;  %v1854_v6 = vsel %vm1814_vm11, %v4921_v62, %v2718_v39  ;;  %v1476_v18 = vmul.f32 1.442695, %v1468_v34  ;;  %v1524_v28 = vmul.f32 %v5772_v43, %v5774_v44  ;;  %2202 = vmatmul.mubr.f32.gmra.mxu1 %v1904_v2 }
 0x1c2   :  { %v5081_v49 = vadd.f32 %v1626_v38, %v1579_v36  ;;  %v3173_v9 = vpop.eup %3172  ;;  %2878 = vmatprep.subr.mxu1 %v1854_v6  ;;  %v1191_v50 = vadd.f32 %v1183_v7, %v1173_v46  ;;  %v1219_v3 = vmul.f32 %v4456_v22, %v5073_v4  ;;  %v1534_v23 = vmul.f32 %v5001_v11, %v5741_v47  ;;  %v1621_v6 = vpop.permute.xlu0 %1620 }
 0x1c3   :  { %v1552_v62 = vmul.f32 %v5032_v61, %v5743_v31  ;;  %v2694_v45 = vadd.f32 -1.0, %v3173_v9  ;;  %3180 = vpow2.f32 %v1476_v18  ;;  %v1570_v57 = vmul.f32 %v5037_v52, %v4473_v5  ;;  %2206 = vmatprep.mubr.f32.mxu1 %v1909_v32  ;;  %v1912_v32 = vld [vmem:[%s5592_s4 + $0x160] sm:$0xff] }
 0x1c4   :  { %v1651_v1 = vmin.f32 %v5081_v49, 0.0  ;;  %v1209_v15 = vadd.f32 %v1201_v0, %v1191_v50  ;;  %v1542_v40 = vadd.f32 %v1534_v23, %v1524_v28  ;;  %v1172_v41 = vmul.f32 %v5057_v20, %v5774_v44  ;;  %v5775_v0 = vld [vmem:[#allocation11_spill] sm:$0xff] }
 0x1c5   :  { %v1182_v22 = vmul.f32 %v5060_v17, %v5741_v47  ;;  %v1502_v42 = vsel %vm1462_vm12, %v4954_v59, %v2694_v45  ;;  %v1200_v39 = vmul.f32 %v5064_v10, %v5743_v31  ;;  %v1218_v34 = vmul.f32 %v5073_v4, %v4473_v5  ;;  %v1913_v47 = vld [vmem:[%s5592_s4 + $0x168] sm:$0xff]  ;;  %2207 = vmatmul.mubr.f32.gmra.mxu1 %v1908_v13 }
 0x1c6   :  { %v1666_v55 = vmul.f32 1.442695, %v1651_v1  ;;  %2879 = vmatpush3.msra.mxu1 %v1502_v42  ;;  %v1227_v38 = vadd.f32 %v1219_v3, %v1209_v15  ;;  %v1560_v46 = vadd.f32 %v1552_v62, %v1542_v40  ;;  %v1523_v2 = vmul.f32 %v5775_v0, %v5772_v43  ;;  %2211 = vmatprep.mubr.f32.mxu1 %v1913_v47  ;;  %v1917_v45 = vld [vmem:[%s5592_s4 + $0x188] sm:$0xff]  ;;  %v1916_v47 = vld [vmem:[%s5592_s4 + $0x180] sm:$0xff] }
 0x1c7   :  { %v3175_v36 = vpop.eup %3174  ;;  %v1190_v7 = vadd.f32 %v1182_v22, %v1172_v41  ;;  %v1533_v31 = vmul.f32 %v5746_v51, %v5001_v11  ;;  %v1551_v5 = vmul.f32 %v5747_v48, %v5032_v61  ;;  %vm1813_vm13 = vcmp.gt.f32.partialorder %v4980_v24, 0.0  ;;  %v1269_v41 = vpop.permute.xlu1 %1268 }
 0x1c8   :  { %v2717_v59 = vadd.f32 -1.0, %v3175_v36  ;;  %3182 = vpow2.f32 %v1666_v55  ;;  %v5121_v18 = vadd.f32 %v1274_v33, %v1227_v38  ;;  %v1578_v44 = vadd.f32 %v1570_v57, %v1560_v46 }
 0x1c9   :  { %v1208_v28 = vadd.f32 %v1200_v39, %v1190_v7  ;;  %v3177_v9 = vpop.eup %3176  ;;  %v1541_v3 = vadd.f32 %v1533_v31, %v1523_v2  ;;  %v1569_v23 = vmul.f32 %v4420_v26, %v5037_v52  ;;  %v1181_v62 = vmul.f32 %v5746_v51, %v5060_v17  ;;  %2212 = vmatmul.mubr.f32.gmra.mxu1 %v1912_v32  ;;  %v1920_v32 = vld [vmem:[%s5592_s4 + $0x1a0] sm:$0xff] }
 0x1ca   :  { %v1853_v50 = vsel %vm1813_vm13, %v4980_v24, %v2717_v59  ;;  %v2693_v1 = vadd.f32 -1.0, %v3177_v9  ;;  %v1299_v57 = vmin.f32 %v5121_v18, 0.0  ;;  %v5135_v15 = vadd.f32 %v1621_v6, %v1578_v44  ;;  %2216 = vmatprep.mubr.f32.mxu1 %v1917_v45  ;;  %v5776_v44 = vld [vmem:[#allocation18_spill] sm:$0xff] }
 0x1cb   :  { %2880 = vmatprep.subr.mxu1 %v1853_v50  ;;  %v1171_v24 = vmul.f32 %v5775_v0, %v5057_v20  ;;  %vm1461_vm14 = vcmp.gt.f32.partialorder %v4997_v54, 0.0  ;;  %v1226_v22 = vadd.f32 %v1218_v34, %v1208_v28  ;;  %v1559_v13 = vadd.f32 %v1551_v5, %v1541_v3  ;;  %v1264_v9 = vpop.permute.xlu1 %1263 }
 0x1cc   :  { %v3179_v40 = vpop.eup %3178  ;;  %v1199_v51 = vmul.f32 %v5747_v48, %v5064_v10  ;;  %v1501_v33 = vsel %vm1461_vm14, %v4997_v54, %v2693_v1  ;;  %v1314_v55 = vmul.f32 1.442695, %v1299_v57  ;;  %vm1812_vm15 = vcmp.gt.f32.partialorder %v5021_v58, 0.0  ;;  %v1921_v48 = vld [vmem:[%s5592_s4 + $0x1a8] sm:$0xff]  ;;  %v1616_v54 = vpop.permute.xlu0 %1615 }
 0x1cd   :  { %v2716_v42 = vadd.f32 -1.0, %v3179_v40  ;;  %v1189_v39 = vadd.f32 %v1181_v62, %v1171_v24  ;;  %2881 = vmatpush3.msra.mxu1 %v1501_v33  ;;  %v1650_v34 = vmin.f32 %v5135_v15, 0.0  ;;  %v5148_v36 = vadd.f32 %v1269_v41, %v1226_v22  ;;  %v1925_v62 = vld [vmem:[%s5592_s4 + $0x1c8] sm:$0xff] }
 0x1ce   :  { %v1577_v38 = vadd.f32 %v1569_v23, %v1559_v13  ;;  %3184 = vpow2.f32 %v1314_v55  ;;  %v1217_v0 = vmul.f32 %v4420_v26, %v5073_v4  ;;  %vm1460_vm0 = vcmp.gt.f32.partialorder %v5049_v30, 0.0  ;;  %2217 = vmatmul.mubr.f32.gmra.mxu1 %v1916_v47 }
 0x1cf   :  { %v1852_v46 = vsel %vm1812_vm15, %v5021_v58, %v2716_v42  ;;  %v1207_v7 = vadd.f32 %v1199_v51, %v1189_v39  ;;  %v1664_v2 = vmul.f32 1.442695, %v1650_v34  ;;  %v1298_v59 = vmin.f32 %v5148_v36, 0.0  ;;  %2221 = vmatprep.mubr.f32.mxu1 %v1921_v48  ;;  %v1929_v34 = vld [vmem:[%s5592_s4 + $0x1e8] sm:$0xff] }
 0x1d0   :  { %2882 = vmatprep.subr.mxu1 %v1852_v46  ;;  %v5158_v31 = vadd.f32 %v1616_v54, %v1577_v38  ;;  %v3181_v5 = vpop.eup %3180  ;;  %v1522_v28 = vmul.f32 %v5772_v43, %v5776_v44  ;;  %v1532_v58 = vmul.f32 %v5001_v11, %v5750_v12  ;;  %v1550_v26 = vmul.f32 %v5032_v61, %v5751_v53  ;;  %v1611_v46 = vpop.permute.xlu0 %1610 }
 0x1d1   :  { %v1225_v6 = vadd.f32 %v1217_v0, %v1207_v7  ;;  %v2692_v50 = vadd.f32 -1.0, %v3181_v5  ;;  %3186 = vpow2.f32 %v1664_v2  ;;  %v1312_v3 = vmul.f32 1.442695, %v1298_v59 }
 0x1d2   :  { %v1568_v23 = vmul.f32 %v5037_v52, %v4441_v16  ;;  %v1649_v45 = vmin.f32 %v5158_v31, 0.0  ;;  %v1540_v57 = vadd.f32 %v1532_v58, %v1522_v28  ;;  %v1170_v24 = vmul.f32 %v5057_v20, %v5776_v44  ;;  %2222 = vmatmul.mubr.f32.gmra.mxu1 %v1920_v32  ;;  %v1259_v32 = vpop.permute.xlu1 %1258 }
 0x1d3   :  { %v5175_v1 = vadd.f32 %v1264_v9, %v1225_v6  ;;  %v1500_v40 = vsel %vm1460_vm0, %v5049_v30, %v2692_v50  ;;  %3188 = vpow2.f32 %v1312_v3  ;;  %v1180_v41 = vmul.f32 %v5060_v17, %v5750_v12  ;;  %2226 = vmatprep.mubr.f32.mxu1 %v1925_v62  ;;  %v1924_v30 = vld [vmem:[%s5592_s4 + $0x1c0] sm:$0xff] }
 0x1d4   :  { %v1198_v22 = vmul.f32 %v5064_v10, %v5751_v53  ;;  %2883 = vmatpush3.msra.mxu1 %v1500_v40  ;;  %vm1643_vm1 = vcmp.gt.f32.partialorder %v5081_v49, 0.0  ;;  %v1662_v51 = vmul.f32 1.442695, %v1649_v45  ;;  %v1558_v42 = vadd.f32 %v1550_v26, %v1540_v57  ;;  %v5777_v53 = vld [vmem:[#allocation8_spill] sm:$0xff]  ;;  %v1871_v26 = vld [vmem:[%s5592_s4 + $0x18] sm:$0xff] }
 0x1d5   :  { %v3183_v13 = vpop.eup %3182  ;;  %v1297_v33 = vmin.f32 %v5175_v1, 0.0  ;;  %v1188_v39 = vadd.f32 %v1180_v41, %v1170_v24  ;;  %v1216_v12 = vmul.f32 %v5073_v4, %v4441_v16  ;;  %v1521_v47 = vmul.f32 %v5777_v53, %v5772_v43  ;;  %v5778_v45 = vld [vmem:[#allocation9_spill] sm:$0xff] }
 0x1d6   :  { %v2711_v55 = vadd.f32 -1.0, %v3183_v13  ;;  %3190 = vpow2.f32 %v1662_v51  ;;  %v1576_v48 = vadd.f32 %v1568_v23, %v1558_v42  ;;  %v1531_v54 = vmul.f32 %v5755_v25, %v5001_v11  ;;  %2227 = vmatmul.mubr.f32.gmra.mxu1 %v1924_v30  ;;  %v1606_v13 = vpop.permute.xlu0 %1605 }
 0x1d7   :  { %v1310_v38 = vmul.f32 1.442695, %v1297_v33  ;;  %vm1291_vm2 = vcmp.gt.f32.partialorder %v5121_v18, 0.0  ;;  %v1206_v16 = vadd.f32 %v1198_v22, %v1188_v39  ;;  %v1549_v0 = vmul.f32 %v5756_v8, %v5032_v61  ;;  %2231 = vmatprep.mubr.f32.mxu1 %v1929_v34 }
 0x1d8   :  { %v1683_v7 = vsel %vm1643_vm1, %v5081_v49, %v2711_v55  ;;  %v5206_v2 = vadd.f32 %v1611_v46, %v1576_v48  ;;  %v1539_v59 = vadd.f32 %v1531_v54, %v1521_v47  ;;  %v1567_v5 = vmul.f32 %v4386_v29, %v5037_v52  ;;  %v1928_v49 = vld [vmem:[%s5592_s4 + $0x1e0] sm:$0xff]  ;;  %v1254_v48 = vpop.permute.xlu1 %1253 }
 0x1d9   :  { %2884 = vmatprep.subr.mxu1 %v1683_v7  ;;  %3192 = vpow2.f32 %v1310_v38  ;;  %v1224_v6 = vadd.f32 %v1216_v12, %v1206_v16  ;;  %v1169_v44 = vmul.f32 %v5777_v53, %v5057_v20  ;;  %v1179_v28 = vmul.f32 %v5755_v25, %v5060_v17 }
 0x1da   :  { %v1197_v58 = vmul.f32 %v5756_v8, %v5064_v10  ;;  %vm1642_vm3 = vcmp.gt.f32.partialorder %v5135_v15, 0.0  ;;  %v1648_v9 = vmin.f32 %v5206_v2, 0.0  ;;  %v1557_v50 = vadd.f32 %v1549_v0, %v1539_v59  ;;  %2232 = vmatmul.mubr.f32.gmra.mxu1 %v1928_v49 }
 0x1db   :  { %v1215_v3 = vmul.f32 %v4386_v29, %v5073_v4  ;;  %v3185_v23 = vpop.eup %3184  ;;  %v5226_v62 = vadd.f32 %v1259_v32, %v1224_v6  ;;  %v1187_v25 = vadd.f32 %v1179_v28, %v1169_v44  ;;  %v1520_v8 = vmul.f32 %v5772_v43, %v5778_v45  ;;  %2301 = vmatprep.mubr.f32.mxu1 %v1871_v26  ;;  %v5779_v32 = vld [vmem:[#allocation6_spill] sm:$0xff] }
 0x1dc   :  { %v1530_v57 = vmul.f32 %v5001_v11, %v5759_v35  ;;  %v2687_v24 = vadd.f32 -1.0, %v3185_v23  ;;  %v1660_v40 = vmul.f32 1.442695, %v1648_v9  ;;  %v1575_v41 = vadd.f32 %v1567_v5, %v1557_v50 }
 0x1dd   :  { %v1548_v22 = vmul.f32 %v5032_v61, %v5760_v56  ;;  %vm1290_vm4 = vcmp.gt.f32.partialorder %v5148_v36, 0.0  ;;  %v1296_v29 = vmin.f32 %v5226_v62, 0.0  ;;  %v1205_v51 = vadd.f32 %v1197_v58, %v1187_v25 }
 0x1de   :  { %v1566_v33 = vmul.f32 %v5037_v52, %v4403_v63  ;;  %v3187_v42 = vpop.eup %3186  ;;  %v1331_v30 = vsel %vm1291_vm2, %v5121_v18, %v2687_v24  ;;  %3194 = vpow2.f32 %v1660_v40  ;;  %v5241_v55 = vadd.f32 %v1606_v13, %v1575_v41 }
 0x1df   :  { %v1538_v39 = vadd.f32 %v1530_v57, %v1520_v8  ;;  %2885 = vmatpush3.msra.mxu1 %v1331_v30  ;;  %v2710_v12 = vadd.f32 -1.0, %v3187_v42  ;;  %v1308_v53 = vmul.f32 1.442695, %v1296_v29  ;;  %v1223_v47 = vadd.f32 %v1215_v3, %v1205_v51 }
 0x1e0   :  { %v1168_v34 = vmul.f32 %v5057_v20, %v5778_v45  ;;  %v3189_v38 = vpop.eup %3188  ;;  %v1647_v54 = vmin.f32 %v5241_v55, 0.0  ;;  %v1178_v7 = vmul.f32 %v5060_v17, %v5759_v35  ;;  %v1196_v18 = vmul.f32 %v5064_v10, %v5760_v56  ;;  %v1601_v35 = vpop.permute.xlu0 %1600 }
 0x1e1   :  { %v1556_v46 = vadd.f32 %v1548_v22, %v1538_v39  ;;  %v1682_v16 = vsel %vm1642_vm3, %v5135_v15, %v2710_v12  ;;  %v2686_v0 = vadd.f32 -1.0, %v3189_v38  ;;  %3196 = vpow2.f32 %v1308_v53  ;;  %v1249_v22 = vpop.permute.xlu1 %1248  ;;  %v5780_v39 = vld [vmem:[#allocation7_spill] sm:$0xff] }
 0x1e2   :  { %v5253_v59 = vadd.f32 %v1254_v48, %v1223_v47  ;;  %2886 = vmatprep.subr.mxu1 %v1682_v16  ;;  %vm1641_vm5 = vcmp.gt.f32.partialorder %v5158_v31, 0.0  ;;  %vm1289_vm6 = vcmp.gt.f32.partialorder %v5175_v1, 0.0  ;;  %v1658_v5 = vmul.f32 1.442695, %v1647_v54 }
 0x1e3   :  { %v1574_v49 = vadd.f32 %v1566_v33, %v1556_v46  ;;  %v3191_v6 = vpop.eup %3190  ;;  %v1330_v56 = vsel %vm1290_vm4, %v5148_v36, %v2686_v0  ;;  %v1186_v15 = vadd.f32 %v1178_v7, %v1168_v34  ;;  %v1214_v28 = vmul.f32 %v5073_v4, %v4403_v63 }
 0x1e4   :  { %v1295_v44 = vmin.f32 %v5253_v59, 0.0  ;;  %2887 = vmatpush3.msra.mxu1 %v1330_v56  ;;  %v2709_v58 = vadd.f32 -1.0, %v3191_v6  ;;  %3198 = vpow2.f32 %v1658_v5  ;;  %v1519_v9 = vmul.f32 %v5779_v32, %v5772_v43 }
 0x1e5   :  { %v5263_v26 = vadd.f32 %v1601_v35, %v1574_v49  ;;  %v1204_v23 = vadd.f32 %v1196_v18, %v1186_v15  ;;  %v1529_v36 = vmul.f32 %v5752_v60, %v5001_v11  ;;  %v1547_v25 = vmul.f32 %v5764_v27, %v5032_v61  ;;  %v1244_v49 = vpop.permute.xlu1 %1243 }
 0x1e6   :  { %v3193_v50 = vpop.eup %3192  ;;  %v1306_v3 = vmul.f32 1.442695, %v1295_v44  ;;  %v1681_v63 = vsel %vm1641_vm5, %v5158_v31, %v2709_v58  ;;  %v1565_v57 = vmul.f32 %v5765_v19, %v5037_v52  ;;  %v1167_v41 = vmul.f32 %v5779_v32, %v5057_v20 }
 0x1e7   :  { %v2685_v45 = vadd.f32 -1.0, %v3193_v50  ;;  %v1646_v8 = vmin.f32 %v5263_v26, 0.0  ;;  %2888 = vmatprep.subr.mxu1 %v1681_v63  ;;  %v1222_v24 = vadd.f32 %v1214_v28, %v1204_v23  ;;  %v1537_v40 = vadd.f32 %v1529_v36, %v1519_v9 }
 0x1e8   :  { %3200 = vpow2.f32 %v1306_v3  ;;  %v1177_v31 = vmul.f32 %v5752_v60, %v5060_v17  ;;  %v1195_v51 = vmul.f32 %v5764_v27, %v5064_v10  ;;  %v1213_v30 = vmul.f32 %v5765_v19, %v5073_v4  ;;  %v1596_v27 = vpop.permute.xlu0 %1595 }
 0x1e9   :  { %v1329_v13 = vsel %vm1289_vm6, %v5175_v1, %v2685_v45  ;;  %v1656_v29 = vmul.f32 1.442695, %v1646_v8  ;;  %v5286_v33 = vadd.f32 %v1249_v22, %v1222_v24  ;;  %v1555_v42 = vadd.f32 %v1547_v25, %v1537_v40  ;;  %v1239_v25 = vpop.permute.xlu1 %1238 }
 0x1ea   :  { %2889 = vmatpush3.msra.mxu1 %v1329_v13  ;;  %v1518_v12 = vmul.f32 %v5772_v43, %v5780_v39  ;;  %v1185_v53 = vadd.f32 %v1177_v31, %v1167_v41  ;;  %v1528_v1 = vmul.f32 %v5001_v11, %v5767_v37  ;;  %v1546_v60 = vmul.f32 %v5032_v61, %v5768_v21 }
 0x1eb   :  { %3202 = vpow2.f32 %v1656_v29  ;;  %v3195_v47 = vpop.eup %3194  ;;  %v1294_v34 = vmin.f32 %v5286_v33, 0.0  ;;  %v1573_v38 = vadd.f32 %v1565_v57, %v1555_v42  ;;  %v1564_v19 = vmul.f32 %v5037_v52, %v5770_v14 }
 0x1ec   :  { %v2708_v48 = vadd.f32 -1.0, %v3195_v47  ;;  %v1203_v54 = vadd.f32 %v1195_v51, %v1185_v53  ;;  %v1536_v46 = vadd.f32 %v1528_v1, %v1518_v12  ;;  %vm1640_vm7 = vcmp.gt.f32.partialorder %v5206_v2, 0.0  ;;  %v1591_v44 = vpop.permute.xlu0 %1590  ;;  %v1874_v47 = vld [vmem:[%s5592_s4 + $0x30] sm:$0xff] }
 0x1ed   :  { %v1304_v43 = vmul.f32 1.442695, %v1294_v34  ;;  %v1629_v7 = vadd.f32 %v1596_v27, %v1573_v38  ;;  %v1176_v11 = vmul.f32 %v5060_v17, %v5767_v37  ;;  %v1166_v5 = vmul.f32 %v5057_v20, %v5780_v39  ;;  %v1879_v27 = vld [vmem:[%s5592_s4 + $0x58] sm:$0xff]  ;;  %v1878_v34 = vld [vmem:[%s5592_s4 + $0x50] sm:$0xff] }
 0x1ee   :  { %v3197_v18 = vpop.eup %3196  ;;  %v1680_v61 = vsel %vm1640_vm7, %v5206_v2, %v2708_v48  ;;  %v1221_v16 = vadd.f32 %v1213_v30, %v1203_v54  ;;  %v1554_v0 = vadd.f32 %v1546_v60, %v1536_v46  ;;  %v1194_v35 = vmul.f32 %v5064_v10, %v5768_v21  ;;  %v1875_v60 = vld [vmem:[%s5592_s4 + $0x38] sm:$0xff]  ;;  %v1882_v48 = vld [vmem:[%s5592_s4 + $0x70] sm:$0xff] }
 0x1ef   :  { %2890 = vmatprep.subr.mxu1 %v1680_v61  ;;  %v2684_v6 = vadd.f32 -1.0, %v3197_v18  ;;  %3204 = vpow2.f32 %v1304_v43  ;;  %v1645_v52 = vmin.f32 %v1629_v7, 0.0  ;;  %vm1288_vm8 = vcmp.gt.f32.partialorder %v5226_v62, 0.0  ;;  %v1883_v38 = vld [vmem:[%s5592_s4 + $0x78] sm:$0xff]  ;;  %v1886_v46 = vld [vmem:[%s5592_s4 + $0x90] sm:$0xff] }
 0x1f0   :  { %v1277_v56 = vadd.f32 %v1244_v49, %v1221_v16  ;;  %v1572_v37 = vadd.f32 %v1564_v19, %v1554_v0  ;;  %v1184_v28 = vadd.f32 %v1176_v11, %v1166_v5  ;;  %v1212_v20 = vmul.f32 %v5073_v4, %v5770_v14  ;;  %v1887_v54 = vld [vmem:[%s5592_s4 + $0x98] sm:$0xff]  ;;  %v1890_v43 = vld [vmem:[%s5592_s4 + $0xb0] sm:$0xff] }
 0x1f1   :  { %v3199_v17 = vpop.eup %3198  ;;  %v1328_v2 = vsel %vm1288_vm8, %v5226_v62, %v2684_v6  ;;  %v1654_v15 = vmul.f32 1.442695, %v1645_v52  ;;  %vm1639_vm9 = vcmp.gt.f32.partialorder %v5241_v55, 0.0  ;;  %vm1287_vm10 = vcmp.gt.f32.partialorder %v5253_v59, 0.0  ;;  %v1891_v19 = vld [vmem:[%s5592_s4 + $0xb8] sm:$0xff]  ;;  %v1894_v11 = vld [vmem:[%s5592_s4 + $0xd0] sm:$0xff] }
 0x1f2   :  { %2891 = vmatpush3.msra.mxu1 %v1328_v2  ;;  %v2707_v58 = vadd.f32 -1.0, %v3199_v17  ;;  %v1293_v32 = vmin.f32 %v1277_v56, 0.0  ;;  %v1628_v9 = vadd.f32 %v1591_v44, %v1572_v37  ;;  %v1202_v21 = vadd.f32 %v1194_v35, %v1184_v28  ;;  %v1899_v18 = vld [vmem:[%s5592_s4 + $0xf8] sm:$0xff]  ;;  %v1898_v61 = vld [vmem:[%s5592_s4 + $0xf0] sm:$0xff] }
 0x1f3   :  { %3206 = vpow2.f32 %v1654_v15  ;;  %vm1638_vm11 = vcmp.gt.f32.partialorder %v5263_v26, 0.0  ;;  %vm1286_vm12 = vcmp.gt.f32.partialorder %v5286_v33, 0.0  ;;  %vm1637_vm13 = vcmp.gt.f32.partialorder %v1629_v7, 0.0  ;;  %v1903_v16 = vld [vmem:[%s5592_s4 + $0x118] sm:$0xff]  ;;  %v1902_v0 = vld [vmem:[%s5592_s4 + $0x110] sm:$0xff] }
 0x1f4   :  { %v1679_v50 = vsel %vm1639_vm9, %v5241_v55, %v2707_v58  ;;  %v1302_v3 = vmul.f32 1.442695, %v1293_v32  ;;  %v1644_v23 = vmin.f32 %v1628_v9, 0.0  ;;  %v1220_v36 = vadd.f32 %v1212_v20, %v1202_v21  ;;  %v1907_v5 = vld [vmem:[%s5592_s4 + $0x138] sm:$0xff]  ;;  %v1906_v49 = vld [vmem:[%s5592_s4 + $0x130] sm:$0xff] }
 0x1f5   :  { %v3201_v10 = vpop.eup %3200  ;;  %2892 = vmatprep.subr.mxu1 %v1679_v50  ;;  %vm1285_vm14 = vcmp.gt.f32.partialorder %v1277_v56, 0.0  ;;  %vm1636_vm15 = vcmp.gt.f32.partialorder %v1628_v9, 0.0  ;;  %v1911_v6 = vld [vmem:[%s5592_s4 + $0x158] sm:$0xff]  ;;  %v1910_v52 = vld [vmem:[%s5592_s4 + $0x150] sm:$0xff]  ;;  %vm3267_vm1 = vmmov 0  }
 0x1f6   :  { %v2683_v62 = vadd.f32 -1.0, %v3201_v10  ;;  %3208 = vpow2.f32 %v1302_v3  ;;  %v1652_v14 = vmul.f32 1.442695, %v1644_v23  ;;  %v1276_v45 = vadd.f32 %v1239_v25, %v1220_v36  ;;  %v1915_v35 = vld [vmem:[%s5592_s4 + $0x178] sm:$0xff]  ;;  %v1918_v17 = vld [vmem:[%s5592_s4 + $0x190] sm:$0xff] }
 0x1f7   :  { %v1919_v37 = vld [vmem:[%s5592_s4 + $0x198] sm:$0xff]  ;;  %v1922_v2 = vld [vmem:[%s5592_s4 + $0x1b0] sm:$0xff] }
 0x1f8   :  { %v3203_v4 = vpop.eup %3202  ;;  %v1327_v63 = vsel %vm1287_vm10, %v5253_v59, %v2683_v62  ;;  %3210 = vpow2.f32 %v1652_v14  ;;  %v1292_v55 = vmin.f32 %v1276_v45, 0.0  ;;  %vm1284_vm0 = vcmp.gt.f32.partialorder %v1276_v45, 0.0  ;;  %v1923_v44 = vld [vmem:[%s5592_s4 + $0x1b8] sm:$0xff]  ;;  %v1926_v28 = vld [vmem:[%s5592_s4 + $0x1d0] sm:$0xff] }
 0x1f9   :  { %2893 = vmatpush3.msra.mxu1 %v1327_v63  ;;  %v2706_v8 = vadd.f32 -1.0, %v3203_v4  ;;  %v1927_v15 = vld [vmem:[%s5592_s4 + $0x1d8] sm:$0xff]  ;;  %v1930_v58 = vld [vmem:[%s5592_s4 + $0x1f0] sm:$0xff] }
 0x1fa   :  { %v1300_v24 = vmul.f32 1.442695, %v1292_v55  ;;  %v1931_v20 = vld [vmem:[%s5592_s4 + $0x1f8] sm:$0xff] }
 0x1fb   :  { %v1678_v57 = vsel %vm1638_vm11, %v5263_v26, %v2706_v8 }
 0x1fc   :  { %2894 = vmatprep.subr.mxu1 %v1678_v57  ;;  %v3205_v40 = vpop.eup %3204  ;;  %3212 = vpow2.f32 %v1300_v24 }
 0x1fd   :  { %v2682_v41 = vadd.f32 -1.0, %v3205_v40 }
 0x1ff   :  { %v1326_v22 = vsel %vm1286_vm12, %v5286_v33, %v2682_v41  ;;  %v1870_v33 = vld [vmem:[%s5592_s4 + $0x10] sm:$0xff] }
 0x200   :  { %v3207_v13 = vpop.eup %3206  ;;  %2895 = vmatpush3.msra.mxu1 %v1326_v22 }
 0x201   :  { %v2705_v59 = vadd.f32 -1.0, %v3207_v13 }
 0x203   :  { %v3209_v29 = vpop.eup %3208  ;;  %v1677_v31 = vsel %vm1637_vm13, %v1629_v7, %v2705_v59  ;;  %v1895_v7 = vld [vmem:[%s5592_s4 + $0xd8] sm:$0xff] }
 0x204   :  { %2896 = vmatprep.subr.mxu1 %v1677_v31  ;;  %v2681_v51 = vadd.f32 -1.0, %v3209_v29 }
 0x205   :  { %v3211_v42 = vpop.eup %3210 }
 0x206   :  { %v1325_v26 = vsel %vm1285_vm14, %v1277_v56, %v2681_v51  ;;  %v2704_v30 = vadd.f32 -1.0, %v3211_v42  ;;  %v1914_v56 = vld [vmem:[%s5592_s4 + $0x170] sm:$0xff] }
 0x207   :  { %2897 = vmatpush3.msra.mxu1 %v1325_v26 }
 0x208   :  { %v1676_v39 = vsel %vm1636_vm15, %v1628_v9, %v2704_v30 }
 0x209   :  { %2898 = vmatprep.subr.mxu1 %v1676_v39  ;;  %v3213_v12 = vpop.eup %3212 }
 0x20a   :  { %v2680_v53 = vadd.f32 -1.0, %v3213_v12 }
 0x20c   :  { %v1324_v1 = vsel %vm1284_vm0, %v1276_v45, %v2680_v53 }
 0x20d   :  { %2899 = vmatpush3.msra.mxu1 %v1324_v1 }
 0x20e   :  { %2302 = vmatmul.mubr.f32.vlgmr.msra.gmra.mxu1 %v1870_v33 }
 0x20f   :  { %2306 = vmatprep.mubr.f32.mxu1 %v1875_v60 }
 0x212   :  { %2307 = vmatmul.mubr.f32.gmra.mxu1 %v1874_v47 }
 0x213   :  { %2311 = vmatprep.mubr.f32.mxu1 %v1879_v27 }
 0x216   :  { %2312 = vmatmul.mubr.f32.gmra.mxu1 %v1878_v34 }
 0x217   :  { %2316 = vmatprep.mubr.f32.mxu1 %v1883_v38 }
 0x21a   :  { %2317 = vmatmul.mubr.f32.gmra.mxu1 %v1882_v48 }
 0x21b   :  { %2321 = vmatprep.mubr.f32.mxu1 %v1887_v54 }
 0x21e   :  { %2322 = vmatmul.mubr.f32.gmra.mxu1 %v1886_v46 }
 0x21f   :  { %2326 = vmatprep.mubr.f32.mxu1 %v1891_v19 }
 0x222   :  { %2327 = vmatmul.mubr.f32.gmra.mxu1 %v1890_v43  ;;  %v3266_v43 = vmov 0.0  }
 0x223   :  { %2331 = vmatprep.mubr.f32.mxu1 %v1895_v7  ;;  %3045 = vmatprep.subr.mxu0 %v3266_v43 }
 0x224   :  { %3077 = vmatprep.mubr.msk.f32.mxu0 %vm3267_vm1, %v3266_v43 }
 0x226   :  { %2332 = vmatmul.mubr.f32.gmra.mxu1 %v1894_v11 }
 0x227   :  { %2336 = vmatprep.mubr.f32.mxu1 %v1899_v18  ;;  %v5443_v18 = vpop.permute.xlu1 %2084 }
 0x22a   :  { %2337 = vmatmul.mubr.f32.gmra.mxu1 %v1898_v61  ;;  %v5445_v61 = vpop.permute.xlu0 %2089 }
 0x22b   :  { %2341 = vmatprep.mubr.f32.mxu1 %v1903_v16  ;;  %v5447_v16 = vpop.permute.xlu1 %2074 }
 0x22e   :  { %2342 = vmatmul.mubr.f32.gmra.mxu1 %v1902_v0  ;;  %v2080_v0 = vpop.permute.xlu0 %2079 }
 0x22f   :  { %2346 = vmatprep.mubr.f32.mxu1 %v1907_v5  ;;  %v5449_v5 = vpop.permute.xlu1 %2064 }
 0x232   :  { %2347 = vmatmul.mubr.f32.gmra.mxu1 %v1906_v49  ;;  %v5451_v49 = vpop.permute.xlu0 %2069 }
 0x233   :  { %2351 = vmatprep.mubr.f32.mxu1 %v1911_v6  ;;  %v5453_v6 = vpop.permute.xlu1 %2054 }
 0x236   :  { %2352 = vmatmul.mubr.f32.gmra.mxu1 %v1910_v52  ;;  %v5455_v52 = vpop.permute.xlu0 %2059 }
 0x237   :  { %2356 = vmatprep.mubr.f32.mxu1 %v1915_v35  ;;  %v5457_v35 = vpop.permute.xlu1 %2044 }
 0x23a   :  { %2357 = vmatmul.mubr.f32.gmra.mxu1 %v1914_v56  ;;  %v5459_v56 = vpop.permute.xlu0 %2049 }
 0x23b   :  { %2361 = vmatprep.mubr.f32.mxu1 %v1919_v37  ;;  %v2035_v37 = vpop.permute.xlu1 %2034 }
 0x23e   :  { %2362 = vmatmul.mubr.f32.gmra.mxu1 %v1918_v17 }
 0x23f   :  { %2366 = vmatprep.mubr.f32.mxu1 %v1923_v44  ;;  %v5462_v44 = vpop.permute.xlu0 %2039 }
 0x242   :  { %2367 = vmatmul.mubr.f32.gmra.mxu1 %v1922_v2  ;;  %v2025_v2 = vpop.permute.xlu1 %2024 }
 0x243   :  { %2371 = vmatprep.mubr.f32.mxu1 %v1927_v15 }
 0x246   :  { %2372 = vmatmul.mubr.f32.gmra.mxu1 %v1926_v28  ;;  %v2030_v28 = vpop.permute.xlu0 %2029 }
 0x247   :  { %2376 = vmatprep.mubr.f32.mxu1 %v1931_v20 }
 0x24a   :  { %2377 = vmatmul.mubr.f32.gmra.mxu1 %v1930_v58  ;;  %v2015_v58 = vpop.permute.xlu1 %2014 }
 0x25c   :  { %v2820_v32 = vpop.f32.mrf.mxu1 }
 0x25e   :  { %v2821_v9 = vpop.f32.mrf.mxu1 }
 0x25f   :  { %v5412_v21 = vadd.f32 %v2821_v9, %v2820_v32 }
 0x260   :  { %v2823_v10 = vpop.f32.mrf.mxu1 }
 0x261   :  { %v2159_v9 = vadd.f32 %v5412_v21, %v2015_v58 }
 0x262   :  { %v2824_v50 = vpop.f32.mrf.mxu1 }
 0x263   :  { %v5414_v3 = vadd.f32 %v2824_v50, %v2823_v10 }
 0x264   :  { %v2826_v23 = vpop.f32.mrf.mxu1 }
 0x266   :  { %v2827_v62 = vpop.f32.mrf.mxu1 }
 0x267   :  { %v5416_v36 = vadd.f32 %v2827_v62, %v2826_v23  ;;  %v2020_v62 = vpop.permute.xlu0 %2019 }
 0x268   :  { %v2829_v25 = vpop.f32.mrf.mxu1 }
 0x26a   :  { %v2830_v14 = vpop.f32.mrf.mxu1 }
 0x26b   :  { %v5418_v4 = vadd.f32 %v2830_v14, %v2829_v25  ;;  %v2164_v14 = vadd.f32 %v5414_v3, %v2020_v62 }
 0x26c   :  { %v2832_v63 = vpop.f32.mrf.mxu1 }
 0x26e   :  { %v2833_v45 = vpop.f32.mrf.mxu1 }
 0x26f   :  { %v5420_v8 = vadd.f32 %v2833_v45, %v2832_v63 }
 0x270   :  { %v2835_v55 = vpop.f32.mrf.mxu1 }
 0x271   :  { %v2179_v3 = vadd.f32 %v5420_v8, %v2035_v37 }
 0x272   :  { %v2836_v57 = vpop.f32.mrf.mxu1 }
 0x273   :  { %v5422_v24 = vadd.f32 %v2836_v57, %v2835_v55 }
 0x275   :  { %v2838_v40 = vpop.f32.mrf.mxu1 }
 0x277   :  { %v2839_v41 = vpop.f32.mrf.mxu1 }
 0x278   :  { %v5424_v22 = vadd.f32 %v2839_v41, %v2838_v40  ;;  %v2169_v40 = vadd.f32 %v5416_v36, %v2025_v2 }
 0x279   :  { %v2841_v13 = vpop.f32.mrf.mxu1 }
 0x27b   :  { %v2842_v59 = vpop.f32.mrf.mxu1 }
 0x27c   :  { %v5426_v29 = vadd.f32 %v2842_v59, %v2841_v13 }
 0x27d   :  { %v2844_v31 = vpop.f32.mrf.mxu1 }
 0x27f   :  { %v2845_v51 = vpop.f32.mrf.mxu1 }
 0x280   :  { %v5428_v42 = vadd.f32 %v2845_v51, %v2844_v31  ;;  %v2174_v31 = vadd.f32 %v5418_v4, %v2030_v28 }
 0x281   :  { %v2847_v26 = vpop.f32.mrf.mxu1 }
 0x283   :  { %v2848_v30 = vpop.f32.mrf.mxu1 }
 0x284   :  { %v5430_v39 = vadd.f32 %v2848_v30, %v2847_v26 }
 0x285   :  { %v2850_v12 = vpop.f32.mrf.mxu1 }
 0x287   :  { %v2851_v53 = vpop.f32.mrf.mxu1 }
 0x288   :  { %v5432_v33 = vadd.f32 %v2851_v53, %v2850_v12 }
 0x289   :  { %v2853_v1 = vpop.f32.mrf.mxu1 }
 0x28b   :  { %v2854_v60 = vpop.f32.mrf.mxu1 }
 0x28c   :  { %v5434_v47 = vadd.f32 %v2854_v60, %v2853_v1 }
 0x28e   :  { %v2856_v27 = vpop.f32.mrf.mxu1 }
 0x290   :  { %v2857_v34 = vpop.f32.mrf.mxu1 }
 0x291   :  { %v5436_v38 = vadd.f32 %v2857_v34, %v2856_v27 }
 0x292   :  { %v2859_v48 = vpop.f32.mrf.mxu1 }
 0x294   :  { %v2860_v54 = vpop.f32.mrf.mxu1 }
 0x295   :  { %v5438_v46 = vadd.f32 %v2860_v54, %v2859_v48 }
 0x296   :  { %v2862_v19 = vpop.f32.mrf.mxu1 }
 0x297   :  { %v2224_v62 = vadd.f32 %v5438_v46, %v2080_v0 }
 0x298   :  { %v2863_v7 = vpop.f32.mrf.mxu1 }
 0x299   :  { %v5441_v11 = vadd.f32 %v2863_v7, %v2862_v19 }
 0x29a   :  { %v2865_v17 = vpop.f32.mrf.mxu1 }
 0x29c   :  { %v2866_v15 = vpop.f32.mrf.mxu1 }
 0x2ce   :  { %v2900_v20 = vpop.f32.mrf.mxu1 }
 0x2d0   :  { %v2901_v32 = vpop.f32.mrf.mxu1 }
 0x2d1   :  { %v2902_v10 = vadd.f32 %v2901_v32, %v2900_v20 }
 0x2d2   :  { %v2903_v50 = vpop.f32.mrf.mxu1 }
 0x2d3   :  { %v5465_v23 = vadd.f32 %v2902_v10, %v2159_v9 }
 0x2d4   :  { %v2904_v25 = vpop.f32.mrf.mxu1 }
 0x2d5   :  { %v2905_v63 = vadd.f32 %v2904_v25, %v2903_v50  ;;  %vm2382_vm1 = vcmp.gt.f32.partialorder %v5465_v23, 0.0 }
 0x2d6   :  { %v2906_v45 = vpop.f32.mrf.mxu1 }
 0x2d7   :  { %v5468_v55 = vadd.f32 %v2905_v63, %v2164_v14  ;;  %v2867_v63 = vadd.f32 %v2866_v15, %v2865_v17  ;;  %v2209_v17 = vadd.f32 %v5432_v33, %v5449_v5 }
 0x2d8   :  { %v2907_v57 = vpop.f32.mrf.mxu1 }
 0x2d9   :  { %v2908_v41 = vadd.f32 %v2907_v57, %v2906_v45  ;;  %v2234_v15 = vadd.f32 %v2867_v63, %v5445_v61  ;;  %v2199_v61 = vadd.f32 %v5428_v42, %v5453_v6  ;;  %v2189_v42 = vadd.f32 %v5424_v22, %v5457_v35 }
 0x2da   :  { %v2909_v13 = vpop.f32.mrf.mxu1  ;;  %vm2383_vm0 = vcmp.gt.f32.partialorder %v5468_v55, 0.0 }
 0x2db   :  { %v5471_v59 = vadd.f32 %v2908_v41, %v2169_v40  ;;  %v2219_v40 = vadd.f32 %v5436_v38, %v5447_v16  ;;  %v2229_v41 = vadd.f32 %v5441_v11, %v5443_v18 }
 0x2dc   :  { %v2910_v21 = vpop.f32.mrf.mxu1 }
 0x2dd   :  { %v2911_v51 = vadd.f32 %v2910_v21, %v2909_v13  ;;  %vm2384_vm15 = vcmp.gt.f32.partialorder %v5471_v59, 0.0 }
 0x2de   :  { %v2912_v26 = vpop.f32.mrf.mxu1 }
 0x2df   :  { %v5474_v30 = vadd.f32 %v2911_v51, %v2174_v31  ;;  %v2214_v51 = vadd.f32 %v5434_v47, %v5451_v49  ;;  %v2204_v47 = vadd.f32 %v5430_v39, %v5455_v52  ;;  %v2194_v39 = vadd.f32 %v5426_v29, %v5459_v56 }
 0x2e0   :  { %v2913_v12 = vpop.f32.mrf.mxu1  ;;  %v2184_v29 = vadd.f32 %v5422_v24, %v5462_v44 }
 0x2e1   :  { %v2914_v53 = vadd.f32 %v2913_v12, %v2912_v26  ;;  %v2401_v63 = vmin.f32 %v5474_v30, 0.0  ;;  %vm2385_vm14 = vcmp.gt.f32.partialorder %v5474_v30, 0.0 }
 0x2e2   :  { %v5477_v1 = vpop.f32.mrf.mxu1 }
 0x2e3   :  { %v5479_v60 = vadd.f32 %v2914_v53, %v2179_v3 }
 0x2e4   :  { %v2916_v36 = vpop.f32.mrf.mxu1 }
 0x2e5   :  { %v2917_v6 = vadd.f32 %v2916_v36, %v5477_v1  ;;  %v2402_v24 = vmin.f32 %v5479_v60, 0.0  ;;  %vm2386_vm13 = vcmp.gt.f32.partialorder %v5479_v60, 0.0 }
 0x2e6   :  { %v2918_v27 = vpop.f32.mrf.mxu1 }
 0x2e8   :  { %v2919_v34 = vpop.f32.mrf.mxu1 }
 0x2e9   :  { %v2920_v52 = vadd.f32 %v2919_v34, %v2918_v27 }
 0x2ea   :  { %v2921_v48 = vpop.f32.mrf.mxu1 }
 0x2eb   :  { %v5524_v56 = vadd.f32 %v2920_v52, %v2189_v42 }
 0x2ec   :  { %v2922_v54 = vpop.f32.mrf.mxu1 }
 0x2ed   :  { %v2404_v1 = vmin.f32 %v5524_v56, 0.0  ;;  %vm2388_vm11 = vcmp.gt.f32.partialorder %v5524_v56, 0.0 }
 0x2ee   :  { %v2924_v19 = vpop.f32.mrf.mxu1 }
 0x2ef   :  { %v2426_v44 = vmul.f32 1.442695, %v2404_v1 }
 0x2f0   :  { %v2925_v7 = vpop.f32.mrf.mxu1 }
 0x2f1   :  { %v2926_v49 = vadd.f32 %v2925_v7, %v2924_v19 }
 0x2f2   :  { %v2927_v4 = vpop.f32.mrf.mxu1 }
 0x2f3   :  { %v5513_v19 = vadd.f32 %v2926_v49, %v2199_v61 }
 0x2f4   :  { %v2928_v2 = vpop.f32.mrf.mxu1 }
 0x2f5   :  { %v2929_v11 = vadd.f32 %v2928_v2, %v2927_v4  ;;  %v2923_v4 = vadd.f32 %v2922_v54, %v2921_v48  ;;  %v2406_v27 = vmin.f32 %v5513_v19, 0.0  ;;  %vm2390_vm9 = vcmp.gt.f32.partialorder %v5513_v19, 0.0 }
 0x2f6   :  { %v2930_v28 = vpop.f32.mrf.mxu1 }
 0x2f7   :  { %v5508_v2 = vadd.f32 %v2929_v11, %v2204_v47  ;;  %v5519_v48 = vadd.f32 %v2923_v4, %v2194_v39  ;;  %v2430_v36 = vmul.f32 1.442695, %v2406_v27  ;;  %v2398_v11 = vmin.f32 %v5465_v23, 0.0 }
 0x2f8   :  { %v2931_v20 = vpop.f32.mrf.mxu1 }
 0x2f9   :  { %v2932_v26 = vadd.f32 %v2931_v20, %v2930_v28  ;;  %v2407_v54 = vmin.f32 %v5508_v2, 0.0  ;;  %v2405_v22 = vmin.f32 %v5519_v48, 0.0  ;;  %vm2391_vm8 = vcmp.gt.f32.partialorder %v5508_v2, 0.0 }
 0x2fa   :  { %v2933_v58 = vpop.f32.mrf.mxu1  ;;  %vm2389_vm10 = vcmp.gt.f32.partialorder %v5519_v48, 0.0 }
 0x2fb   :  { %v5503_v53 = vadd.f32 %v2932_v26, %v2209_v17  ;;  %v2432_v35 = vmul.f32 1.442695, %v2407_v54  ;;  %v2399_v26 = vmin.f32 %v5468_v55, 0.0  ;;  %v2420_v17 = vmul.f32 1.442695, %v2401_v63 }
 0x2fc   :  { %v2934_v32 = vpop.f32.mrf.mxu1 }
 0x2fd   :  { %v2935_v13 = vadd.f32 %v2934_v32, %v2933_v58  ;;  %v2408_v7 = vmin.f32 %v5503_v53, 0.0  ;;  %vm2392_vm7 = vcmp.gt.f32.partialorder %v5503_v53, 0.0 }
 0x2fe   :  { %v2936_v9 = vpop.f32.mrf.mxu1 }
 0x2ff   :  { %v5498_v18 = vadd.f32 %v2935_v13, %v2214_v51  ;;  %v2434_v34 = vmul.f32 1.442695, %v2408_v7  ;;  %v2422_v13 = vmul.f32 1.442695, %v2402_v24 }
 0x300   :  { %v2937_v8 = vpop.f32.mrf.mxu1 }
 0x301   :  { %v2938_v14 = vadd.f32 %v2937_v8, %v2936_v9  ;;  %v2409_v58 = vmin.f32 %v5498_v18, 0.0  ;;  %vm2393_vm6 = vcmp.gt.f32.partialorder %v5498_v18, 0.0 }
 0x302   :  { %v2939_v37 = vpop.f32.mrf.mxu1 }
 0x303   :  { %v5490_v46 = vadd.f32 %v2938_v14, %v2219_v40 }
 0x304   :  { %v2940_v10 = vpop.f32.mrf.mxu1 }
 0x305   :  { %v2941_v50 = vadd.f32 %v2940_v10, %v2939_v37  ;;  %v2410_v28 = vmin.f32 %v5490_v46, 0.0  ;;  %v2436_v37 = vmul.f32 1.442695, %v2409_v58  ;;  %v5527_v10 = vadd.f32 %v2917_v6, %v2184_v29 }
 0x306   :  { %v2942_v25 = vpop.f32.mrf.mxu1  ;;  %vm2394_vm5 = vcmp.gt.f32.partialorder %v5490_v46, 0.0 }
 0x307   :  { %v5482_v45 = vadd.f32 %v2941_v50, %v2224_v62  ;;  %v2438_v9 = vmul.f32 1.442695, %v2410_v28  ;;  %v2403_v50 = vmin.f32 %v5527_v10, 0.0  ;;  %v2428_v62 = vmul.f32 1.442695, %v2405_v22 }
 0x308   :  { %v2943_v57 = vpop.f32.mrf.mxu1  ;;  %v2416_v28 = vmul.f32 1.442695, %v2399_v26  ;;  %vm2387_vm12 = vcmp.gt.f32.partialorder %v5527_v10, 0.0 }
 0x309   :  { %v2944_v21 = vadd.f32 %v2943_v57, %v2942_v25  ;;  %v2411_v38 = vmin.f32 %v5482_v45, 0.0  ;;  %v2424_v57 = vmul.f32 1.442695, %v2403_v50  ;;  %vm2395_vm4 = vcmp.gt.f32.partialorder %v5482_v45, 0.0 }
 0x30a   :  { %v2945_v31 = vpop.f32.mrf.mxu1 }
 0x30b   :  { %v5492_v0 = vadd.f32 %v2944_v21, %v2229_v41  ;;  %v2440_v20 = vmul.f32 1.442695, %v2411_v38  ;;  %v2400_v41 = vmin.f32 %v5471_v59, 0.0 }
 0x30c   :  { %v2946_v16 = vpop.f32.mrf.mxu1 }
 0x30d   :  { %v2412_v12 = vmin.f32 %v5492_v0, 0.0  ;;  %v2947_v3 = vadd.f32 %v2946_v16, %v2945_v31  ;;  %vm2396_vm3 = vcmp.gt.f32.partialorder %v5492_v0, 0.0 }
 0x30f   :  { %v2442_v33 = vmul.f32 1.442695, %v2412_v12  ;;  %v2379_v5 = vadd.f32 %v2947_v3, %v2234_v15  ;;  %v2418_v12 = vmul.f32 1.442695, %v2400_v41 }
 0x311   :  { %v2413_v32 = vmin.f32 %v2379_v5, 0.0  ;;  %3214 = vpow2.f32 %v2442_v33  ;;  %vm2397_vm2 = vcmp.gt.f32.partialorder %v2379_v5, 0.0 }
 0x312   :  { %3216 = vpow2.f32 %v2440_v20  ;;  %v2414_v20 = vmul.f32 1.442695, %v2398_v11 }
 0x313   :  { %v2444_v8 = vmul.f32 1.442695, %v2413_v32 }
 0x315   :  { %3218 = vpow2.f32 %v2444_v8 }
 0x316   :  { %3220 = vpow2.f32 %v2438_v9 }
 0x317   :  { %3222 = vpow2.f32 %v2436_v37 }
 0x318   :  { %3224 = vpow2.f32 %v2434_v34 }
 0x319   :  { %3226 = vpow2.f32 %v2432_v35 }
 0x31a   :  { %3228 = vpow2.f32 %v2430_v36 }
 0x31b   :  { %3230 = vpow2.f32 %v2428_v62 }
 0x31c   :  { %3232 = vpow2.f32 %v2426_v44 }
 0x31d   :  { %3234 = vpow2.f32 %v2424_v57 }
 0x31e   :  { %v3215_v25 = vpop.eup %3214  ;;  %3236 = vpow2.f32 %v2422_v13 }
 0x31f   :  { %v3217_v14 = vpop.eup %3216  ;;  %v2738_v31 = vadd.f32 -1.0, %v3215_v25  ;;  %3238 = vpow2.f32 %v2420_v17 }
 0x320   :  { %v2737_v38 = vadd.f32 -1.0, %v3217_v14  ;;  %3240 = vpow2.f32 %v2418_v12 }
 0x321   :  { %v2476_v3 = vsel %vm2396_vm3, %v5492_v0, %v2738_v31  ;;  %3242 = vpow2.f32 %v2416_v28 }
 0x322   :  { %v3219_v40 = vpop.eup %3218  ;;  %v2475_v33 = vsel %vm2395_vm4, %v5482_v45, %v2737_v38  ;;  %3244 = vpow2.f32 %v2414_v20 }
 0x323   :  { %v2739_v21 = vadd.f32 -1.0, %v3219_v40  ;;  %v3221_v51 = vpop.eup %3220 }
 0x324   :  { %v3223_v16 = vpop.eup %3222  ;;  %v2736_v47 = vadd.f32 -1.0, %v3221_v51 }
 0x325   :  { %v2477_v15 = vsel %vm2397_vm2, %v2379_v5, %v2739_v21  ;;  %v3225_v49 = vpop.eup %3224  ;;  %v2735_v5 = vadd.f32 -1.0, %v3223_v16  ;;  %vm2555_vm2 = vcmask 1042432  }
 0x326   :  { %3046 = vmatpush3.msra.mxu0 %v2477_v15  ;;  %v3227_v61 = vpop.eup %3226  ;;  %v2474_v0 = vsel %vm2394_vm5, %v5490_v46, %v2736_v47  ;;  %v2734_v4 = vadd.f32 -1.0, %v3225_v49 }
 0x327   :  { %3047 = vmatprep.subr.mxu0 %v3266_v43  ;;  %v3229_v58 = vpop.eup %3228  ;;  %v2473_v45 = vsel %vm2393_vm6, %v5498_v18, %v2735_v5  ;;  %v2733_v32 = vadd.f32 -1.0, %v3227_v61 }
 0x328   :  { %3048 = vmatpush3.msra.mxu0 %v2476_v3  ;;  %v3231_v39 = vpop.eup %3230  ;;  %v2472_v46 = vsel %vm2392_vm7, %v5503_v53, %v2734_v4  ;;  %v2732_v52 = vadd.f32 -1.0, %v3229_v58 }
 0x329   :  { %3049 = vmatprep.subr.mxu0 %v3266_v43  ;;  %v3233_v7 = vpop.eup %3232  ;;  %v2471_v9 = vsel %vm2391_vm8, %v5508_v2, %v2733_v32  ;;  %v2731_v18 = vadd.f32 -1.0, %v3231_v39 }
 0x32a   :  { %3050 = vmatpush3.msra.mxu0 %v2475_v33  ;;  %v3235_v8 = vpop.eup %3234  ;;  %v2470_v42 = vsel %vm2390_vm9, %v5513_v19, %v2732_v52  ;;  %v2730_v6 = vadd.f32 -1.0, %v3233_v7 }
 0x32b   :  { %3051 = vmatprep.subr.mxu0 %v3266_v43  ;;  %v3237_v53 = vpop.eup %3236  ;;  %v2469_v54 = vsel %vm2389_vm10, %v5519_v48, %v2731_v18  ;;  %v2729_v37 = vadd.f32 -1.0, %v3235_v8 }
 0x32c   :  { %3052 = vmatpush3.msra.mxu0 %v2474_v0  ;;  %v3239_v2 = vpop.eup %3238  ;;  %v2468_v29 = vsel %vm2388_vm11, %v5524_v56, %v2730_v6  ;;  %v2728_v27 = vadd.f32 -1.0, %v3237_v53 }
 0x32d   :  { %3053 = vmatprep.subr.mxu0 %v3266_v43  ;;  %v3241_v19 = vpop.eup %3240  ;;  %v2467_v34 = vsel %vm2387_vm12, %v5527_v10, %v2729_v37  ;;  %v2727_v22 = vadd.f32 -1.0, %v3239_v2 }
 0x32e   :  { %3054 = vmatpush3.msra.mxu0 %v2473_v45  ;;  %v3243_v48 = vpop.eup %3242  ;;  %v2466_v35 = vsel %vm2386_vm13, %v5479_v60, %v2728_v27  ;;  %v2726_v1 = vadd.f32 -1.0, %v3241_v19 }
 0x32f   :  { %3055 = vmatprep.subr.mxu0 %v3266_v43  ;;  %v3245_v56 = vpop.eup %3244  ;;  %v2465_v36 = vsel %vm2385_vm14, %v5474_v30, %v2727_v22  ;;  %v2725_v50 = vadd.f32 -1.0, %v3243_v48  ;;  %v2478_v30 = vld [vmem:[%s5594_s6] sm:$0x7] }
 0x330   :  { %3056 = vmatpush3.msra.mxu0 %v2472_v46  ;;  %v2464_v10 = vsel %vm2384_vm15, %v5471_v59, %v2726_v1  ;;  %v2724_v62 = vadd.f32 -1.0, %v3245_v56  ;;  %v2483_v59 = vpop.permute.xlu0 %2482 }
 0x331   :  { %3057 = vmatprep.subr.mxu0 %v3266_v43  ;;  %v2463_v60 = vsel %vm2383_vm0, %v5468_v55, %v2725_v50 }
 0x332   :  { %3058 = vmatpush3.msra.mxu0 %v2471_v9  ;;  %v2462_v24 = vsel %vm2382_vm1, %v5465_v23, %v2724_v62 }
 0x333   :  { %3059 = vmatprep.subr.mxu0 %v3266_v43 }
 0x334   :  { %3060 = vmatpush3.msra.mxu0 %v2470_v42 }
 0x335   :  { %3061 = vmatprep.subr.mxu0 %v3266_v43 }
 0x336   :  { %3062 = vmatpush3.msra.mxu0 %v2469_v54 }
 0x337   :  { %3063 = vmatprep.subr.mxu0 %v3266_v43 }
 0x338   :  { %3064 = vmatpush3.msra.mxu0 %v2468_v29 }
 0x339   :  { %3065 = vmatprep.subr.mxu0 %v3266_v43 }
 0x33a   :  { %3066 = vmatpush3.msra.mxu0 %v2467_v34 }
 0x33b   :  { %3067 = vmatprep.subr.mxu0 %v3266_v43 }
 0x33c   :  { %3068 = vmatpush3.msra.mxu0 %v2466_v35 }
 0x33d   :  { %3069 = vmatprep.subr.mxu0 %v3266_v43 }
 0x33e   :  { %3070 = vmatpush3.msra.mxu0 %v2465_v36 }
 0x33f   :  { %3071 = vmatprep.subr.mxu0 %v3266_v43 }
 0x340   :  { %3072 = vmatpush3.msra.mxu0 %v2464_v10 }
 0x341   :  { %3073 = vmatprep.subr.mxu0 %v3266_v43 }
 0x342   :  { %3074 = vmatpush3.msra.mxu0 %v2463_v60 }
 0x343   :  { %3075 = vmatprep.subr.mxu0 %v3266_v43 }
 0x344   :  { %3076 = vmatpush3.msra.mxu0 %v2462_v24 }
 0x345   :  { %3078 = vmatmul.mubr.f32.vlgmr.msra.gmra.mxu0 %v2478_v30 }
 0x405   :  { %v2551_v44 = vpop.f32.mrf.mxu0 }
 0x406   :  { %v2552_v25 = vadd.f32 %v2551_v44, %v2483_v59 }
 0x407   :  { %v3079_v14 = vpop.f32.mrf.mxu0 }
 0x408   :  { %v2556_v63 = vsel %vm2555_vm2, %v2552_v25, -inf }
 0x409   :  { %v2557_v55 = vrot.slane %v2556_v63, 4 }
 0x40b   :  { %v2558_v57 = vmax.f32 %v2556_v63, %v2557_v55 }
 0x40d   :  { %v2559_v40 = vrot.slane %v2558_v57, 2 }
 0x40f   :  { %v2560_v41 = vmax.f32 %v2558_v57, %v2559_v40 }
 0x411   :  { %v2561_v13 = vrot.slane %v2560_v41, 1 }
 0x413   :  { %v2562_v21 = vmax.f32 %v2560_v41, %v2561_v13 }
 0x415   :  { %v2563_v31 = vsub.f32 %v2552_v25, %v2562_v21 }
 0x417   :  { %v2564_v51 = vmul.f32 1.442695, %v2563_v31 }
 0x419   :  { %3246 = vpow2.f32 %v2564_v51 }
 0x426   :  { %v3247_v43 = vpop.eup %3246 }
 0x427   :  { %v2566_v26 = vsel %vm2555_vm2, %v3247_v43, 0.0 }
 0x428   :  { %v2567_v23 = vrot.slane %v2566_v26, 4 }
 0x42a   :  { %v2568_v17 = vadd.f32 %v2567_v23, %v2566_v26 }
 0x42c   :  { %v2569_v15 = vrot.slane %v2568_v17, 2 }
 0x42e   :  { %v2570_v38 = vadd.f32 %v2569_v15, %v2568_v17 }
 0x430   :  { %v2571_v16 = vrot.slane %v2570_v38, 1 }
 0x432   :  { %v2572_v11 = vadd.f32 %v2571_v16, %v2570_v38 }
 0x434   :  { %3248 = vrcp.f32 %v2572_v11 }
 0x441   :  { %v3249_v12 = vpop.eup %3248 }
 0x442   :  { %v2574_v3 = vmul.f32 %v3249_v12, %v3247_v43 }
 0x444   :  { %2575 = vst [vmem:[%s5596_s8] sm:$0x7] %v2574_v3 }
 0x445   :  { %2580 = vsyncpa [#allocation4], 1 }

</bundles_post_ra>
